<compile_context>
chip_gen: v7x
topology: tpu7x:2x2x1
jax: 0.10.0
libtpu: 0.0.40
codegen_flags: <defaults>
</compile_context>

<pallas_src>
import functools

import jax
import jax.numpy as jnp
from jax.experimental import pallas as pl
from jax.experimental.pallas import tpu as pltpu


def _conv_block(x_val, pad_ref, w_ref, s_ref, b_ref):
    """conv3x3(pad=1) + folded BN(eval) + ReLU + maxpool(2) for one image.

    x_val  : (H, W, Cin)  f32 value (VMEM resident)
    pad_ref: (H+2, W+2, Cin) VMEM scratch used for the zero halo
    w_ref  : (3, 3, Cin, Cout)  conv weights (HWIO)
    s_ref  : (1, Cout)  folded BN scale
    b_ref  : (1, Cout)  folded bias
    returns (H//2, W//2, Cout) f32 value
    """
    H, W, Cin = x_val.shape
    Cout = w_ref.shape[-1]

    # In-kernel zero padding (halo) in VMEM scratch.
    pad_ref[...] = jnp.zeros_like(pad_ref)
    pad_ref[1:H + 1, 1:W + 1, :] = x_val

    # 3x3 conv as 9 accumulated MXU matmuls.  The 3 width-shifted copies are
    # materialized once (dw loop); the dh shifts are cheap contiguous row
    # slices of the flattened ((H+2)*W, Cin) view.
    acc = jnp.zeros((H * W, Cout), dtype=jnp.float32)
    for dw in range(3):
        xw = pad_ref[:, dw:dw + W, :].reshape((H + 2) * W, Cin)
        for dh in range(3):
            lhs = xw[dh * W:(dh + H) * W, :]                  # (H*W, Cin)
            acc = acc + jnp.dot(lhs, w_ref[dh, dw, :, :],
                                preferred_element_type=jnp.float32)

    # BatchNorm (eval, folded with conv bias) + ReLU.
    y = jnp.maximum(acc * s_ref[...] + b_ref[...], 0.0)       # (H*W, Cout)

    # MaxPool2d(2): pool width, then height (channels stay on the lane axis).
    y3 = y.reshape(H, W, Cout)
    yw = y3.reshape(H, W // 2, 2, Cout).max(axis=2)           # (H, W/2, C)
    yh = yw.reshape(H // 2, 2, W // 2, Cout).max(axis=1)      # (H/2, W/2, C)
    return yh


def _convnet_kernel(x_ref,
                    w1, s1, b1, w2, s2, b2, w3, s3, b3, w4, s4, b4,
                    o_ref,
                    p1, p2, p3, p4):
    # x_ref: (1, H, W, Cin) for one image; o_ref: (1, H/16, W/16, Cout).
    a = x_ref[0, :, :, :]
    a = _conv_block(a, p1, w1, s1, b1)
    a = _conv_block(a, p2, w2, s2, b2)
    a = _conv_block(a, p3, w3, s3, b3)
    a = _conv_block(a, p4, w4, s4, b4)
    o_ref[0, :, :, :] = a.astype(o_ref.dtype)


def _convnet_pallas(x_nhwc, params):
    """Fused 4-block forward on NHWC input; one pallas_call for everything."""
    N, H, W, Cin = x_nhwc.shape
    assert H % 16 == 0 and W % 16 == 0, "spatial dims must survive 4 pools"
    assert len(params) == 4

    in_specs = [pl.BlockSpec((1, H, W, Cin), lambda n: (n, 0, 0, 0))]
    flat_params = []
    scratch_shapes = []
    h, w_sz, cin = H, W, Cin
    for (wgt, scale, bias) in params:
        cout = wgt.shape[-1]
        in_specs.append(pl.BlockSpec(wgt.shape, lambda n: (0, 0, 0, 0)))
        in_specs.append(pl.BlockSpec(scale.shape, lambda n: (0, 0)))
        in_specs.append(pl.BlockSpec(bias.shape, lambda n: (0, 0)))
        flat_params += [wgt, scale, bias]
        # Zero-halo scratch for this layer's padded input.
        scratch_shapes.append(pltpu.VMEM((h + 2, w_sz + 2, cin), jnp.float32))
        h, w_sz, cin = h // 2, w_sz // 2, cout
    Hf, Wf, Cout = h, w_sz, cin

    return pl.pallas_call(
        _convnet_kernel,
        out_shape=jax.ShapeDtypeStruct((N, Hf, Wf, Cout), jnp.float32),
        grid=(N,),
        in_specs=in_specs,
        out_specs=pl.BlockSpec((1, Hf, Wf, Cout), lambda n: (n, 0, 0, 0)),
        scratch_shapes=scratch_shapes,
        compiler_params=pltpu.CompilerParams(
            dimension_semantics=("parallel",)),
    )(x_nhwc, *flat_params)


def init_convnet_params(key, x_dim=3, hid_dim=64, z_dim=64):
    """Deterministic parameter init matching the module's shapes (BN folded)."""
    dims = [(x_dim, hid_dim), (hid_dim, hid_dim),
            (hid_dim, hid_dim), (hid_dim, z_dim)]
    params = []
    eps = 1e-5
    for (cin, cout) in dims:
        key, kw, kb, kg = jax.random.split(key, 4)
        fan_in = cin * 3 * 3
        bound = 1.0 / jnp.sqrt(float(fan_in))
        w = jax.random.uniform(kw, (3, 3, cin, cout), jnp.float32,
                               -bound, bound)                 # HWIO
        conv_b = jax.random.uniform(kb, (cout,), jnp.float32, -bound, bound)
        gamma = jax.random.uniform(kg, (cout,), jnp.float32, 0.0, 1.0)
        beta = jnp.zeros((cout,), jnp.float32)
        running_mean = jnp.zeros((cout,), jnp.float32)
        running_var = jnp.ones((cout,), jnp.float32)
        # Fold BN (eval mode) with the conv bias:
        scale = gamma / jnp.sqrt(running_var + eps)
        bias = (conv_b - running_mean) * scale + beta
        params.append((w, scale.reshape(1, cout), bias.reshape(1, cout)))
    return params


@jax.jit
def convnet_forward(x_nchw, params):
    # NCHW (PyTorch) -> NHWC (kernel layout)
    x = jnp.transpose(x_nchw, (0, 2, 3, 1)).astype(jnp.float32)
    out = _convnet_pallas(x, params)
    # Back to NCHW, then flatten like x.view(x.size(0), -1)
    out = jnp.transpose(out, (0, 3, 1, 2))
    return out.reshape(out.shape[0], -1)


if __name__ == "__main__":
    key = jax.random.PRNGKey(0)
    key, kx = jax.random.split(key)

    # Small shapes consistent with the module: batch=2, x_dim=3, 16x16 images,
    # hid_dim = z_dim = 32.  After 4 pool-by-2 stages: 16 -> 8 -> 4 -> 2 -> 1.
    x = jax.random.normal(kx, (2, 3, 16, 16), dtype=jnp.float32)
    params = init_convnet_params(key, x_dim=3, hid_dim=32, z_dim=32)

    out = convnet_forward(x, params)
    out = jax.block_until_ready(out)
    assert out.shape == (2, 32), out.shape
    print("KERNEL_OK")
</pallas_src>

<mosaic_0001>
module attributes {stable_mosaic.version = 11 : i64} {
  func.func @_convnet_kernel(%arg0: i32, %arg1: memref<1x16x16x3xf32, #tpu.memory_space<vmem>>, %arg2: memref<3x3x3x32xf32, #tpu.memory_space<vmem>>, %arg3: memref<1x32xf32, #tpu.memory_space<vmem>>, %arg4: memref<1x32xf32, #tpu.memory_space<vmem>>, %arg5: memref<3x3x32x32xf32, #tpu.memory_space<vmem>>, %arg6: memref<1x32xf32, #tpu.memory_space<vmem>>, %arg7: memref<1x32xf32, #tpu.memory_space<vmem>>, %arg8: memref<3x3x32x32xf32, #tpu.memory_space<vmem>>, %arg9: memref<1x32xf32, #tpu.memory_space<vmem>>, %arg10: memref<1x32xf32, #tpu.memory_space<vmem>>, %arg11: memref<3x3x32x32xf32, #tpu.memory_space<vmem>>, %arg12: memref<1x32xf32, #tpu.memory_space<vmem>>, %arg13: memref<1x32xf32, #tpu.memory_space<vmem>>, %arg14: memref<1x1x1x32xf32, #tpu.memory_space<vmem>>, %arg15: memref<18x18x3xf32, #tpu.memory_space<vmem>>, %arg16: memref<10x10x32xf32, #tpu.memory_space<vmem>>, %arg17: memref<6x6x32xf32, #tpu.memory_space<vmem>>, %arg18: memref<4x4x32xf32, #tpu.memory_space<vmem>>) attributes {dimension_semantics = [#tpu.dimension_semantics<parallel>], iteration_bounds = array<i64: 2>, scalar_prefetch = 0 : i64, scratch_operands = 4 : i64, tpu.core_type = #tpu.core_type<tc>, window_params = [{transform_indices = @transform_0, window_bounds = array<i64: 1, 16, 16, 3>}, {pipeline_mode = #tpu.pipeline_mode<synchronous>, transform_indices = @transform_1, window_bounds = array<i64: 3, 3, 3, 32>}, {pipeline_mode = #tpu.pipeline_mode<synchronous>, transform_indices = @transform_2, window_bounds = array<i64: 1, 32>}, {pipeline_mode = #tpu.pipeline_mode<synchronous>, transform_indices = @transform_3, window_bounds = array<i64: 1, 32>}, {pipeline_mode = #tpu.pipeline_mode<synchronous>, transform_indices = @transform_4, window_bounds = array<i64: 3, 3, 32, 32>}, {pipeline_mode = #tpu.pipeline_mode<synchronous>, transform_indices = @transform_5, window_bounds = array<i64: 1, 32>}, {pipeline_mode = #tpu.pipeline_mode<synchronous>, transform_indices = @transform_6, window_bounds = array<i64: 1, 32>}, {pipeline_mode = #tpu.pipeline_mode<synchronous>, transform_indices = @transform_7, window_bounds = array<i64: 3, 3, 32, 32>}, {pipeline_mode = #tpu.pipeline_mode<synchronous>, transform_indices = @transform_8, window_bounds = array<i64: 1, 32>}, {pipeline_mode = #tpu.pipeline_mode<synchronous>, transform_indices = @transform_9, window_bounds = array<i64: 1, 32>}, {pipeline_mode = #tpu.pipeline_mode<synchronous>, transform_indices = @transform_10, window_bounds = array<i64: 3, 3, 32, 32>}, {pipeline_mode = #tpu.pipeline_mode<synchronous>, transform_indices = @transform_11, window_bounds = array<i64: 1, 32>}, {pipeline_mode = #tpu.pipeline_mode<synchronous>, transform_indices = @transform_12, window_bounds = array<i64: 1, 32>}, {transform_indices = @transform_13, window_bounds = array<i64: 1, 1, 1, 32>}]} {
    %c0 = arith.constant 0 : index
    %c0_0 = arith.constant 0 : index
    %c0_1 = arith.constant 0 : index
    %c0_2 = arith.constant 0 : index
    %0 = vector.load %arg1[%c0, %c0_0, %c0_1, %c0_2] : memref<1x16x16x3xf32, #tpu.memory_space<vmem>>, vector<1x16x16x3xf32>
    %1 = vector.shape_cast %0 : vector<1x16x16x3xf32> to vector<16x16x3xf32>
    %cst = arith.constant 0.000000e+00 : f32
    %2 = vector.broadcast %cst : f32 to vector<18x18x3xf32>
    %c0_3 = arith.constant 0 : index
    %c0_4 = arith.constant 0 : index
    %c0_5 = arith.constant 0 : index
    %3 = vector.load %arg15[%c0_3, %c0_4, %c0_5] : memref<18x18x3xf32, #tpu.memory_space<vmem>>, vector<18x18x3xf32>
    tpu.vector_store %arg15[%c0_3, %c0_4, %c0_5], %2 {strides = array<i32>} : memref<18x18x3xf32, #tpu.memory_space<vmem>>, vector<18x18x3xf32>,
    %c1 = arith.constant 1 : index
    %c1_6 = arith.constant 1 : index
    %c0_7 = arith.constant 0 : index
    %4 = vector.load %arg15[%c1, %c1_6, %c0_7] : memref<18x18x3xf32, #tpu.memory_space<vmem>>, vector<16x16x3xf32>
    tpu.vector_store %arg15[%c1, %c1_6, %c0_7], %1 {strides = array<i32>} : memref<18x18x3xf32, #tpu.memory_space<vmem>>, vector<16x16x3xf32>,
    %cst_8 = arith.constant 0.000000e+00 : f32
    %5 = vector.broadcast %cst_8 : f32 to vector<256x32xf32>
    %c0_9 = arith.constant 0 : index
    %c0_10 = arith.constant 0 : index
    %c0_11 = arith.constant 0 : index
    %6 = vector.load %arg15[%c0_9, %c0_10, %c0_11] : memref<18x18x3xf32, #tpu.memory_space<vmem>>, vector<18x16x3xf32>
    %7 = vector.shape_cast %6 : vector<18x16x3xf32> to vector<288x3xf32>
    %8 = vector.extract_strided_slice %7 {offsets = [0, 0], sizes = [256, 3], strides = [1, 1]} : vector<288x3xf32> to vector<256x3xf32>
    %c0_12 = arith.constant 0 : index
    %c0_13 = arith.constant 0 : index
    %c0_14 = arith.constant 0 : index
    %c0_15 = arith.constant 0 : index
    %9 = vector.load %arg2[%c0_12, %c0_13, %c0_14, %c0_15] : memref<3x3x3x32xf32, #tpu.memory_space<vmem>>, vector<1x1x3x32xf32>
    %10 = vector.shape_cast %9 : vector<1x1x3x32xf32> to vector<3x32xf32>
    %cst_16 = arith.constant dense<0.000000e+00> : vector<256x32xf32>
    %11 = tpu.matmul %8, %10, %cst_16 {dimension_numbers = #tpu.dot_dimension_numbers<[1], [0], [0], [1], [0, 0, 1, 1], [], []>} : vector<256x3xf32>, vector<3x32xf32>, vector<256x32xf32> -> vector<256x32xf32>
    %12 = arith.addf %5, %11 : vector<256x32xf32>
    %13 = vector.extract_strided_slice %7 {offsets = [16, 0], sizes = [256, 3], strides = [1, 1]} : vector<288x3xf32> to vector<256x3xf32>
    %c1_17 = arith.constant 1 : index
    %c0_18 = arith.constant 0 : index
    %c0_19 = arith.constant 0 : index
    %c0_20 = arith.constant 0 : index
    %14 = vector.load %arg2[%c1_17, %c0_18, %c0_19, %c0_20] : memref<3x3x3x32xf32, #tpu.memory_space<vmem>>, vector<1x1x3x32xf32>
    %15 = vector.shape_cast %14 : vector<1x1x3x32xf32> to vector<3x32xf32>
    %cst_21 = arith.constant dense<0.000000e+00> : vector<256x32xf32>
    %16 = tpu.matmul %13, %15, %cst_21 {dimension_numbers = #tpu.dot_dimension_numbers<[1], [0], [0], [1], [0, 0, 1, 1], [], []>} : vector<256x3xf32>, vector<3x32xf32>, vector<256x32xf32> -> vector<256x32xf32>
    %17 = arith.addf %12, %16 : vector<256x32xf32>
    %18 = vector.extract_strided_slice %7 {offsets = [32, 0], sizes = [256, 3], strides = [1, 1]} : vector<288x3xf32> to vector<256x3xf32>
    %c2 = arith.constant 2 : index
    %c0_22 = arith.constant 0 : index
    %c0_23 = arith.constant 0 : index
    %c0_24 = arith.constant 0 : index
    %19 = vector.load %arg2[%c2, %c0_22, %c0_23, %c0_24] : memref<3x3x3x32xf32, #tpu.memory_space<vmem>>, vector<1x1x3x32xf32>
    %20 = vector.shape_cast %19 : vector<1x1x3x32xf32> to vector<3x32xf32>
    %cst_25 = arith.constant dense<0.000000e+00> : vector<256x32xf32>
    %21 = tpu.matmul %18, %20, %cst_25 {dimension_numbers = #tpu.dot_dimension_numbers<[1], [0], [0], [1], [0, 0, 1, 1], [], []>} : vector<256x3xf32>, vector<3x32xf32>, vector<256x32xf32> -> vector<256x32xf32>
    %22 = arith.addf %17, %21 : vector<256x32xf32>
    %c0_26 = arith.constant 0 : index
    %c1_27 = arith.constant 1 : index
    %c0_28 = arith.constant 0 : index
    %23 = vector.load %arg15[%c0_26, %c1_27, %c0_28] : memref<18x18x3xf32, #tpu.memory_space<vmem>>, vector<18x16x3xf32>
    %24 = vector.shape_cast %23 : vector<18x16x3xf32> to vector<288x3xf32>
    %25 = vector.extract_strided_slice %24 {offsets = [0, 0], sizes = [256, 3], strides = [1, 1]} : vector<288x3xf32> to vector<256x3xf32>
    %c0_29 = arith.constant 0 : index
    %c1_30 = arith.constant 1 : index
    %c0_31 = arith.constant 0 : index
    %c0_32 = arith.constant 0 : index
    %26 = vector.load %arg2[%c0_29, %c1_30, %c0_31, %c0_32] : memref<3x3x3x32xf32, #tpu.memory_space<vmem>>, vector<1x1x3x32xf32>
    %27 = vector.shape_cast %26 : vector<1x1x3x32xf32> to vector<3x32xf32>
    %cst_33 = arith.constant dense<0.000000e+00> : vector<256x32xf32>
    %28 = tpu.matmul %25, %27, %cst_33 {dimension_numbers = #tpu.dot_dimension_numbers<[1], [0], [0], [1], [0, 0, 1, 1], [], []>} : vector<256x3xf32>, vector<3x32xf32>, vector<256x32xf32> -> vector<256x32xf32>
    %29 = arith.addf %22, %28 : vector<256x32xf32>
    %30 = vector.extract_strided_slice %24 {offsets = [16, 0], sizes = [256, 3], strides = [1, 1]} : vector<288x3xf32> to vector<256x3xf32>
    %c1_34 = arith.constant 1 : index
    %c1_35 = arith.constant 1 : index
    %c0_36 = arith.constant 0 : index
    %c0_37 = arith.constant 0 : index
    %31 = vector.load %arg2[%c1_34, %c1_35, %c0_36, %c0_37] : memref<3x3x3x32xf32, #tpu.memory_space<vmem>>, vector<1x1x3x32xf32>
    %32 = vector.shape_cast %31 : vector<1x1x3x32xf32> to vector<3x32xf32>
    %cst_38 = arith.constant dense<0.000000e+00> : vector<256x32xf32>
    %33 = tpu.matmul %30, %32, %cst_38 {dimension_numbers = #tpu.dot_dimension_numbers<[1], [0], [0], [1], [0, 0, 1, 1], [], []>} : vector<256x3xf32>, vector<3x32xf32>, vector<256x32xf32> -> vector<256x32xf32>
    %34 = arith.addf %29, %33 : vector<256x32xf32>
    %35 = vector.extract_strided_slice %24 {offsets = [32, 0], sizes = [256, 3], strides = [1, 1]} : vector<288x3xf32> to vector<256x3xf32>
    %c2_39 = arith.constant 2 : index
    %c1_40 = arith.constant 1 : index
    %c0_41 = arith.constant 0 : index
    %c0_42 = arith.constant 0 : index
    %36 = vector.load %arg2[%c2_39, %c1_40, %c0_41, %c0_42] : memref<3x3x3x32xf32, #tpu.memory_space<vmem>>, vector<1x1x3x32xf32>
    %37 = vector.shape_cast %36 : vector<1x1x3x32xf32> to vector<3x32xf32>
    %cst_43 = arith.constant dense<0.000000e+00> : vector<256x32xf32>
    %38 = tpu.matmul %35, %37, %cst_43 {dimension_numbers = #tpu.dot_dimension_numbers<[1], [0], [0], [1], [0, 0, 1, 1], [], []>} : vector<256x3xf32>, vector<3x32xf32>, vector<256x32xf32> -> vector<256x32xf32>
    %39 = arith.addf %34, %38 : vector<256x32xf32>
    %c0_44 = arith.constant 0 : index
    %c2_45 = arith.constant 2 : index
    %c0_46 = arith.constant 0 : index
    %40 = vector.load %arg15[%c0_44, %c2_45, %c0_46] : memref<18x18x3xf32, #tpu.memory_space<vmem>>, vector<18x16x3xf32>
    %41 = vector.shape_cast %40 : vector<18x16x3xf32> to vector<288x3xf32>
    %42 = vector.extract_strided_slice %41 {offsets = [0, 0], sizes = [256, 3], strides = [1, 1]} : vector<288x3xf32> to vector<256x3xf32>
    %c0_47 = arith.constant 0 : index
    %c2_48 = arith.constant 2 : index
    %c0_49 = arith.constant 0 : index
    %c0_50 = arith.constant 0 : index
    %43 = vector.load %arg2[%c0_47, %c2_48, %c0_49, %c0_50] : memref<3x3x3x32xf32, #tpu.memory_space<vmem>>, vector<1x1x3x32xf32>
    %44 = vector.shape_cast %43 : vector<1x1x3x32xf32> to vector<3x32xf32>
    %cst_51 = arith.constant dense<0.000000e+00> : vector<256x32xf32>
    %45 = tpu.matmul %42, %44, %cst_51 {dimension_numbers = #tpu.dot_dimension_numbers<[1], [0], [0], [1], [0, 0, 1, 1], [], []>} : vector<256x3xf32>, vector<3x32xf32>, vector<256x32xf32> -> vector<256x32xf32>
    %46 = arith.addf %39, %45 : vector<256x32xf32>
    %47 = vector.extract_strided_slice %41 {offsets = [16, 0], sizes = [256, 3], strides = [1, 1]} : vector<288x3xf32> to vector<256x3xf32>
    %c1_52 = arith.constant 1 : index
    %c2_53 = arith.constant 2 : index
    %c0_54 = arith.constant 0 : index
    %c0_55 = arith.constant 0 : index
    %48 = vector.load %arg2[%c1_52, %c2_53, %c0_54, %c0_55] : memref<3x3x3x32xf32, #tpu.memory_space<vmem>>, vector<1x1x3x32xf32>
    %49 = vector.shape_cast %48 : vector<1x1x3x32xf32> to vector<3x32xf32>
    %cst_56 = arith.constant dense<0.000000e+00> : vector<256x32xf32>
    %50 = tpu.matmul %47, %49, %cst_56 {dimension_numbers = #tpu.dot_dimension_numbers<[1], [0], [0], [1], [0, 0, 1, 1], [], []>} : vector<256x3xf32>, vector<3x32xf32>, vector<256x32xf32> -> vector<256x32xf32>
    %51 = arith.addf %46, %50 : vector<256x32xf32>
    %52 = vector.extract_strided_slice %41 {offsets = [32, 0], sizes = [256, 3], strides = [1, 1]} : vector<288x3xf32> to vector<256x3xf32>
    %c2_57 = arith.constant 2 : index
    %c2_58 = arith.constant 2 : index
    %c0_59 = arith.constant 0 : index
    %c0_60 = arith.constant 0 : index
    %53 = vector.load %arg2[%c2_57, %c2_58, %c0_59, %c0_60] : memref<3x3x3x32xf32, #tpu.memory_space<vmem>>, vector<1x1x3x32xf32>
    %54 = vector.shape_cast %53 : vector<1x1x3x32xf32> to vector<3x32xf32>
    %cst_61 = arith.constant dense<0.000000e+00> : vector<256x32xf32>
    %55 = tpu.matmul %52, %54, %cst_61 {dimension_numbers = #tpu.dot_dimension_numbers<[1], [0], [0], [1], [0, 0, 1, 1], [], []>} : vector<256x3xf32>, vector<3x32xf32>, vector<256x32xf32> -> vector<256x32xf32>
    %56 = arith.addf %51, %55 : vector<256x32xf32>
    %c0_62 = arith.constant 0 : index
    %c0_63 = arith.constant 0 : index
    %57 = vector.load %arg3[%c0_62, %c0_63] : memref<1x32xf32, #tpu.memory_space<vmem>>, vector<1x32xf32>
    %58 = vector.broadcast %57 : vector<1x32xf32> to vector<256x32xf32>
    %59 = arith.mulf %56, %58 : vector<256x32xf32>
    %c0_64 = arith.constant 0 : index
    %c0_65 = arith.constant 0 : index
    %60 = vector.load %arg4[%c0_64, %c0_65] : memref<1x32xf32, #tpu.memory_space<vmem>>, vector<1x32xf32>
    %61 = vector.broadcast %60 : vector<1x32xf32> to vector<256x32xf32>
    %62 = arith.addf %59, %61 : vector<256x32xf32>
    %cst_66 = arith.constant 0.000000e+00 : f32
    %63 = vector.broadcast %cst_66 : f32 to vector<256x32xf32>
    %64 = arith.maximumf %62, %63 : vector<256x32xf32>
    %65 = vector.shape_cast %64 : vector<256x32xf32> to vector<16x16x32xf32>
    %66 = vector.shape_cast %65 : vector<16x16x32xf32> to vector<16x8x2x32xf32>
    %cst_67 = arith.constant dense<0xFF800000> : vector<16x8x32xf32>
    %67 = vector.multi_reduction <maximumf>, %66, %cst_67 [2] : vector<16x8x2x32xf32> to vector<16x8x32xf32>
    %68 = vector.shape_cast %67 : vector<16x8x32xf32> to vector<8x2x8x32xf32>
    %cst_68 = arith.constant dense<0xFF800000> : vector<8x8x32xf32>
    %69 = vector.multi_reduction <maximumf>, %68, %cst_68 [1] : vector<8x2x8x32xf32> to vector<8x8x32xf32>
    %cst_69 = arith.constant 0.000000e+00 : f32
    %70 = vector.broadcast %cst_69 : f32 to vector<10x10x32xf32>
    %c0_70 = arith.constant 0 : index
    %c0_71 = arith.constant 0 : index
    %c0_72 = arith.constant 0 : index
    %71 = vector.load %arg16[%c0_70, %c0_71, %c0_72] : memref<10x10x32xf32, #tpu.memory_space<vmem>>, vector<10x10x32xf32>
    tpu.vector_store %arg16[%c0_70, %c0_71, %c0_72], %70 {strides = array<i32>} : memref<10x10x32xf32, #tpu.memory_space<vmem>>, vector<10x10x32xf32>,
    %c1_73 = arith.constant 1 : index
    %c1_74 = arith.constant 1 : index
    %c0_75 = arith.constant 0 : index
    %72 = vector.load %arg16[%c1_73, %c1_74, %c0_75] : memref<10x10x32xf32, #tpu.memory_space<vmem>>, vector<8x8x32xf32>
    tpu.vector_store %arg16[%c1_73, %c1_74, %c0_75], %69 {strides = array<i32>} : memref<10x10x32xf32, #tpu.memory_space<vmem>>, vector<8x8x32xf32>,
    %cst_76 = arith.constant 0.000000e+00 : f32
    %73 = vector.broadcast %cst_76 : f32 to vector<64x32xf32>
    %c0_77 = arith.constant 0 : index
    %c0_78 = arith.constant 0 : index
    %c0_79 = arith.constant 0 : index
    %74 = vector.load %arg16[%c0_77, %c0_78, %c0_79] : memref<10x10x32xf32, #tpu.memory_space<vmem>>, vector<10x8x32xf32>
    %75 = vector.shape_cast %74 : vector<10x8x32xf32> to vector<80x32xf32>
    %76 = vector.extract_strided_slice %75 {offsets = [0, 0], sizes = [64, 32], strides = [1, 1]} : vector<80x32xf32> to vector<64x32xf32>
    %c0_80 = arith.constant 0 : index
    %c0_81 = arith.constant 0 : index
    %c0_82 = arith.constant 0 : index
    %c0_83 = arith.constant 0 : index
    %77 = vector.load %arg5[%c0_80, %c0_81, %c0_82, %c0_83] : memref<3x3x32x32xf32, #tpu.memory_space<vmem>>, vector<1x1x32x32xf32>
    %78 = vector.shape_cast %77 : vector<1x1x32x32xf32> to vector<32x32xf32>
    %cst_84 = arith.constant dense<0.000000e+00> : vector<64x32xf32>
    %79 = tpu.matmul %76, %78, %cst_84 {dimension_numbers = #tpu.dot_dimension_numbers<[1], [0], [0], [1], [0, 0, 1, 1], [], []>} : vector<64x32xf32>, vector<32x32xf32>, vector<64x32xf32> -> vector<64x32xf32>
    %80 = arith.addf %73, %79 : vector<64x32xf32>
    %81 = vector.extract_strided_slice %75 {offsets = [8, 0], sizes = [64, 32], strides = [1, 1]} : vector<80x32xf32> to vector<64x32xf32>
    %c1_85 = arith.constant 1 : index
    %c0_86 = arith.constant 0 : index
    %c0_87 = arith.constant 0 : index
    %c0_88 = arith.constant 0 : index
    %82 = vector.load %arg5[%c1_85, %c0_86, %c0_87, %c0_88] : memref<3x3x32x32xf32, #tpu.memory_space<vmem>>, vector<1x1x32x32xf32>
    %83 = vector.shape_cast %82 : vector<1x1x32x32xf32> to vector<32x32xf32>
    %cst_89 = arith.constant dense<0.000000e+00> : vector<64x32xf32>
    %84 = tpu.matmul %81, %83, %cst_89 {dimension_numbers = #tpu.dot_dimension_numbers<[1], [0], [0], [1], [0, 0, 1, 1], [], []>} : vector<64x32xf32>, vector<32x32xf32>, vector<64x32xf32> -> vector<64x32xf32>
    %85 = arith.addf %80, %84 : vector<64x32xf32>
    %86 = vector.extract_strided_slice %75 {offsets = [16, 0], sizes = [64, 32], strides = [1, 1]} : vector<80x32xf32> to vector<64x32xf32>
    %c2_90 = arith.constant 2 : index
    %c0_91 = arith.constant 0 : index
    %c0_92 = arith.constant 0 : index
    %c0_93 = arith.constant 0 : index
    %87 = vector.load %arg5[%c2_90, %c0_91, %c0_92, %c0_93] : memref<3x3x32x32xf32, #tpu.memory_space<vmem>>, vector<1x1x32x32xf32>
    %88 = vector.shape_cast %87 : vector<1x1x32x32xf32> to vector<32x32xf32>
    %cst_94 = arith.constant dense<0.000000e+00> : vector<64x32xf32>
    %89 = tpu.matmul %86, %88, %cst_94 {dimension_numbers = #tpu.dot_dimension_numbers<[1], [0], [0], [1], [0, 0, 1, 1], [], []>} : vector<64x32xf32>, vector<32x32xf32>, vector<64x32xf32> -> vector<64x32xf32>
    %90 = arith.addf %85, %89 : vector<64x32xf32>
    %c0_95 = arith.constant 0 : index
    %c1_96 = arith.constant 1 : index
    %c0_97 = arith.constant 0 : index
    %91 = vector.load %arg16[%c0_95, %c1_96, %c0_97] : memref<10x10x32xf32, #tpu.memory_space<vmem>>, vector<10x8x32xf32>
    %92 = vector.shape_cast %91 : vector<10x8x32xf32> to vector<80x32xf32>
    %93 = vector.extract_strided_slice %92 {offsets = [0, 0], sizes = [64, 32], strides = [1, 1]} : vector<80x32xf32> to vector<64x32xf32>
    %c0_98 = arith.constant 0 : index
    %c1_99 = arith.constant 1 : index
    %c0_100 = arith.constant 0 : index
    %c0_101 = arith.constant 0 : index
    %94 = vector.load %arg5[%c0_98, %c1_99, %c0_100, %c0_101] : memref<3x3x32x32xf32, #tpu.memory_space<vmem>>, vector<1x1x32x32xf32>
    %95 = vector.shape_cast %94 : vector<1x1x32x32xf32> to vector<32x32xf32>
    %cst_102 = arith.constant dense<0.000000e+00> : vector<64x32xf32>
    %96 = tpu.matmul %93, %95, %cst_102 {dimension_numbers = #tpu.dot_dimension_numbers<[1], [0], [0], [1], [0, 0, 1, 1], [], []>} : vector<64x32xf32>, vector<32x32xf32>, vector<64x32xf32> -> vector<64x32xf32>
    %97 = arith.addf %90, %96 : vector<64x32xf32>
    %98 = vector.extract_strided_slice %92 {offsets = [8, 0], sizes = [64, 32], strides = [1, 1]} : vector<80x32xf32> to vector<64x32xf32>
    %c1_103 = arith.constant 1 : index
    %c1_104 = arith.constant 1 : index
    %c0_105 = arith.constant 0 : index
    %c0_106 = arith.constant 0 : index
    %99 = vector.load %arg5[%c1_103, %c1_104, %c0_105, %c0_106] : memref<3x3x32x32xf32, #tpu.memory_space<vmem>>, vector<1x1x32x32xf32>
    %100 = vector.shape_cast %99 : vector<1x1x32x32xf32> to vector<32x32xf32>
    %cst_107 = arith.constant dense<0.000000e+00> : vector<64x32xf32>
    %101 = tpu.matmul %98, %100, %cst_107 {dimension_numbers = #tpu.dot_dimension_numbers<[1], [0], [0], [1], [0, 0, 1, 1], [], []>} : vector<64x32xf32>, vector<32x32xf32>, vector<64x32xf32> -> vector<64x32xf32>
    %102 = arith.addf %97, %101 : vector<64x32xf32>
    %103 = vector.extract_strided_slice %92 {offsets = [16, 0], sizes = [64, 32], strides = [1, 1]} : vector<80x32xf32> to vector<64x32xf32>
    %c2_108 = arith.constant 2 : index
    %c1_109 = arith.constant 1 : index
    %c0_110 = arith.constant 0 : index
    %c0_111 = arith.constant 0 : index
    %104 = vector.load %arg5[%c2_108, %c1_109, %c0_110, %c0_111] : memref<3x3x32x32xf32, #tpu.memory_space<vmem>>, vector<1x1x32x32xf32>
    %105 = vector.shape_cast %104 : vector<1x1x32x32xf32> to vector<32x32xf32>
    %cst_112 = arith.constant dense<0.000000e+00> : vector<64x32xf32>
    %106 = tpu.matmul %103, %105, %cst_112 {dimension_numbers = #tpu.dot_dimension_numbers<[1], [0], [0], [1], [0, 0, 1, 1], [], []>} : vector<64x32xf32>, vector<32x32xf32>, vector<64x32xf32> -> vector<64x32xf32>
    %107 = arith.addf %102, %106 : vector<64x32xf32>
    %c0_113 = arith.constant 0 : index
    %c2_114 = arith.constant 2 : index
    %c0_115 = arith.constant 0 : index
    %108 = vector.load %arg16[%c0_113, %c2_114, %c0_115] : memref<10x10x32xf32, #tpu.memory_space<vmem>>, vector<10x8x32xf32>
    %109 = vector.shape_cast %108 : vector<10x8x32xf32> to vector<80x32xf32>
    %110 = vector.extract_strided_slice %109 {offsets = [0, 0], sizes = [64, 32], strides = [1, 1]} : vector<80x32xf32> to vector<64x32xf32>
    %c0_116 = arith.constant 0 : index
    %c2_117 = arith.constant 2 : index
    %c0_118 = arith.constant 0 : index
    %c0_119 = arith.constant 0 : index
    %111 = vector.load %arg5[%c0_116, %c2_117, %c0_118, %c0_119] : memref<3x3x32x32xf32, #tpu.memory_space<vmem>>, vector<1x1x32x32xf32>
    %112 = vector.shape_cast %111 : vector<1x1x32x32xf32> to vector<32x32xf32>
    %cst_120 = arith.constant dense<0.000000e+00> : vector<64x32xf32>
    %113 = tpu.matmul %110, %112, %cst_120 {dimension_numbers = #tpu.dot_dimension_numbers<[1], [0], [0], [1], [0, 0, 1, 1], [], []>} : vector<64x32xf32>, vector<32x32xf32>, vector<64x32xf32> -> vector<64x32xf32>
    %114 = arith.addf %107, %113 : vector<64x32xf32>
    %115 = vector.extract_strided_slice %109 {offsets = [8, 0], sizes = [64, 32], strides = [1, 1]} : vector<80x32xf32> to vector<64x32xf32>
    %c1_121 = arith.constant 1 : index
    %c2_122 = arith.constant 2 : index
    %c0_123 = arith.constant 0 : index
    %c0_124 = arith.constant 0 : index
    %116 = vector.load %arg5[%c1_121, %c2_122, %c0_123, %c0_124] : memref<3x3x32x32xf32, #tpu.memory_space<vmem>>, vector<1x1x32x32xf32>
    %117 = vector.shape_cast %116 : vector<1x1x32x32xf32> to vector<32x32xf32>
    %cst_125 = arith.constant dense<0.000000e+00> : vector<64x32xf32>
    %118 = tpu.matmul %115, %117, %cst_125 {dimension_numbers = #tpu.dot_dimension_numbers<[1], [0], [0], [1], [0, 0, 1, 1], [], []>} : vector<64x32xf32>, vector<32x32xf32>, vector<64x32xf32> -> vector<64x32xf32>
    %119 = arith.addf %114, %118 : vector<64x32xf32>
    %120 = vector.extract_strided_slice %109 {offsets = [16, 0], sizes = [64, 32], strides = [1, 1]} : vector<80x32xf32> to vector<64x32xf32>
    %c2_126 = arith.constant 2 : index
    %c2_127 = arith.constant 2 : index
    %c0_128 = arith.constant 0 : index
    %c0_129 = arith.constant 0 : index
    %121 = vector.load %arg5[%c2_126, %c2_127, %c0_128, %c0_129] : memref<3x3x32x32xf32, #tpu.memory_space<vmem>>, vector<1x1x32x32xf32>
    %122 = vector.shape_cast %121 : vector<1x1x32x32xf32> to vector<32x32xf32>
    %cst_130 = arith.constant dense<0.000000e+00> : vector<64x32xf32>
    %123 = tpu.matmul %120, %122, %cst_130 {dimension_numbers = #tpu.dot_dimension_numbers<[1], [0], [0], [1], [0, 0, 1, 1], [], []>} : vector<64x32xf32>, vector<32x32xf32>, vector<64x32xf32> -> vector<64x32xf32>
    %124 = arith.addf %119, %123 : vector<64x32xf32>
    %c0_131 = arith.constant 0 : index
    %c0_132 = arith.constant 0 : index
    %125 = vector.load %arg6[%c0_131, %c0_132] : memref<1x32xf32, #tpu.memory_space<vmem>>, vector<1x32xf32>
    %126 = vector.broadcast %125 : vector<1x32xf32> to vector<64x32xf32>
    %127 = arith.mulf %124, %126 : vector<64x32xf32>
    %c0_133 = arith.constant 0 : index
    %c0_134 = arith.constant 0 : index
    %128 = vector.load %arg7[%c0_133, %c0_134] : memref<1x32xf32, #tpu.memory_space<vmem>>, vector<1x32xf32>
    %129 = vector.broadcast %128 : vector<1x32xf32> to vector<64x32xf32>
    %130 = arith.addf %127, %129 : vector<64x32xf32>
    %cst_135 = arith.constant 0.000000e+00 : f32
    %131 = vector.broadcast %cst_135 : f32 to vector<64x32xf32>
    %132 = arith.maximumf %130, %131 : vector<64x32xf32>
    %133 = vector.shape_cast %132 : vector<64x32xf32> to vector<8x8x32xf32>
    %134 = vector.shape_cast %133 : vector<8x8x32xf32> to vector<8x4x2x32xf32>
    %cst_136 = arith.constant dense<0xFF800000> : vector<8x4x32xf32>
    %135 = vector.multi_reduction <maximumf>, %134, %cst_136 [2] : vector<8x4x2x32xf32> to vector<8x4x32xf32>
    %136 = vector.shape_cast %135 : vector<8x4x32xf32> to vector<4x2x4x32xf32>
    %cst_137 = arith.constant dense<0xFF800000> : vector<4x4x32xf32>
    %137 = vector.multi_reduction <maximumf>, %136, %cst_137 [1] : vector<4x2x4x32xf32> to vector<4x4x32xf32>
    %cst_138 = arith.constant 0.000000e+00 : f32
    %138 = vector.broadcast %cst_138 : f32 to vector<6x6x32xf32>
    %c0_139 = arith.constant 0 : index
    %c0_140 = arith.constant 0 : index
    %c0_141 = arith.constant 0 : index
    %139 = vector.load %arg17[%c0_139, %c0_140, %c0_141] : memref<6x6x32xf32, #tpu.memory_space<vmem>>, vector<6x6x32xf32>
    tpu.vector_store %arg17[%c0_139, %c0_140, %c0_141], %138 {strides = array<i32>} : memref<6x6x32xf32, #tpu.memory_space<vmem>>, vector<6x6x32xf32>,
    %c1_142 = arith.constant 1 : index
    %c1_143 = arith.constant 1 : index
    %c0_144 = arith.constant 0 : index
    %140 = vector.load %arg17[%c1_142, %c1_143, %c0_144] : memref<6x6x32xf32, #tpu.memory_space<vmem>>, vector<4x4x32xf32>
    tpu.vector_store %arg17[%c1_142, %c1_143, %c0_144], %137 {strides = array<i32>} : memref<6x6x32xf32, #tpu.memory_space<vmem>>, vector<4x4x32xf32>,
    %cst_145 = arith.constant 0.000000e+00 : f32
    %141 = vector.broadcast %cst_145 : f32 to vector<16x32xf32>
    %c0_146 = arith.constant 0 : index
    %c0_147 = arith.constant 0 : index
    %c0_148 = arith.constant 0 : index
    %142 = vector.load %arg17[%c0_146, %c0_147, %c0_148] : memref<6x6x32xf32, #tpu.memory_space<vmem>>, vector<6x4x32xf32>
    %143 = vector.shape_cast %142 : vector<6x4x32xf32> to vector<24x32xf32>
    %144 = vector.extract_strided_slice %143 {offsets = [0, 0], sizes = [16, 32], strides = [1, 1]} : vector<24x32xf32> to vector<16x32xf32>
    %c0_149 = arith.constant 0 : index
    %c0_150 = arith.constant 0 : index
    %c0_151 = arith.constant 0 : index
    %c0_152 = arith.constant 0 : index
    %145 = vector.load %arg8[%c0_149, %c0_150, %c0_151, %c0_152] : memref<3x3x32x32xf32, #tpu.memory_space<vmem>>, vector<1x1x32x32xf32>
    %146 = vector.shape_cast %145 : vector<1x1x32x32xf32> to vector<32x32xf32>
    %cst_153 = arith.constant dense<0.000000e+00> : vector<16x32xf32>
    %147 = tpu.matmul %144, %146, %cst_153 {dimension_numbers = #tpu.dot_dimension_numbers<[1], [0], [0], [1], [0, 0, 1, 1], [], []>} : vector<16x32xf32>, vector<32x32xf32>, vector<16x32xf32> -> vector<16x32xf32>
    %148 = arith.addf %141, %147 : vector<16x32xf32>
    %149 = vector.extract_strided_slice %143 {offsets = [4, 0], sizes = [16, 32], strides = [1, 1]} : vector<24x32xf32> to vector<16x32xf32>
    %c1_154 = arith.constant 1 : index
    %c0_155 = arith.constant 0 : index
    %c0_156 = arith.constant 0 : index
    %c0_157 = arith.constant 0 : index
    %150 = vector.load %arg8[%c1_154, %c0_155, %c0_156, %c0_157] : memref<3x3x32x32xf32, #tpu.memory_space<vmem>>, vector<1x1x32x32xf32>
    %151 = vector.shape_cast %150 : vector<1x1x32x32xf32> to vector<32x32xf32>
    %cst_158 = arith.constant dense<0.000000e+00> : vector<16x32xf32>
    %152 = tpu.matmul %149, %151, %cst_158 {dimension_numbers = #tpu.dot_dimension_numbers<[1], [0], [0], [1], [0, 0, 1, 1], [], []>} : vector<16x32xf32>, vector<32x32xf32>, vector<16x32xf32> -> vector<16x32xf32>
    %153 = arith.addf %148, %152 : vector<16x32xf32>
    %154 = vector.extract_strided_slice %143 {offsets = [8, 0], sizes = [16, 32], strides = [1, 1]} : vector<24x32xf32> to vector<16x32xf32>
    %c2_159 = arith.constant 2 : index
    %c0_160 = arith.constant 0 : index
    %c0_161 = arith.constant 0 : index
    %c0_162 = arith.constant 0 : index
    %155 = vector.load %arg8[%c2_159, %c0_160, %c0_161, %c0_162] : memref<3x3x32x32xf32, #tpu.memory_space<vmem>>, vector<1x1x32x32xf32>
    %156 = vector.shape_cast %155 : vector<1x1x32x32xf32> to vector<32x32xf32>
    %cst_163 = arith.constant dense<0.000000e+00> : vector<16x32xf32>
    %157 = tpu.matmul %154, %156, %cst_163 {dimension_numbers = #tpu.dot_dimension_numbers<[1], [0], [0], [1], [0, 0, 1, 1], [], []>} : vector<16x32xf32>, vector<32x32xf32>, vector<16x32xf32> -> vector<16x32xf32>
    %158 = arith.addf %153, %157 : vector<16x32xf32>
    %c0_164 = arith.constant 0 : index
    %c1_165 = arith.constant 1 : index
    %c0_166 = arith.constant 0 : index
    %159 = vector.load %arg17[%c0_164, %c1_165, %c0_166] : memref<6x6x32xf32, #tpu.memory_space<vmem>>, vector<6x4x32xf32>
    %160 = vector.shape_cast %159 : vector<6x4x32xf32> to vector<24x32xf32>
    %161 = vector.extract_strided_slice %160 {offsets = [0, 0], sizes = [16, 32], strides = [1, 1]} : vector<24x32xf32> to vector<16x32xf32>
    %c0_167 = arith.constant 0 : index
    %c1_168 = arith.constant 1 : index
    %c0_169 = arith.constant 0 : index
    %c0_170 = arith.constant 0 : index
    %162 = vector.load %arg8[%c0_167, %c1_168, %c0_169, %c0_170] : memref<3x3x32x32xf32, #tpu.memory_space<vmem>>, vector<1x1x32x32xf32>
    %163 = vector.shape_cast %162 : vector<1x1x32x32xf32> to vector<32x32xf32>
    %cst_171 = arith.constant dense<0.000000e+00> : vector<16x32xf32>
    %164 = tpu.matmul %161, %163, %cst_171 {dimension_numbers = #tpu.dot_dimension_numbers<[1], [0], [0], [1], [0, 0, 1, 1], [], []>} : vector<16x32xf32>, vector<32x32xf32>, vector<16x32xf32> -> vector<16x32xf32>
    %165 = arith.addf %158, %164 : vector<16x32xf32>
    %166 = vector.extract_strided_slice %160 {offsets = [4, 0], sizes = [16, 32], strides = [1, 1]} : vector<24x32xf32> to vector<16x32xf32>
    %c1_172 = arith.constant 1 : index
    %c1_173 = arith.constant 1 : index
    %c0_174 = arith.constant 0 : index
    %c0_175 = arith.constant 0 : index
    %167 = vector.load %arg8[%c1_172, %c1_173, %c0_174, %c0_175] : memref<3x3x32x32xf32, #tpu.memory_space<vmem>>, vector<1x1x32x32xf32>
    %168 = vector.shape_cast %167 : vector<1x1x32x32xf32> to vector<32x32xf32>
    %cst_176 = arith.constant dense<0.000000e+00> : vector<16x32xf32>
    %169 = tpu.matmul %166, %168, %cst_176 {dimension_numbers = #tpu.dot_dimension_numbers<[1], [0], [0], [1], [0, 0, 1, 1], [], []>} : vector<16x32xf32>, vector<32x32xf32>, vector<16x32xf32> -> vector<16x32xf32>
    %170 = arith.addf %165, %169 : vector<16x32xf32>
    %171 = vector.extract_strided_slice %160 {offsets = [8, 0], sizes = [16, 32], strides = [1, 1]} : vector<24x32xf32> to vector<16x32xf32>
    %c2_177 = arith.constant 2 : index
    %c1_178 = arith.constant 1 : index
    %c0_179 = arith.constant 0 : index
    %c0_180 = arith.constant 0 : index
    %172 = vector.load %arg8[%c2_177, %c1_178, %c0_179, %c0_180] : memref<3x3x32x32xf32, #tpu.memory_space<vmem>>, vector<1x1x32x32xf32>
    %173 = vector.shape_cast %172 : vector<1x1x32x32xf32> to vector<32x32xf32>
    %cst_181 = arith.constant dense<0.000000e+00> : vector<16x32xf32>
    %174 = tpu.matmul %171, %173, %cst_181 {dimension_numbers = #tpu.dot_dimension_numbers<[1], [0], [0], [1], [0, 0, 1, 1], [], []>} : vector<16x32xf32>, vector<32x32xf32>, vector<16x32xf32> -> vector<16x32xf32>
    %175 = arith.addf %170, %174 : vector<16x32xf32>
    %c0_182 = arith.constant 0 : index
    %c2_183 = arith.constant 2 : index
    %c0_184 = arith.constant 0 : index
    %176 = vector.load %arg17[%c0_182, %c2_183, %c0_184] : memref<6x6x32xf32, #tpu.memory_space<vmem>>, vector<6x4x32xf32>
    %177 = vector.shape_cast %176 : vector<6x4x32xf32> to vector<24x32xf32>
    %178 = vector.extract_strided_slice %177 {offsets = [0, 0], sizes = [16, 32], strides = [1, 1]} : vector<24x32xf32> to vector<16x32xf32>
    %c0_185 = arith.constant 0 : index
    %c2_186 = arith.constant 2 : index
    %c0_187 = arith.constant 0 : index
    %c0_188 = arith.constant 0 : index
    %179 = vector.load %arg8[%c0_185, %c2_186, %c0_187, %c0_188] : memref<3x3x32x32xf32, #tpu.memory_space<vmem>>, vector<1x1x32x32xf32>
    %180 = vector.shape_cast %179 : vector<1x1x32x32xf32> to vector<32x32xf32>
    %cst_189 = arith.constant dense<0.000000e+00> : vector<16x32xf32>
    %181 = tpu.matmul %178, %180, %cst_189 {dimension_numbers = #tpu.dot_dimension_numbers<[1], [0], [0], [1], [0, 0, 1, 1], [], []>} : vector<16x32xf32>, vector<32x32xf32>, vector<16x32xf32> -> vector<16x32xf32>
    %182 = arith.addf %175, %181 : vector<16x32xf32>
    %183 = vector.extract_strided_slice %177 {offsets = [4, 0], sizes = [16, 32], strides = [1, 1]} : vector<24x32xf32> to vector<16x32xf32>
    %c1_190 = arith.constant 1 : index
    %c2_191 = arith.constant 2 : index
    %c0_192 = arith.constant 0 : index
    %c0_193 = arith.constant 0 : index
    %184 = vector.load %arg8[%c1_190, %c2_191, %c0_192, %c0_193] : memref<3x3x32x32xf32, #tpu.memory_space<vmem>>, vector<1x1x32x32xf32>
    %185 = vector.shape_cast %184 : vector<1x1x32x32xf32> to vector<32x32xf32>
    %cst_194 = arith.constant dense<0.000000e+00> : vector<16x32xf32>
    %186 = tpu.matmul %183, %185, %cst_194 {dimension_numbers = #tpu.dot_dimension_numbers<[1], [0], [0], [1], [0, 0, 1, 1], [], []>} : vector<16x32xf32>, vector<32x32xf32>, vector<16x32xf32> -> vector<16x32xf32>
    %187 = arith.addf %182, %186 : vector<16x32xf32>
    %188 = vector.extract_strided_slice %177 {offsets = [8, 0], sizes = [16, 32], strides = [1, 1]} : vector<24x32xf32> to vector<16x32xf32>
    %c2_195 = arith.constant 2 : index
    %c2_196 = arith.constant 2 : index
    %c0_197 = arith.constant 0 : index
    %c0_198 = arith.constant 0 : index
    %189 = vector.load %arg8[%c2_195, %c2_196, %c0_197, %c0_198] : memref<3x3x32x32xf32, #tpu.memory_space<vmem>>, vector<1x1x32x32xf32>
    %190 = vector.shape_cast %189 : vector<1x1x32x32xf32> to vector<32x32xf32>
    %cst_199 = arith.constant dense<0.000000e+00> : vector<16x32xf32>
    %191 = tpu.matmul %188, %190, %cst_199 {dimension_numbers = #tpu.dot_dimension_numbers<[1], [0], [0], [1], [0, 0, 1, 1], [], []>} : vector<16x32xf32>, vector<32x32xf32>, vector<16x32xf32> -> vector<16x32xf32>
    %192 = arith.addf %187, %191 : vector<16x32xf32>
    %c0_200 = arith.constant 0 : index
    %c0_201 = arith.constant 0 : index
    %193 = vector.load %arg9[%c0_200, %c0_201] : memref<1x32xf32, #tpu.memory_space<vmem>>, vector<1x32xf32>
    %194 = vector.broadcast %193 : vector<1x32xf32> to vector<16x32xf32>
    %195 = arith.mulf %192, %194 : vector<16x32xf32>
    %c0_202 = arith.constant 0 : index
    %c0_203 = arith.constant 0 : index
    %196 = vector.load %arg10[%c0_202, %c0_203] : memref<1x32xf32, #tpu.memory_space<vmem>>, vector<1x32xf32>
    %197 = vector.broadcast %196 : vector<1x32xf32> to vector<16x32xf32>
    %198 = arith.addf %195, %197 : vector<16x32xf32>
    %cst_204 = arith.constant 0.000000e+00 : f32
    %199 = vector.broadcast %cst_204 : f32 to vector<16x32xf32>
    %200 = arith.maximumf %198, %199 : vector<16x32xf32>
    %201 = vector.shape_cast %200 : vector<16x32xf32> to vector<4x4x32xf32>
    %202 = vector.shape_cast %201 : vector<4x4x32xf32> to vector<4x2x2x32xf32>
    %cst_205 = arith.constant dense<0xFF800000> : vector<4x2x32xf32>
    %203 = vector.multi_reduction <maximumf>, %202, %cst_205 [2] : vector<4x2x2x32xf32> to vector<4x2x32xf32>
    %204 = vector.shape_cast %203 : vector<4x2x32xf32> to vector<2x2x2x32xf32>
    %cst_206 = arith.constant dense<0xFF800000> : vector<2x2x32xf32>
    %205 = vector.multi_reduction <maximumf>, %204, %cst_206 [1] : vector<2x2x2x32xf32> to vector<2x2x32xf32>
    %cst_207 = arith.constant 0.000000e+00 : f32
    %206 = vector.broadcast %cst_207 : f32 to vector<4x4x32xf32>
    %c0_208 = arith.constant 0 : index
    %c0_209 = arith.constant 0 : index
    %c0_210 = arith.constant 0 : index
    %207 = vector.load %arg18[%c0_208, %c0_209, %c0_210] : memref<4x4x32xf32, #tpu.memory_space<vmem>>, vector<4x4x32xf32>
    tpu.vector_store %arg18[%c0_208, %c0_209, %c0_210], %206 {strides = array<i32>} : memref<4x4x32xf32, #tpu.memory_space<vmem>>, vector<4x4x32xf32>,
    %c1_211 = arith.constant 1 : index
    %c1_212 = arith.constant 1 : index
    %c0_213 = arith.constant 0 : index
    %208 = vector.load %arg18[%c1_211, %c1_212, %c0_213] : memref<4x4x32xf32, #tpu.memory_space<vmem>>, vector<2x2x32xf32>
    tpu.vector_store %arg18[%c1_211, %c1_212, %c0_213], %205 {strides = array<i32>} : memref<4x4x32xf32, #tpu.memory_space<vmem>>, vector<2x2x32xf32>,
    %cst_214 = arith.constant 0.000000e+00 : f32
    %209 = vector.broadcast %cst_214 : f32 to vector<4x32xf32>
    %c0_215 = arith.constant 0 : index
    %c0_216 = arith.constant 0 : index
    %c0_217 = arith.constant 0 : index
    %210 = vector.load %arg18[%c0_215, %c0_216, %c0_217] : memref<4x4x32xf32, #tpu.memory_space<vmem>>, vector<4x2x32xf32>
    %211 = vector.shape_cast %210 : vector<4x2x32xf32> to vector<8x32xf32>
    %212 = vector.extract_strided_slice %211 {offsets = [0, 0], sizes = [4, 32], strides = [1, 1]} : vector<8x32xf32> to vector<4x32xf32>
    %c0_218 = arith.constant 0 : index
    %c0_219 = arith.constant 0 : index
    %c0_220 = arith.constant 0 : index
    %c0_221 = arith.constant 0 : index
    %213 = vector.load %arg11[%c0_218, %c0_219, %c0_220, %c0_221] : memref<3x3x32x32xf32, #tpu.memory_space<vmem>>, vector<1x1x32x32xf32>
    %214 = vector.shape_cast %213 : vector<1x1x32x32xf32> to vector<32x32xf32>
    %cst_222 = arith.constant dense<0.000000e+00> : vector<4x32xf32>
    %215 = tpu.matmul %212, %214, %cst_222 {dimension_numbers = #tpu.dot_dimension_numbers<[1], [0], [0], [1], [0, 0, 1, 1], [], []>} : vector<4x32xf32>, vector<32x32xf32>, vector<4x32xf32> -> vector<4x32xf32>
    %216 = arith.addf %209, %215 : vector<4x32xf32>
    %217 = vector.extract_strided_slice %211 {offsets = [2, 0], sizes = [4, 32], strides = [1, 1]} : vector<8x32xf32> to vector<4x32xf32>
    %c1_223 = arith.constant 1 : index
    %c0_224 = arith.constant 0 : index
    %c0_225 = arith.constant 0 : index
    %c0_226 = arith.constant 0 : index
    %218 = vector.load %arg11[%c1_223, %c0_224, %c0_225, %c0_226] : memref<3x3x32x32xf32, #tpu.memory_space<vmem>>, vector<1x1x32x32xf32>
    %219 = vector.shape_cast %218 : vector<1x1x32x32xf32> to vector<32x32xf32>
    %cst_227 = arith.constant dense<0.000000e+00> : vector<4x32xf32>
    %220 = tpu.matmul %217, %219, %cst_227 {dimension_numbers = #tpu.dot_dimension_numbers<[1], [0], [0], [1], [0, 0, 1, 1], [], []>} : vector<4x32xf32>, vector<32x32xf32>, vector<4x32xf32> -> vector<4x32xf32>
    %221 = arith.addf %216, %220 : vector<4x32xf32>
    %222 = vector.extract_strided_slice %211 {offsets = [4, 0], sizes = [4, 32], strides = [1, 1]} : vector<8x32xf32> to vector<4x32xf32>
    %c2_228 = arith.constant 2 : index
    %c0_229 = arith.constant 0 : index
    %c0_230 = arith.constant 0 : index
    %c0_231 = arith.constant 0 : index
    %223 = vector.load %arg11[%c2_228, %c0_229, %c0_230, %c0_231] : memref<3x3x32x32xf32, #tpu.memory_space<vmem>>, vector<1x1x32x32xf32>
    %224 = vector.shape_cast %223 : vector<1x1x32x32xf32> to vector<32x32xf32>
    %cst_232 = arith.constant dense<0.000000e+00> : vector<4x32xf32>
    %225 = tpu.matmul %222, %224, %cst_232 {dimension_numbers = #tpu.dot_dimension_numbers<[1], [0], [0], [1], [0, 0, 1, 1], [], []>} : vector<4x32xf32>, vector<32x32xf32>, vector<4x32xf32> -> vector<4x32xf32>
    %226 = arith.addf %221, %225 : vector<4x32xf32>
    %c0_233 = arith.constant 0 : index
    %c1_234 = arith.constant 1 : index
    %c0_235 = arith.constant 0 : index
    %227 = vector.load %arg18[%c0_233, %c1_234, %c0_235] : memref<4x4x32xf32, #tpu.memory_space<vmem>>, vector<4x2x32xf32>
    %228 = vector.shape_cast %227 : vector<4x2x32xf32> to vector<8x32xf32>
    %229 = vector.extract_strided_slice %228 {offsets = [0, 0], sizes = [4, 32], strides = [1, 1]} : vector<8x32xf32> to vector<4x32xf32>
    %c0_236 = arith.constant 0 : index
    %c1_237 = arith.constant 1 : index
    %c0_238 = arith.constant 0 : index
    %c0_239 = arith.constant 0 : index
    %230 = vector.load %arg11[%c0_236, %c1_237, %c0_238, %c0_239] : memref<3x3x32x32xf32, #tpu.memory_space<vmem>>, vector<1x1x32x32xf32>
    %231 = vector.shape_cast %230 : vector<1x1x32x32xf32> to vector<32x32xf32>
    %cst_240 = arith.constant dense<0.000000e+00> : vector<4x32xf32>
    %232 = tpu.matmul %229, %231, %cst_240 {dimension_numbers = #tpu.dot_dimension_numbers<[1], [0], [0], [1], [0, 0, 1, 1], [], []>} : vector<4x32xf32>, vector<32x32xf32>, vector<4x32xf32> -> vector<4x32xf32>
    %233 = arith.addf %226, %232 : vector<4x32xf32>
    %234 = vector.extract_strided_slice %228 {offsets = [2, 0], sizes = [4, 32], strides = [1, 1]} : vector<8x32xf32> to vector<4x32xf32>
    %c1_241 = arith.constant 1 : index
    %c1_242 = arith.constant 1 : index
    %c0_243 = arith.constant 0 : index
    %c0_244 = arith.constant 0 : index
    %235 = vector.load %arg11[%c1_241, %c1_242, %c0_243, %c0_244] : memref<3x3x32x32xf32, #tpu.memory_space<vmem>>, vector<1x1x32x32xf32>
    %236 = vector.shape_cast %235 : vector<1x1x32x32xf32> to vector<32x32xf32>
    %cst_245 = arith.constant dense<0.000000e+00> : vector<4x32xf32>
    %237 = tpu.matmul %234, %236, %cst_245 {dimension_numbers = #tpu.dot_dimension_numbers<[1], [0], [0], [1], [0, 0, 1, 1], [], []>} : vector<4x32xf32>, vector<32x32xf32>, vector<4x32xf32> -> vector<4x32xf32>
    %238 = arith.addf %233, %237 : vector<4x32xf32>
    %239 = vector.extract_strided_slice %228 {offsets = [4, 0], sizes = [4, 32], strides = [1, 1]} : vector<8x32xf32> to vector<4x32xf32>
    %c2_246 = arith.constant 2 : index
    %c1_247 = arith.constant 1 : index
    %c0_248 = arith.constant 0 : index
    %c0_249 = arith.constant 0 : index
    %240 = vector.load %arg11[%c2_246, %c1_247, %c0_248, %c0_249] : memref<3x3x32x32xf32, #tpu.memory_space<vmem>>, vector<1x1x32x32xf32>
    %241 = vector.shape_cast %240 : vector<1x1x32x32xf32> to vector<32x32xf32>
    %cst_250 = arith.constant dense<0.000000e+00> : vector<4x32xf32>
    %242 = tpu.matmul %239, %241, %cst_250 {dimension_numbers = #tpu.dot_dimension_numbers<[1], [0], [0], [1], [0, 0, 1, 1], [], []>} : vector<4x32xf32>, vector<32x32xf32>, vector<4x32xf32> -> vector<4x32xf32>
    %243 = arith.addf %238, %242 : vector<4x32xf32>
    %c0_251 = arith.constant 0 : index
    %c2_252 = arith.constant 2 : index
    %c0_253 = arith.constant 0 : index
    %244 = vector.load %arg18[%c0_251, %c2_252, %c0_253] : memref<4x4x32xf32, #tpu.memory_space<vmem>>, vector<4x2x32xf32>
    %245 = vector.shape_cast %244 : vector<4x2x32xf32> to vector<8x32xf32>
    %246 = vector.extract_strided_slice %245 {offsets = [0, 0], sizes = [4, 32], strides = [1, 1]} : vector<8x32xf32> to vector<4x32xf32>
    %c0_254 = arith.constant 0 : index
    %c2_255 = arith.constant 2 : index
    %c0_256 = arith.constant 0 : index
    %c0_257 = arith.constant 0 : index
    %247 = vector.load %arg11[%c0_254, %c2_255, %c0_256, %c0_257] : memref<3x3x32x32xf32, #tpu.memory_space<vmem>>, vector<1x1x32x32xf32>
    %248 = vector.shape_cast %247 : vector<1x1x32x32xf32> to vector<32x32xf32>
    %cst_258 = arith.constant dense<0.000000e+00> : vector<4x32xf32>
    %249 = tpu.matmul %246, %248, %cst_258 {dimension_numbers = #tpu.dot_dimension_numbers<[1], [0], [0], [1], [0, 0, 1, 1], [], []>} : vector<4x32xf32>, vector<32x32xf32>, vector<4x32xf32> -> vector<4x32xf32>
    %250 = arith.addf %243, %249 : vector<4x32xf32>
    %251 = vector.extract_strided_slice %245 {offsets = [2, 0], sizes = [4, 32], strides = [1, 1]} : vector<8x32xf32> to vector<4x32xf32>
    %c1_259 = arith.constant 1 : index
    %c2_260 = arith.constant 2 : index
    %c0_261 = arith.constant 0 : index
    %c0_262 = arith.constant 0 : index
    %252 = vector.load %arg11[%c1_259, %c2_260, %c0_261, %c0_262] : memref<3x3x32x32xf32, #tpu.memory_space<vmem>>, vector<1x1x32x32xf32>
    %253 = vector.shape_cast %252 : vector<1x1x32x32xf32> to vector<32x32xf32>
    %cst_263 = arith.constant dense<0.000000e+00> : vector<4x32xf32>
    %254 = tpu.matmul %251, %253, %cst_263 {dimension_numbers = #tpu.dot_dimension_numbers<[1], [0], [0], [1], [0, 0, 1, 1], [], []>} : vector<4x32xf32>, vector<32x32xf32>, vector<4x32xf32> -> vector<4x32xf32>
    %255 = arith.addf %250, %254 : vector<4x32xf32>
    %256 = vector.extract_strided_slice %245 {offsets = [4, 0], sizes = [4, 32], strides = [1, 1]} : vector<8x32xf32> to vector<4x32xf32>
    %c2_264 = arith.constant 2 : index
    %c2_265 = arith.constant 2 : index
    %c0_266 = arith.constant 0 : index
    %c0_267 = arith.constant 0 : index
    %257 = vector.load %arg11[%c2_264, %c2_265, %c0_266, %c0_267] : memref<3x3x32x32xf32, #tpu.memory_space<vmem>>, vector<1x1x32x32xf32>
    %258 = vector.shape_cast %257 : vector<1x1x32x32xf32> to vector<32x32xf32>
    %cst_268 = arith.constant dense<0.000000e+00> : vector<4x32xf32>
    %259 = tpu.matmul %256, %258, %cst_268 {dimension_numbers = #tpu.dot_dimension_numbers<[1], [0], [0], [1], [0, 0, 1, 1], [], []>} : vector<4x32xf32>, vector<32x32xf32>, vector<4x32xf32> -> vector<4x32xf32>
    %260 = arith.addf %255, %259 : vector<4x32xf32>
    %c0_269 = arith.constant 0 : index
    %c0_270 = arith.constant 0 : index
    %261 = vector.load %arg12[%c0_269, %c0_270] : memref<1x32xf32, #tpu.memory_space<vmem>>, vector<1x32xf32>
    %262 = vector.broadcast %261 : vector<1x32xf32> to vector<4x32xf32>
    %263 = arith.mulf %260, %262 : vector<4x32xf32>
    %c0_271 = arith.constant 0 : index
    %c0_272 = arith.constant 0 : index
    %264 = vector.load %arg13[%c0_271, %c0_272] : memref<1x32xf32, #tpu.memory_space<vmem>>, vector<1x32xf32>
    %265 = vector.broadcast %264 : vector<1x32xf32> to vector<4x32xf32>
    %266 = arith.addf %263, %265 : vector<4x32xf32>
    %cst_273 = arith.constant 0.000000e+00 : f32
    %267 = vector.broadcast %cst_273 : f32 to vector<4x32xf32>
    %268 = arith.maximumf %266, %267 : vector<4x32xf32>
    %269 = vector.shape_cast %268 : vector<4x32xf32> to vector<2x2x32xf32>
    %270 = vector.shape_cast %269 : vector<2x2x32xf32> to vector<2x1x2x32xf32>
    %cst_274 = arith.constant dense<0xFF800000> : vector<2x1x32xf32>
    %271 = vector.multi_reduction <maximumf>, %270, %cst_274 [2] : vector<2x1x2x32xf32> to vector<2x1x32xf32>
    %272 = vector.shape_cast %271 : vector<2x1x32xf32> to vector<1x2x1x32xf32>
    %cst_275 = arith.constant dense<0xFF800000> : vector<1x1x32xf32>
    %273 = vector.multi_reduction <maximumf>, %272, %cst_275 [1] : vector<1x2x1x32xf32> to vector<1x1x32xf32>
    %c0_276 = arith.constant 0 : index
    %c0_277 = arith.constant 0 : index
    %c0_278 = arith.constant 0 : index
    %c0_279 = arith.constant 0 : index
    %274 = vector.load %arg14[%c0_276, %c0_277, %c0_278, %c0_279] : memref<1x1x1x32xf32, #tpu.memory_space<vmem>>, vector<1x1x1x32xf32>
    %275 = vector.shape_cast %274 : vector<1x1x1x32xf32> to vector<1x1x32xf32>
    %276 = vector.shape_cast %273 : vector<1x1x32xf32> to vector<1x1x1x32xf32>
    tpu.vector_store %arg14[%c0_276, %c0_277, %c0_278, %c0_279], %276 {strides = array<i32>} : memref<1x1x1x32xf32, #tpu.memory_space<vmem>>, vector<1x1x1x32xf32>,
    return
  }
  func.func @transform_0(%arg0: i32) -> (i32, i32, i32, i32) {
    %c0_i32 = arith.constant 0 : i32
    %c0_i32_0 = arith.constant 0 : i32
    %c0_i32_1 = arith.constant 0 : i32
    %c0_i32_2 = arith.constant 0 : i32
    return %arg0, %c0_i32, %c0_i32_0, %c0_i32_1 : i32, i32, i32, i32
  }
  func.func @transform_1(%arg0: i32) -> (i32, i32, i32, i32) {
    %c0_i32 = arith.constant 0 : i32
    %c0_i32_0 = arith.constant 0 : i32
    %c0_i32_1 = arith.constant 0 : i32
    %c0_i32_2 = arith.constant 0 : i32
    %c0_i32_3 = arith.constant 0 : i32
    return %c0_i32, %c0_i32_0, %c0_i32_1, %c0_i32_2 : i32, i32, i32, i32
  }
  func.func @transform_2(%arg0: i32) -> (i32, i32) {
    %c0_i32 = arith.constant 0 : i32
    %c0_i32_0 = arith.constant 0 : i32
    %c0_i32_1 = arith.constant 0 : i32
    return %c0_i32, %c0_i32_0 : i32, i32
  }
  func.func @transform_3(%arg0: i32) -> (i32, i32) {
    %c0_i32 = arith.constant 0 : i32
    %c0_i32_0 = arith.constant 0 : i32
    %c0_i32_1 = arith.constant 0 : i32
    return %c0_i32, %c0_i32_0 : i32, i32
  }
  func.func @transform_4(%arg0: i32) -> (i32, i32, i32, i32) {
    %c0_i32 = arith.constant 0 : i32
    %c0_i32_0 = arith.constant 0 : i32
    %c0_i32_1 = arith.constant 0 : i32
    %c0_i32_2 = arith.constant 0 : i32
    %c0_i32_3 = arith.constant 0 : i32
    return %c0_i32, %c0_i32_0, %c0_i32_1, %c0_i32_2 : i32, i32, i32, i32
  }
  func.func @transform_5(%arg0: i32) -> (i32, i32) {
    %c0_i32 = arith.constant 0 : i32
    %c0_i32_0 = arith.constant 0 : i32
    %c0_i32_1 = arith.constant 0 : i32
    return %c0_i32, %c0_i32_0 : i32, i32
  }
  func.func @transform_6(%arg0: i32) -> (i32, i32) {
    %c0_i32 = arith.constant 0 : i32
    %c0_i32_0 = arith.constant 0 : i32
    %c0_i32_1 = arith.constant 0 : i32
    return %c0_i32, %c0_i32_0 : i32, i32
  }
  func.func @transform_7(%arg0: i32) -> (i32, i32, i32, i32) {
    %c0_i32 = arith.constant 0 : i32
    %c0_i32_0 = arith.constant 0 : i32
    %c0_i32_1 = arith.constant 0 : i32
    %c0_i32_2 = arith.constant 0 : i32
    %c0_i32_3 = arith.constant 0 : i32
    return %c0_i32, %c0_i32_0, %c0_i32_1, %c0_i32_2 : i32, i32, i32, i32
  }
  func.func @transform_8(%arg0: i32) -> (i32, i32) {
    %c0_i32 = arith.constant 0 : i32
    %c0_i32_0 = arith.constant 0 : i32
    %c0_i32_1 = arith.constant 0 : i32
    return %c0_i32, %c0_i32_0 : i32, i32
  }
  func.func @transform_9(%arg0: i32) -> (i32, i32) {
    %c0_i32 = arith.constant 0 : i32
    %c0_i32_0 = arith.constant 0 : i32
    %c0_i32_1 = arith.constant 0 : i32
    return %c0_i32, %c0_i32_0 : i32, i32
  }
  func.func @transform_10(%arg0: i32) -> (i32, i32, i32, i32) {
    %c0_i32 = arith.constant 0 : i32
    %c0_i32_0 = arith.constant 0 : i32
    %c0_i32_1 = arith.constant 0 : i32
    %c0_i32_2 = arith.constant 0 : i32
    %c0_i32_3 = arith.constant 0 : i32
    return %c0_i32, %c0_i32_0, %c0_i32_1, %c0_i32_2 : i32, i32, i32, i32
  }
  func.func @transform_11(%arg0: i32) -> (i32, i32) {
    %c0_i32 = arith.constant 0 : i32
    %c0_i32_0 = arith.constant 0 : i32
    %c0_i32_1 = arith.constant 0 : i32
    return %c0_i32, %c0_i32_0 : i32, i32
  }
  func.func @transform_12(%arg0: i32) -> (i32, i32) {
    %c0_i32 = arith.constant 0 : i32
    %c0_i32_0 = arith.constant 0 : i32
    %c0_i32_1 = arith.constant 0 : i32
    return %c0_i32, %c0_i32_0 : i32, i32
  }
  func.func @transform_13(%arg0: i32) -> (i32, i32, i32, i32) {
    %c0_i32 = arith.constant 0 : i32
    %c0_i32_0 = arith.constant 0 : i32
    %c0_i32_1 = arith.constant 0 : i32
    %c0_i32_2 = arith.constant 0 : i32
    return %arg0, %c0_i32, %c0_i32_0, %c0_i32_1 : i32, i32, i32, i32
  }
}

</mosaic_0001>

<bundles_post_ra>
// kernel: convnet_forward.1
= control target key start
LH: loop header
LB: loop body
LE: loop exit
PB: predicated region body
PF: predicated region fallthrough
CT: control target
= control target key end

     0   :  { %s14417_s0 = inlined_call_operand.vmem [shape: f32[2,16,16,3], index: 0, kind: input, shape index: {}]   ;;  %s14418_s1 = inlined_call_operand.hbm [shape: f32[3,3,3,32], index: 1, kind: input, shape index: {}]   ;;  %s14419_s2 = inlined_call_operand.vmem [shape: f32[1,32], index: 2, kind: input, shape index: {}]   ;;  %s14420_s3 = inlined_call_operand.vmem [shape: f32[1,32], index: 3, kind: input, shape index: {}]   ;;  %s14421_s4 = inlined_call_operand.vmem [shape: f32[3,3,32,32], index: 4, kind: input, shape index: {}]   ;;  %s14422_s5 = inlined_call_operand.vmem [shape: f32[1,32], index: 5, kind: input, shape index: {}]   ;;  %s14423_s6 = inlined_call_operand.vmem [shape: f32[1,32], index: 6, kind: input, shape index: {}]   ;;  %s14424_s7 = inlined_call_operand.vmem [shape: f32[3,3,32,32], index: 7, kind: input, shape index: {}]   ;;  %s14425_s8 = inlined_call_operand.vmem [shape: f32[1,32], index: 8, kind: input, shape index: {}]   ;;  %s14426_s9 = inlined_call_operand.vmem [shape: f32[1,32], index: 9, kind: input, shape index: {}]   ;;  %s14427_s10 = inlined_call_operand.hbm [shape: f32[3,3,32,32], index: 10, kind: input, shape index: {}]   ;;  %s14428_s11 = inlined_call_operand.vmem [shape: f32[1,32], index: 11, kind: input, shape index: {}]   ;;  %s14429_s12 = inlined_call_operand.vmem [shape: f32[1,32], index: 12, kind: input, shape index: {}]   ;;  %s14430_s13 = inlined_call_operand.hbm [shape: f32[2,1,1,32], index: 13, kind: output, shape index: {}]  }
   0x1   :  { %14446 = sst [smem:[#allocation39_spill]] %s14430_s13 }
   0x2   :  { %18 = vsyncpa [#allocation7], 0 }
   0x3   :  { %19 = vsyncpa [#allocation10], 0 }
   0x4   :  { %20 = vsyncpa [#allocation8], 0 }
   0x5   :  { %22 = vsyncpa [#allocation8 + $0x1], 0  ;;  %s11644_s25 = smov 0   ;;  %s11646_s26 = smov 0  }
   0x6   :  { %s11648_s27 = smov 0   ;;  %s11650_s28 = smov 0  }
   0x7 LB: > { %14447 = sst [smem:[#allocation15_spill]] %s11549_s25  ;;  %s11665_s29 = sadd.s32 4294967295, %s11561_s28   ;;  %s11561_s28 = sphi %s11650_s28, %s14509_s28   ;;  %s11557_s27 = sphi %s11648_s27, %s14511_s27   ;;  %s11553_s26 = sphi %s11646_s26, %s14513_s26   ;;  %s11549_s25 = sphi %s11644_s25, %s14512_s25  }
   0x8   : > { %14448 = sst [smem:[#allocation16_spill]] %s11557_s27  ;;  %s8972_s30 = sadd.s32 4294967294, %s11561_s28  }
   0x9   : > { %14449 = sst [smem:[#allocation17_spill]] %s11561_s28  ;;  %s11669_s14 = sadd.s32 1, %s11561_s28  }
   0xa   : > { %14450 = sst [smem:[#allocation18_spill]] %s11669_s14  ;;  %s313_s15 = sadd.s32 1, %s11557_s27 }
   0xb   : > { %s310_s16 = ssub.s32 %s11561_s28, %s11669_s14  ;;  %p323_p0 = scmp.ne.s32.totalorder %s11557_s27, %s11553_s26 }
   0xc   : > { %p311_p1 = scmp.eq.s32.totalorder %s310_s16, 0  ;;  %p324_p2 = scmp.eq.s32.totalorder %s11665_s29, 1 }
   0xd   : > { %p329_p3 = scmp.ne.s32.totalorder %s11553_s26, %s11549_s25  ;;  %p330_p4 = scmp.eq.s32.totalorder %s8972_s30, 1 }
   0xe   : > { %s11680_s17 = scalar_select %p311_p1, %s11557_s27, %s313_s15  }
   0xf   : > { %p11682_p5 = por %p324_p2, %p323_p0  ;;  %p11686_p6 = por %p330_p4, %p329_p3 }
  0x10   : > { %14451 = sst [smem:[#allocation19_spill]] %s11680_s17  ;;  %p8973_p7 = scmp.ge.s32.totalorder %s11561_s28, 1 }
  0x11   : > { %s14452_s18 = scalar_select %p11682_p5, 1, 0 }
  0x12   : > { %s14453_s19 = scalar_select %p11686_p6, 1, 0 }
  0x13   : > { %p337_p8 = scmp.lt.s32.totalorder %s11561_s28, 3  ;;  %p14435_p9 = scmp.eq.s32.totalorder %s11665_s29, 0 }
  0x14   : > { %14454 = sst [smem:[#allocation20_spill]] %s14453_s19  ;;  %s11563_s21 = smov [#allocation6]  }
  0x15   : > { %p11693_p10 = pnand %p8973_p7, %p337_p8  ;;  %s349_s22 = sshll.u32 %s11563_s21, 4  ;;  %s350_s22 = int_to_ptr.vmem [resolvable:$true] %s349_s22 }
  0x16   : > { %s11564_s24 = smov [#allocation9]   ;;  %s11435_s17 = scalar_lea.hbm %s14418_s1, 576 }
  0x17   : > { %s14455_s20 = scalar_select %p11693_p10, 1, 0 }
  0x18   : > { %p11348_p11 = pneg %p11693_p10  ;;  %s386_s30 = sshll.u32 %s11564_s24, 4  ;;  %s11705_s30 = int_to_ptr.vmem [resolvable:$true] %s386_s30 }
  0x19   : > { %p11436_p13 = scmp.ne.s32.totalorder %s14418_s1, %s11435_s17  ;;  %p11442_p3 = scmp.lt.u32.totalorder %s11435_s17, %s14418_s1 }
  0x1a   : > { %p11701_p12 = pnand %p14435_p9, %p11348_p11 }
  0x1c   : > { %p11437_p0 = pneg %p11701_p12 }
  0x1e   : > { %p11438_p1 = pnand %p11437_p0, %p11436_p13 }
  0x20   : > { %p11439_p2 = pneg %p11438_p1 }
  0x22   : > { %p11444_p4 = pnand %p11442_p3, %p11439_p2 }
  0x24   : > { %11447 = shalt.err (!%p11444_p4)
}
  0x25   : > { %s11448_s24 = scalar_lea.vmem %s350_s22, 576  ;;  %p11456_p9 = scmp.lt.s32.totalorder %s350_s22, %s350_s22 }
  0x26   : > { %p11449_p7 = scmp.ne.s32.totalorder %s350_s22, %s11448_s24  ;;  %p11457_p6 = scmp.lt.s32.totalorder %s11448_s24, %s11448_s24 }
  0x28   : > { %p11451_p8 = pnand %p11449_p7, %p11437_p0  ;;  %p11458_p5 = por %p11457_p6, %p11456_p9 }
  0x2a   : > { %p11452_p11 = pneg %p11451_p8 }
  0x2c   : > { %p11459_p10 = pnand %p11458_p5, %p11452_p11 }
  0x2e   : > { %11462 = shalt.err (!%p11459_p10)
}
  0x2f   : > { %s11565_s27 = smov 64   ;;  %s11566_s15 = smov 4  }
  0x30   : > { %11351 = dma.hbm_to_vmem [thread:$0]  (!%p11701_p12), %s14418_s1, 576, %s350_s22, [#allocation7], %s11565_s27, %s11565_s27, %s11566_s15  }
  0x31   : > { %s11463_s21 = scalar_lea.hbm %s14427_s10, 4608 }
  0x32   : > { %p11464_p13 = scmp.ne.s32.totalorder %s14427_s10, %s11463_s21  ;;  %p11470_p9 = scmp.lt.u32.totalorder %s11463_s21, %s14427_s10 }
  0x34   : > { %p11466_p5 = pnand %p11464_p13, %p11437_p0 }
  0x36   : > { %p11467_p6 = pneg %p11466_p5 }
  0x38   : > { %p11472_p10 = pnand %p11470_p9, %p11467_p6 }
  0x3a   : > { %11475 = shalt.err (!%p11472_p10)
}
  0x3b   : > { %s11476_s22 = scalar_lea.vmem %s11705_s30, 4608  ;;  %p11484_p4 = scmp.lt.s32.totalorder %s11705_s30, %s11705_s30 }
  0x3c   : > { %p11477_p1 = scmp.ne.s32.totalorder %s11705_s30, %s11476_s22  ;;  %p11485_p7 = scmp.lt.s32.totalorder %s11476_s22, %s11476_s22 }
  0x3e   : > { %p11479_p2 = pnand %p11477_p1, %p11437_p0  ;;  %p11486_p8 = por %p11485_p7, %p11484_p4 }
  0x40   : > { %p11480_p3 = pneg %p11479_p2 }
  0x42   : > { %p11487_p11 = pnand %p11486_p8, %p11480_p3 }
  0x44   : > { %11490 = shalt.err (!%p11487_p11)
}
  0x45   : > { %s11567_s13 = smov 128   ;;  %s11568_s25 = smov 8  }
  0x46   : > { %11354 = dma.hbm_to_vmem [thread:$0]  (!%p11701_p12), %s14427_s10, 4608, %s11705_s30, [#allocation10], %s11567_s13, %s11567_s13, %s11568_s25  }
  0x47   : > { %p14457_p13 = scmp.ne.s32.totalorder %s14455_s20, 0 }
  0x49   : > { %416 = sbr.rel (%p14457_p13) target bundleno = 2155 (0x86b), region = 72 }
  0x50   : > { %p14458_p0 = scmp.eq.s32.totalorder %s11665_s29, 0 }
  0x52   : > { %11536 = dma.done.wait (%p14458_p0), [#allocation7], 576   ;;  %p14459_p5 = pmov %p14458_p0 }
  0x53   : > { %p14460_p6 = pmov %p14458_p0 }
  0x54   : > { %11538 = vsyncadd (%p14459_p5), [#allocation7], 4294966720 }
  0x55   : > { %11540 = dma.done.wait (%p14460_p6), [#allocation10], 4608   ;;  %p14461_p9 = pmov %p14458_p0 }
  0x56   : > { %p463_p10 = scmp.lt.s32.totalorder %s11665_s29, 1  ;;  %vm500_vm0 = vcmask 23552   ;;  %v14441_v0 = vmov 0.0   ;;  %vm503_vm1 = vcmask 17408   ;;  %vm724_vm2 = vcmask 1042432   ;;  %s461_s21 = sand.u32 1, %s11553_s26  }
  0x57   : > { %11542 = vsyncadd (%p14461_p9), [#allocation10], 4294962688  ;;  %508 = vst.msk [vmem:[#allocation2 + $0x30] sm:$0xff] %vm500_vm0, %v14441_v0  ;;  %v11881_v1 = vld [vmem:[#allocation6 + $0x18] sm:$0x7]  ;;  %vm4129_vm3 = vcmask 254976  }
  0x58   : > { %509 = vst.msk [vmem:[#allocation2 + $0x38] sm:$0xff] %vm500_vm0, %v14441_v0  ;;  %501 = vst.msk [vmem:[#allocation2] sm:$0xff] %vm500_vm0, %v14441_v0  ;;  %s464_s20 = scalar_select %p463_p10, %s11665_s29, 1  ;;  %v1492_v3 = vld [vmem:[#allocation6 + $0x4] sm:$0x7]  ;;  %10058 = vmatprep.subr.msk.mxu0 %vm724_vm2, %v11881_v1  ;;  %vm5026_vm4 = vcmask 261120  }
  0x59   : > { %502 = vst.msk [vmem:[#allocation2 + $0x8] sm:$0xff] %vm500_vm0, %v14441_v0  ;;  %505 = vst.msk [vmem:[#allocation2 + $0x18] sm:$0xff] %vm500_vm0, %v14441_v0  ;;  %10059 = vmatpush3.msk.msra.mxu0 %vm724_vm2, %v11881_v1  ;;  %v1850_v34 = vld [vmem:[#allocation6 + $0x10] sm:$0x7]  ;;  %v12053_v63 = vld [vmem:[#allocation6 + $0x1c] sm:$0x7] }
  0x5a   : > { %506 = vst.msk [vmem:[#allocation2 + $0x20] sm:$0xff] %vm500_vm0, %v14441_v0  ;;  %511 = vst.msk [vmem:[#allocation2 + $0x48] sm:$0xff] %vm500_vm0, %v14441_v0  ;;  %s9453_s23 = sshll.u32 %s464_s20, 8  ;;  %10108 = vmatprep.subr.msk.mxu0 %vm724_vm2, %v1492_v3  ;;  %vm5303_vm5 = vcmask 1041409   ;;  %vm5305_vm6 = vcmask 1042434   ;;  %vm5307_vm7 = vcmask 1043459  }
  0x5b   : > { %512 = vst.msk [vmem:[#allocation2 + $0x50] sm:$0xff] %vm500_vm0, %v14441_v0  ;;  %514 = vst.msk [vmem:[#allocation2 + $0x60] sm:$0xff] %vm500_vm0, %v14441_v0  ;;  %s11879_s14 = scalar_lea.vmem %s14417_s0, %s9453_s23  ;;  %vm5309_vm8 = vcmask 1044484   ;;  %vm5311_vm9 = vcmask 1045509   ;;  %vm5313_vm10 = vcmask 1046534   ;;  %vm5315_vm11 = vcmask 1047559  }
  0x5c   : > { %515 = vst.msk [vmem:[#allocation2 + $0x68] sm:$0xff] %vm500_vm0, %v14441_v0  ;;  %517 = vst.msk [vmem:[#allocation2 + $0x78] sm:$0xff] %vm500_vm0, %v14441_v0  ;;  %v470_v2 = vld [vmem:[%s11879_s14 + $0x10] sm:$0xff]  ;;  %v471_v4 = vld [vmem:[%s11879_s14 + $0x18] sm:$0xff]  ;;  %vm7034_vm12 = vcmask 259072   ;;  %vm7074_vm13 = vcmask 257024  }
  0x5d   : > { %518 = vst.msk [vmem:[#allocation2 + $0x80] sm:$0xff] %vm500_vm0, %v14441_v0  ;;  %520 = vst.msk [vmem:[#allocation2 + $0x90] sm:$0xff] %vm500_vm0, %v14441_v0  ;;  %v472_v5 = vld [vmem:[%s11879_s14 + $0x20] sm:$0xff]  ;;  %v473_v6 = vld [vmem:[%s11879_s14 + $0x28] sm:$0xff]  ;;  %vm11572_vm14 = vmmov 0   ;;  %s9450_s24 = sshll.u32 %s11665_s29, 4 }
  0x5e   : > { %521 = vst.msk [vmem:[#allocation2 + $0x98] sm:$0xff] %vm500_vm0, %v14441_v0  ;;  %523 = vst.msk [vmem:[#allocation2 + $0xa8] sm:$0xff] %vm500_vm0, %v14441_v0  ;;  %v474_v7 = vld [vmem:[%s11879_s14 + $0x30] sm:$0xff]  ;;  %v475_v8 = vld [vmem:[%s11879_s14 + $0x38] sm:$0xff]  ;;  %s462_s22 = scalar_lea.vmem [#allocation11], %s461_s21  ;;  %vm8880_vm15 = vcmask 253952  }
  0x5f   : > { %524 = vst.msk [vmem:[#allocation2 + $0xb0] sm:$0xff] %vm500_vm0, %v14441_v0  ;;  %526 = vst.msk [vmem:[#allocation2 + $0xc0] sm:$0xff] %vm500_vm0, %v14441_v0  ;;  %v476_v9 = vld [vmem:[%s11879_s14 + $0x40] sm:$0xff]  ;;  %v477_v10 = vld [vmem:[%s11879_s14 + $0x48] sm:$0xff]  ;;  %s8895_s13 = sshll.u32 %s462_s22, 4  ;;  %s14502_s27 = sld [smem:[#allocation39_spill]]  ;;  %s14377_s13 = int_to_ptr.vmem [resolvable:$true] %s8895_s13 }
  0x60   : > { %527 = vst.msk [vmem:[#allocation2 + $0xc8] sm:$0xff] %vm500_vm0, %v14441_v0  ;;  %529 = vst.msk [vmem:[#allocation2 + $0xd8] sm:$0xff] %vm500_vm0, %v14441_v0  ;;  %v478_v11 = vld [vmem:[%s11879_s14 + $0x50] sm:$0xff]  ;;  %v479_v12 = vld [vmem:[%s11879_s14 + $0x58] sm:$0xff]  ;;  %s8883_s29 = scalar_lea.sflag [#allocation8], %s461_s21  ;;  %s11491_s30 = scalar_lea.vmem %s14377_s13, 16 }
  0x61   : > { %530 = vst.msk [vmem:[#allocation2 + $0xe0] sm:$0xff] %vm500_vm0, %v14441_v0  ;;  %532 = vst.msk [vmem:[#allocation2 + $0xf0] sm:$0xff] %vm500_vm0, %v14441_v0  ;;  %v480_v13 = vld [vmem:[%s11879_s14 + $0x60] sm:$0xff]  ;;  %v481_v14 = vld [vmem:[%s11879_s14 + $0x68] sm:$0xff]  ;;  %p11492_p12 = scmp.ne.s32.totalorder %s14377_s13, %s11491_s30  ;;  %p14504_p1 = scmp.ne.s32.totalorder %s14452_s18, 0 }
  0x62   : > { %533 = vst.msk [vmem:[#allocation2 + $0xf8] sm:$0xff] %vm500_vm0, %v14441_v0  ;;  %535 = vst.msk [vmem:[#allocation2 + $0x108] sm:$0xff] %vm500_vm0, %v14441_v0  ;;  %v482_v15 = vld [vmem:[%s11879_s14 + $0x70] sm:$0xff]  ;;  %v483_v16 = vld [vmem:[%s11879_s14 + $0x78] sm:$0xff]  ;;  %s11573_s15 = smov [#allocation11]  }
  0x63   : > { %536 = vst.msk [vmem:[#allocation2 + $0x110] sm:$0xff] %vm500_vm0, %v14441_v0  ;;  %538 = vst.msk [vmem:[#allocation2 + $0x120] sm:$0xff] %vm500_vm0, %v14441_v0  ;;  %v484_v17 = vld [vmem:[%s11879_s14 + $0x80] sm:$0xff]  ;;  %v485_v18 = vld [vmem:[%s11879_s14 + $0x88] sm:$0xff]  ;;  %p11493_p2 = pnand %p11492_p12, %p14504_p1 }
  0x64   : > { %539 = vst.msk [vmem:[#allocation2 + $0x128] sm:$0xff] %vm500_vm0, %v14441_v0  ;;  %541 = vst.msk [vmem:[#allocation2 + $0x138] sm:$0xff] %vm500_vm0, %v14441_v0  ;;  %v486_v19 = vld [vmem:[%s11879_s14 + $0x90] sm:$0xff]  ;;  %v487_v20 = vld [vmem:[%s11879_s14 + $0x98] sm:$0xff] }
  0x65   : > { %542 = vst.msk [vmem:[#allocation2 + $0x140] sm:$0xff] %vm500_vm0, %v14441_v0  ;;  %544 = vst.msk [vmem:[#allocation2 + $0x150] sm:$0xff] %vm500_vm0, %v14441_v0  ;;  %v488_v21 = vld [vmem:[%s11879_s14 + $0xa0] sm:$0xff]  ;;  %v489_v22 = vld [vmem:[%s11879_s14 + $0xa8] sm:$0xff]  ;;  %s14503_s20 = smov %s14502_s27  ;;  %s14375_s23 = scalar_lea.hbm %s14502_s27, %s9450_s24 }
  0x66   : > { %545 = vst.msk [vmem:[#allocation2 + $0x158] sm:$0xff] %vm500_vm0, %v14441_v0  ;;  %547 = vst.msk [vmem:[#allocation2 + $0x168] sm:$0xff] %vm500_vm0, %v14441_v0  ;;  %v490_v23 = vld [vmem:[%s11879_s14 + $0xb0] sm:$0xff]  ;;  %v491_v24 = vld [vmem:[%s11879_s14 + $0xb8] sm:$0xff]  ;;  %p11494_p3 = pneg %p11493_p2 }
  0x67   : > { %548 = vst.msk [vmem:[#allocation2 + $0x170] sm:$0xff] %vm500_vm0, %v14441_v0  ;;  %550 = vst.msk [vmem:[#allocation2 + $0x180] sm:$0xff] %vm500_vm0, %v14441_v0  ;;  %v492_v26 = vld [vmem:[%s11879_s14 + $0xc0] sm:$0xff]  ;;  %v493_v27 = vld [vmem:[%s11879_s14 + $0xc8] sm:$0xff] }
  0x68   : > { %551 = vst.msk [vmem:[#allocation2 + $0x188] sm:$0xff] %vm500_vm0, %v14441_v0  ;;  %553 = vst.msk [vmem:[#allocation2 + $0x198] sm:$0xff] %vm500_vm0, %v14441_v0  ;;  %v468_v35 = vld [vmem:[%s11879_s14] sm:$0xff]  ;;  %v469_v36 = vld [vmem:[%s11879_s14 + $0x8] sm:$0xff] }
  0x69   : > { %554 = vst.msk [vmem:[#allocation2 + $0x1a0] sm:$0xff] %vm500_vm0, %v14441_v0  ;;  %559 = vst.msk [vmem:[#allocation2 + $0x31] sm:$0xff] %vm500_vm0, %v470_v2  ;;  %v494_v42 = vld [vmem:[%s11879_s14 + $0xd0] sm:$0xff]  ;;  %v495_v43 = vld [vmem:[%s11879_s14 + $0xd8] sm:$0xff] }
  0x6a   : > { %510 = vst.msk [vmem:[#allocation2 + $0x40] sm:$0x3] %vm503_vm1, %v14441_v0  ;;  %504 = vst.msk [vmem:[#allocation2 + $0x10] sm:$0x3] %vm503_vm1, %v14441_v0  ;;  %v496_v44 = vld [vmem:[%s11879_s14 + $0xe0] sm:$0xff]  ;;  %v497_v46 = vld [vmem:[%s11879_s14 + $0xe8] sm:$0xff] }
  0x6b   : > { %507 = vst.msk [vmem:[#allocation2 + $0x28] sm:$0x3] %vm503_vm1, %v14441_v0  ;;  %513 = vst.msk [vmem:[#allocation2 + $0x58] sm:$0x3] %vm503_vm1, %v14441_v0  ;;  %v498_v55 = vld [vmem:[%s11879_s14 + $0xf0] sm:$0xff]  ;;  %v499_v56 = vld [vmem:[%s11879_s14 + $0xf8] sm:$0xff] }
  0x6c   : > { %516 = vst.msk [vmem:[#allocation2 + $0x70] sm:$0x3] %vm503_vm1, %v14441_v0  ;;  %519 = vst.msk [vmem:[#allocation2 + $0x88] sm:$0x3] %vm503_vm1, %v14441_v0  ;;  %v1455_v60 = vld [vmem:[#allocation2 + $0x1] sm:$0xff]  ;;  %s11495_s14 = sshll.u32 %s11573_s15, 4  ;;  %s11496_s14 = int_to_ptr.vmem [resolvable:$false] %s11495_s14 }
  0x6d   : > { %522 = vst.msk [vmem:[#allocation2 + $0xa0] sm:$0x3] %vm503_vm1, %v14441_v0  ;;  %525 = vst.msk [vmem:[#allocation2 + $0xb8] sm:$0x3] %vm503_vm1, %v14441_v0  ;;  %s11497_s17 = scalar_lea.vmem %s11496_s14, 32  ;;  %p11498_p4 = scmp.lt.s32.totalorder %s14377_s13, %s11496_s14 }
  0x6e   : > { %528 = vst.msk [vmem:[#allocation2 + $0xd0] sm:$0x3] %vm503_vm1, %v14441_v0  ;;  %531 = vst.msk [vmem:[#allocation2 + $0xe8] sm:$0x3] %vm503_vm1, %v14441_v0  ;;  %p11499_p7 = scmp.lt.s32.totalorder %s11497_s17, %s11491_s30 }
  0x6f   : > { %534 = vst.msk [vmem:[#allocation2 + $0x100] sm:$0x3] %vm503_vm1, %v14441_v0  ;;  %537 = vst.msk [vmem:[#allocation2 + $0x118] sm:$0x3] %vm503_vm1, %v14441_v0 }
  0x70   : > { %540 = vst.msk [vmem:[#allocation2 + $0x130] sm:$0x3] %vm503_vm1, %v14441_v0  ;;  %543 = vst.msk [vmem:[#allocation2 + $0x148] sm:$0x3] %vm503_vm1, %v14441_v0  ;;  %v11929_v25 = vld [vmem:[#allocation2 + $0x30] sm:$0xff]  ;;  %p11500_p8 = por %p11499_p7, %p11498_p4 }
  0x71   : > { %546 = vst.msk [vmem:[#allocation2 + $0x160] sm:$0x3] %vm503_vm1, %v14441_v0  ;;  %549 = vst.msk [vmem:[#allocation2 + $0x178] sm:$0x3] %vm503_vm1, %v14441_v0  ;;  %10060 = vmatprep.mubr.msk.f32.mxu0 %vm500_vm0, %v11929_v25  ;;  %v1456_v61 = vld [vmem:[#allocation2 + $0x9] sm:$0xff] }
  0x72   : > { %552 = vst.msk [vmem:[#allocation2 + $0x190] sm:$0x3] %vm503_vm1, %v14441_v0  ;;  %555 = vst.msk [vmem:[#allocation2 + $0x1a8] sm:$0x3] %vm503_vm1, %v14441_v0  ;;  %v589_v0 = vld [vmem:[#allocation2] sm:$0xff]  ;;  %p11501_p11 = pnand %p11500_p8, %p11494_p3 }
  0x73   : > { %560 = vst.msk [vmem:[#allocation2 + $0x39] sm:$0xff] %vm500_vm0, %v471_v4  ;;  %561 = vst.msk [vmem:[#allocation2 + $0x49] sm:$0xff] %vm500_vm0, %v472_v5 }
  0x74   : > { %562 = vst.msk [vmem:[#allocation2 + $0x51] sm:$0xff] %vm500_vm0, %v473_v6  ;;  %563 = vst.msk [vmem:[#allocation2 + $0x61] sm:$0xff] %vm500_vm0, %v474_v7 }
  0x75   : > { %564 = vst.msk [vmem:[#allocation2 + $0x69] sm:$0xff] %vm500_vm0, %v475_v8  ;;  %565 = vst.msk [vmem:[#allocation2 + $0x79] sm:$0xff] %vm500_vm0, %v476_v9 }
  0x76   : > { %566 = vst.msk [vmem:[#allocation2 + $0x81] sm:$0xff] %vm500_vm0, %v477_v10  ;;  %567 = vst.msk [vmem:[#allocation2 + $0x91] sm:$0xff] %vm500_vm0, %v478_v11 }
  0x77   : > { %568 = vst.msk [vmem:[#allocation2 + $0x99] sm:$0xff] %vm500_vm0, %v479_v12  ;;  %569 = vst.msk [vmem:[#allocation2 + $0xa9] sm:$0xff] %vm500_vm0, %v480_v13 }
  0x78   : > { %570 = vst.msk [vmem:[#allocation2 + $0xb1] sm:$0xff] %vm500_vm0, %v481_v14  ;;  %571 = vst.msk [vmem:[#allocation2 + $0xc1] sm:$0xff] %vm500_vm0, %v482_v15 }
  0x79   : > { %572 = vst.msk [vmem:[#allocation2 + $0xc9] sm:$0xff] %vm500_vm0, %v483_v16  ;;  %573 = vst.msk [vmem:[#allocation2 + $0xd9] sm:$0xff] %vm500_vm0, %v484_v17  ;;  %v627_v16 = vld [vmem:[#allocation6 + $0xc] sm:$0x7] }
  0x7a   : > { %574 = vst.msk [vmem:[#allocation2 + $0xe1] sm:$0xff] %vm500_vm0, %v485_v18  ;;  %575 = vst.msk [vmem:[#allocation2 + $0xf1] sm:$0xff] %vm500_vm0, %v486_v19  ;;  %v11938_v28 = vld [vmem:[#allocation2 + $0x38] sm:$0xff]  ;;  %v11940_v29 = vld [vmem:[#allocation2 + $0x48] sm:$0xff]  ;;  %9958 = vmatprep.subr.msk.mxu1 %vm724_vm2, %v627_v16 }
  0x7b   : > { %576 = vst.msk [vmem:[#allocation2 + $0xf9] sm:$0xff] %vm500_vm0, %v487_v20  ;;  %577 = vst.msk [vmem:[#allocation2 + $0x109] sm:$0xff] %vm500_vm0, %v488_v21  ;;  %10061 = vmatmul.mubr.msk.f32.vlgmr.msra.gmra.mrb[0].mxu0 %vm500_vm0, %v11938_v28  ;;  %v11949_v30 = vld [vmem:[#allocation2 + $0x50] sm:$0xff]  ;;  %v11951_v31 = vld [vmem:[#allocation2 + $0x60] sm:$0xff]  ;;  %9959 = vmatpush3.msk.msra.mxu1 %vm724_vm2, %v627_v16 }
  0x7c   : > { %578 = vst.msk [vmem:[#allocation2 + $0x111] sm:$0xff] %vm500_vm0, %v489_v22  ;;  %579 = vst.msk [vmem:[#allocation2 + $0x121] sm:$0xff] %vm500_vm0, %v490_v23  ;;  %10109 = vmatpush3.msk.msra.mxu0 %vm724_vm2, %v1492_v3  ;;  %10063 = vmatprep.mubr.msk.f32.mxu0 %vm500_vm0, %v11940_v29  ;;  %v11957_v32 = vld [vmem:[#allocation2 + $0x68] sm:$0xff]  ;;  %v11959_v33 = vld [vmem:[#allocation2 + $0x78] sm:$0xff] }
  0x7d   : > { %580 = vst.msk [vmem:[#allocation2 + $0x129] sm:$0xff] %vm500_vm0, %v491_v24  ;;  %581 = vst.msk [vmem:[#allocation2 + $0x139] sm:$0xff] %vm500_vm0, %v492_v26  ;;  %10158 = vmatprep.subr.msk.mxu0 %vm724_vm2, %v1850_v34  ;;  %v11969_v37 = vld [vmem:[#allocation2 + $0x80] sm:$0xff]  ;;  %v11972_v38 = vld [vmem:[#allocation2 + $0x90] sm:$0xff] }
  0x7e   : > { %582 = vst.msk [vmem:[#allocation2 + $0x141] sm:$0xff] %vm500_vm0, %v493_v27  ;;  %557 = vst.msk [vmem:[#allocation2 + $0x19] sm:$0xff] %vm500_vm0, %v468_v35  ;;  %v11978_v39 = vld [vmem:[#allocation2 + $0x98] sm:$0xff]  ;;  %v11980_v40 = vld [vmem:[#allocation2 + $0xa8] sm:$0xff] }
  0x7f   : > { %10064 = vmatmul.mubr.msk.f32.gmra.mrb[2].mxu0 %vm500_vm0, %v11949_v30  ;;  %558 = vst.msk [vmem:[#allocation2 + $0x21] sm:$0xff] %vm500_vm0, %v469_v36  ;;  %v11984_v41 = vld [vmem:[#allocation2 + $0xb0] sm:$0xff]  ;;  %v11991_v45 = vld [vmem:[#allocation2 + $0xc0] sm:$0xff]  ;;  %583 = vst.msk [vmem:[#allocation2 + $0x151] sm:$0xff] %vm500_vm0, %v494_v42 }
  0x80   : > { %10066 = vmatprep.mubr.msk.f32.mxu0 %vm500_vm0, %v11951_v31  ;;  %584 = vst.msk [vmem:[#allocation2 + $0x159] sm:$0xff] %vm500_vm0, %v495_v43  ;;  %585 = vst.msk [vmem:[#allocation2 + $0x169] sm:$0xff] %vm500_vm0, %v496_v44  ;;  %v12002_v47 = vld [vmem:[#allocation2 + $0xc8] sm:$0xff]  ;;  %v12004_v48 = vld [vmem:[#allocation2 + $0xd8] sm:$0xff] }
  0x81   : > { %586 = vst.msk [vmem:[#allocation2 + $0x171] sm:$0xff] %vm500_vm0, %v497_v46  ;;  %v12010_v49 = vld [vmem:[#allocation2 + $0xe0] sm:$0xff]  ;;  %v12012_v50 = vld [vmem:[#allocation2 + $0xf0] sm:$0xff]  ;;  %587 = vst.msk [vmem:[#allocation2 + $0x181] sm:$0xff] %vm500_vm0, %v498_v55 }
  0x82   : > { %v12018_v51 = vld [vmem:[#allocation2 + $0xf8] sm:$0xff]  ;;  %v12020_v52 = vld [vmem:[#allocation2 + $0x108] sm:$0xff]  ;;  %588 = vst.msk [vmem:[#allocation2 + $0x189] sm:$0xff] %vm500_vm0, %v499_v56  ;;  %v625_v16 = vld [vmem:[#allocation6] sm:$0x7] }
  0x83   : > { %10067 = vmatmul.mubr.msk.f32.gmra.mrb[4].mxu0 %vm500_vm0, %v11957_v32  ;;  %v12026_v53 = vld [vmem:[#allocation2 + $0x110] sm:$0xff]  ;;  %v12028_v54 = vld [vmem:[#allocation2 + $0x120] sm:$0xff]  ;;  %v12219_v55 = vld [vmem:[#allocation6 + $0x8] sm:$0x7]  ;;  %10008 = vmatprep.subr.msk.mxu1 %vm724_vm2, %v625_v16 }
  0x84   : > { %10069 = vmatprep.mubr.msk.f32.mxu0 %vm500_vm0, %v11959_v33  ;;  %v12038_v57 = vld [vmem:[#allocation2 + $0x128] sm:$0xff]  ;;  %v12040_v58 = vld [vmem:[#allocation2 + $0x138] sm:$0xff] }
  0x85   : > { %v12046_v59 = vld [vmem:[#allocation2 + $0x140] sm:$0xff]  ;;  %v12061_v3 = vld [vmem:[#allocation2 + $0x31] sm:$0xff]  ;;  %v12071_v5 = vld [vmem:[#allocation2 + $0x49] sm:$0xff] }
  0x86   : > { %v12051_v62 = vld [vmem:[#allocation2 + $0x19] sm:$0xff]  ;;  %v12059_v2 = vld [vmem:[#allocation2 + $0x21] sm:$0xff]  ;;  %v12077_v6 = vld [vmem:[#allocation2 + $0x51] sm:$0xff] }
  0x87   : > { %10070 = vmatmul.mubr.msk.f32.gmra.mrb[6].mxu0 %vm500_vm0, %v11969_v37  ;;  %v12069_v4 = vld [vmem:[#allocation2 + $0x39] sm:$0xff]  ;;  %v12079_v7 = vld [vmem:[#allocation2 + $0x61] sm:$0xff]  ;;  %v12085_v8 = vld [vmem:[#allocation2 + $0x69] sm:$0xff] }
  0x88   : > { %10072 = vmatprep.mubr.msk.f32.mxu0 %vm500_vm0, %v11972_v38  ;;  %v12087_v9 = vld [vmem:[#allocation2 + $0x79] sm:$0xff]  ;;  %v12093_v10 = vld [vmem:[#allocation2 + $0x81] sm:$0xff]  ;;  %v12095_v11 = vld [vmem:[#allocation2 + $0x91] sm:$0xff] }
  0x89   : > { %v12101_v12 = vld [vmem:[#allocation2 + $0x99] sm:$0xff]  ;;  %v12103_v13 = vld [vmem:[#allocation2 + $0xa9] sm:$0xff]  ;;  %v12109_v14 = vld [vmem:[#allocation2 + $0xb1] sm:$0xff] }
  0x8a   : > { %v12111_v15 = vld [vmem:[#allocation2 + $0xc1] sm:$0xff]  ;;  %v12115_v17 = vld [vmem:[#allocation2 + $0x18] sm:$0xff]  ;;  %v12121_v19 = vld [vmem:[#allocation2 + $0xc9] sm:$0xff] }
  0x8b   : > { %10073 = vmatmul.mubr.msk.f32.gmra.mrb[8].mxu0 %vm500_vm0, %v11978_v39  ;;  %v12117_v18 = vld [vmem:[#allocation2 + $0x20] sm:$0xff]  ;;  %9960 = vmatprep.mubr.msk.f32.mxu1 %vm500_vm0, %v12115_v17  ;;  %v12139_v22 = vld [vmem:[#allocation2 + $0xf1] sm:$0xff]  ;;  %v12151_v24 = vld [vmem:[#allocation2 + $0x109] sm:$0xff] }
  0x8c   : > { %10075 = vmatprep.mubr.msk.f32.mxu0 %vm500_vm0, %v11980_v40  ;;  %v12124_v20 = vld [vmem:[#allocation2 + $0xd9] sm:$0xff]  ;;  %9961 = vmatmul.mubr.msk.f32.vlgmr.msra.gmra.mrb[0].mxu1 %vm500_vm0, %v12117_v18  ;;  %v12137_v21 = vld [vmem:[#allocation2 + $0xe1] sm:$0xff]  ;;  %v12161_v26 = vld [vmem:[#allocation2 + $0x111] sm:$0xff] }
  0x8d   : > { %9963 = vmatprep.mubr.msk.f32.mxu1 %vm500_vm0, %v11929_v25  ;;  %v12149_v23 = vld [vmem:[#allocation2 + $0xf9] sm:$0xff]  ;;  %v12163_v27 = vld [vmem:[#allocation2 + $0x121] sm:$0xff]  ;;  %v12187_v42 = vld [vmem:[#allocation2 + $0x151] sm:$0xff]  ;;  %10009 = vmatpush3.msk.msra.mxu1 %vm724_vm2, %v625_v16 }
  0x8e   : > { %v12175_v35 = vld [vmem:[#allocation2 + $0x139] sm:$0xff]  ;;  %v12185_v36 = vld [vmem:[#allocation2 + $0x141] sm:$0xff]  ;;  %v12199_v44 = vld [vmem:[#allocation2 + $0x169] sm:$0xff]  ;;  %10984 = vmatprep.subr.msk.mxu1 %vm724_vm2, %v11881_v1 }
  0x8f   : > { %10076 = vmatmul.mubr.msk.f32.gmra.mrb[10].mxu0 %vm500_vm0, %v11984_v41  ;;  %v12197_v43 = vld [vmem:[#allocation2 + $0x159] sm:$0xff]  ;;  %v12209_v46 = vld [vmem:[#allocation2 + $0x171] sm:$0xff] }
  0x90   : > { %10078 = vmatprep.mubr.msk.f32.mxu0 %vm500_vm0, %v11991_v45  ;;  %9964 = vmatmul.mubr.msk.f32.gmra.mrb[2].mxu1 %vm500_vm0, %v11938_v28  ;;  %v12261_v56 = vld [vmem:[#allocation2 + $0x150] sm:$0xff] }
  0x91   : > { %9966 = vmatprep.mubr.msk.f32.mxu1 %vm500_vm0, %v11940_v29 }
  0x93   : > { %10079 = vmatmul.mubr.msk.f32.gmra.mrb[12].mxu0 %vm500_vm0, %v12002_v47 }
  0x94   : > { %10081 = vmatprep.mubr.msk.f32.mxu0 %vm500_vm0, %v12004_v48  ;;  %9967 = vmatmul.mubr.msk.f32.gmra.mrb[4].mxu1 %vm500_vm0, %v11949_v30 }
  0x95   : > { %9969 = vmatprep.mubr.msk.f32.mxu1 %vm500_vm0, %v11951_v31 }
  0x97   : > { %10082 = vmatmul.mubr.msk.f32.gmra.mrb[14].mxu0 %vm500_vm0, %v12010_v49 }
  0x98   : > { %10084 = vmatprep.mubr.msk.f32.mxu0 %vm500_vm0, %v12012_v50  ;;  %9970 = vmatmul.mubr.msk.f32.gmra.mrb[6].mxu1 %vm500_vm0, %v11957_v32 }
  0x99   : > { %9972 = vmatprep.mubr.msk.f32.mxu1 %vm500_vm0, %v11959_v33 }
  0x9b   : > { %10085 = vmatmul.mubr.msk.f32.gmra.mrb[16].mxu0 %vm500_vm0, %v12018_v51 }
  0x9c   : > { %10087 = vmatprep.mubr.msk.f32.mxu0 %vm500_vm0, %v12020_v52  ;;  %9973 = vmatmul.mubr.msk.f32.gmra.mrb[8].mxu1 %vm500_vm0, %v11969_v37 }
  0x9d   : > { %9975 = vmatprep.mubr.msk.f32.mxu1 %vm500_vm0, %v11972_v38 }
  0x9f   : > { %10088 = vmatmul.mubr.msk.f32.gmra.mrb[18].mxu0 %vm500_vm0, %v12026_v53 }
  0xa0   : > { %10090 = vmatprep.mubr.msk.f32.mxu0 %vm500_vm0, %v12028_v54  ;;  %9976 = vmatmul.mubr.msk.f32.gmra.mrb[10].mxu1 %vm500_vm0, %v11978_v39 }
  0xa1   : > { %9978 = vmatprep.mubr.msk.f32.mxu1 %vm500_vm0, %v11980_v40 }
  0xa3   : > { %10091 = vmatmul.mubr.msk.f32.gmra.mrb[20].mxu0 %vm500_vm0, %v12038_v57 }
  0xa4   : > { %10093 = vmatprep.mubr.msk.f32.mxu0 %vm500_vm0, %v12040_v58  ;;  %9979 = vmatmul.mubr.msk.f32.gmra.mrb[12].mxu1 %vm500_vm0, %v11984_v41 }
  0xa5   : > { %9981 = vmatprep.mubr.msk.f32.mxu1 %vm500_vm0, %v11991_v45 }
  0xa7   : > { %10094 = vmatmul.mubr.msk.f32.gmra.mrb[22].mxu0 %vm500_vm0, %v12046_v59 }
  0xa8   : > { %10110 = vmatprep.mubr.msk.f32.mxu0 %vm500_vm0, %v1455_v60  ;;  %9982 = vmatmul.mubr.msk.f32.gmra.mrb[14].mxu1 %vm500_vm0, %v12002_v47  ;;  %v12263_v60 = vld [vmem:[#allocation2 + $0x158] sm:$0xff] }
  0xa9   : > { %9984 = vmatprep.mubr.msk.f32.mxu1 %vm500_vm0, %v12004_v48 }
  0xab   : > { %10111 = vmatmul.mubr.msk.f32.vlgmr.msra.gmra.mrb[0].mxu0 %vm500_vm0, %v1456_v61  ;;  %v12273_v61 = vld [vmem:[#allocation2 + $0x168] sm:$0xff] }
  0xac   : > { %10159 = vmatpush3.msk.msra.mxu0 %vm724_vm2, %v1850_v34  ;;  %10113 = vmatprep.mubr.msk.f32.mxu0 %vm500_vm0, %v12051_v62  ;;  %v12173_v34 = vld [vmem:[#allocation2 + $0x129] sm:$0xff] }
  0xad   : > { %10208 = vmatprep.subr.msk.mxu0 %vm724_vm2, %v12053_v63  ;;  %9985 = vmatmul.mubr.msk.f32.gmra.mrb[16].mxu1 %vm500_vm0, %v12010_v49 }
  0xae   : > { %9987 = vmatprep.mubr.msk.f32.mxu1 %vm500_vm0, %v12012_v50 }
  0xaf   : > { %10114 = vmatmul.mubr.msk.f32.gmra.mrb[2].mxu0 %vm500_vm0, %v12059_v2 }
  0xb0   : > { %10116 = vmatprep.mubr.msk.f32.mxu0 %vm500_vm0, %v12061_v3 }
  0xb1   : > { %9988 = vmatmul.mubr.msk.f32.gmra.mrb[18].mxu1 %vm500_vm0, %v12018_v51 }
  0xb2   : > { %9990 = vmatprep.mubr.msk.f32.mxu1 %vm500_vm0, %v12020_v52 }
  0xb3   : > { %10117 = vmatmul.mubr.msk.f32.gmra.mrb[4].mxu0 %vm500_vm0, %v12069_v4 }
  0xb4   : > { %10119 = vmatprep.mubr.msk.f32.mxu0 %vm500_vm0, %v12071_v5 }
  0xb5   : > { %9991 = vmatmul.mubr.msk.f32.gmra.mrb[20].mxu1 %vm500_vm0, %v12026_v53 }
  0xb6   : > { %9993 = vmatprep.mubr.msk.f32.mxu1 %vm500_vm0, %v12028_v54 }
  0xb7   : > { %10120 = vmatmul.mubr.msk.f32.gmra.mrb[6].mxu0 %vm500_vm0, %v12077_v6 }
  0xb8   : > { %10122 = vmatprep.mubr.msk.f32.mxu0 %vm500_vm0, %v12079_v7 }
  0xb9   : > { %9994 = vmatmul.mubr.msk.f32.gmra.mrb[22].mxu1 %vm500_vm0, %v12038_v57 }
  0xba   : > { %9996 = vmatprep.mubr.msk.f32.mxu1 %vm500_vm0, %v12040_v58 }
  0xbb   : > { %10123 = vmatmul.mubr.msk.f32.gmra.mrb[8].mxu0 %vm500_vm0, %v12085_v8 }
  0xbc   : > { %10125 = vmatprep.mubr.msk.f32.mxu0 %vm500_vm0, %v12087_v9 }
  0xbd   : > { %9997 = vmatmul.mubr.msk.f32.gmra.mrb[24].mxu1 %vm500_vm0, %v12046_v59 }
  0xbe   : > { %9999 = vmatprep.mubr.msk.f32.mxu1 %vm500_vm0, %v12261_v56 }
  0xbf   : > { %10126 = vmatmul.mubr.msk.f32.gmra.mrb[10].mxu0 %vm500_vm0, %v12093_v10 }
  0xc0   : > { %10128 = vmatprep.mubr.msk.f32.mxu0 %vm500_vm0, %v12095_v11 }
  0xc1   : > { %10000 = vmatmul.mubr.msk.f32.gmra.mrb[26].mxu1 %vm500_vm0, %v12263_v60 }
  0xc2   : > { %10002 = vmatprep.mubr.msk.f32.mxu1 %vm500_vm0, %v12273_v61 }
  0xc3   : > { %10129 = vmatmul.mubr.msk.f32.gmra.mrb[12].mxu0 %vm500_vm0, %v12101_v12 }
  0xc4   : > { %10131 = vmatprep.mubr.msk.f32.mxu0 %vm500_vm0, %v12103_v13 }
  0xc7   : > { %10132 = vmatmul.mubr.msk.f32.gmra.mrb[14].mxu0 %vm500_vm0, %v12109_v14 }
  0xc8   : > { %10134 = vmatprep.mubr.msk.f32.mxu0 %vm500_vm0, %v12111_v15 }
  0xcb   : > { %10135 = vmatmul.mubr.msk.f32.gmra.mrb[16].mxu0 %vm500_vm0, %v12121_v19 }
  0xcc   : > { %10137 = vmatprep.mubr.msk.f32.mxu0 %vm500_vm0, %v12124_v20 }
  0xcf   : > { %10138 = vmatmul.mubr.msk.f32.gmra.mrb[18].mxu0 %vm500_vm0, %v12137_v21 }
  0xd0   : > { %10140 = vmatprep.mubr.msk.f32.mxu0 %vm500_vm0, %v12139_v22 }
  0xd3   : > { %10141 = vmatmul.mubr.msk.f32.gmra.mrb[20].mxu0 %vm500_vm0, %v12149_v23 }
  0xd4   : > { %10143 = vmatprep.mubr.msk.f32.mxu0 %vm500_vm0, %v12151_v24 }
  0xd7   : > { %10144 = vmatmul.mubr.msk.f32.gmra.mrb[22].mxu0 %vm500_vm0, %v12161_v26 }
  0xd8   : > { %10146 = vmatprep.mubr.msk.f32.mxu0 %vm500_vm0, %v12163_v27 }
  0xdb   : > { %10147 = vmatmul.mubr.msk.f32.gmra.mrb[24].mxu0 %vm500_vm0, %v12173_v34 }
  0xdc   : > { %10149 = vmatprep.mubr.msk.f32.mxu0 %vm500_vm0, %v12175_v35 }
  0xdf   : > { %10150 = vmatmul.mubr.msk.f32.gmra.mrb[26].mxu0 %vm500_vm0, %v12185_v36 }
  0xe0   : > { %10152 = vmatprep.mubr.msk.f32.mxu0 %vm500_vm0, %v12187_v42 }
  0xe3   : > { %10153 = vmatmul.mubr.msk.f32.gmra.mrb[28].mxu0 %vm500_vm0, %v12197_v43 }
  0xe4   : > { %10155 = vmatprep.mubr.msk.f32.mxu0 %vm500_vm0, %v12199_v44 }
  0xe7   : > { %10156 = vmatmul.mubr.msk.f32.gmra.mrb[30].mxu0 %vm500_vm0, %v12209_v46 }
  0xe8   : > { %10160 = vmatprep.mubr.msk.f32.mxu0 %vm500_vm0, %v12051_v62  ;;  %v12275_v62 = vld [vmem:[#allocation2 + $0x170] sm:$0xff] }
  0xe9   : > { %14462 = vst [vmem:[#allocation21_spill] sm:$0xff] %v12275_v62  ;;  %10003 = vmatmul.mubr.msk.f32.gmra.mrb[28].mxu1 %vm500_vm0, %v12275_v62  ;;  %v590_v62 = vld [vmem:[#allocation2 + $0x8] sm:$0xff] }
  0xeb   : > { %10161 = vmatmul.mubr.msk.f32.vlgmr.msra.gmra.mrb[0].mxu0 %vm500_vm0, %v12059_v2  ;;  %v12287_v2 = vld [vmem:[#allocation2 + $0x188] sm:$0xff] }
  0xec   : > { %10209 = vmatpush3.msk.msra.mxu0 %vm724_vm2, %v12053_v63  ;;  %10163 = vmatprep.mubr.msk.f32.mxu0 %vm500_vm0, %v12061_v3  ;;  %v12285_v63 = vld [vmem:[#allocation2 + $0x180] sm:$0xff] }
  0xed   : > { %10258 = vmatprep.subr.msk.mxu0 %vm724_vm2, %v12219_v55  ;;  %10005 = vmatprep.mubr.msk.f32.mxu1 %vm500_vm0, %v12285_v63 }
  0xee   : > { %10006 = vmatmul.mubr.msk.f32.gmra.mrb[30].mxu1 %vm500_vm0, %v12287_v2 }
  0xef   : > { %10164 = vmatmul.mubr.msk.f32.gmra.mrb[2].mxu0 %vm500_vm0, %v12069_v4  ;;  %10010 = vmatprep.mubr.msk.f32.mxu1 %vm500_vm0, %v589_v0  ;;  %v12353_v0 = vld [vmem:[#allocation2 + $0x181] sm:$0xff] }
  0xf0   : > { %10166 = vmatprep.mubr.msk.f32.mxu0 %vm500_vm0, %v12071_v5 }
  0xf2   : > { %10011 = vmatmul.mubr.msk.f32.vlgmr.msra.gmra.mrb[0].mxu1 %vm500_vm0, %v590_v62 }
  0xf3   : > { %10167 = vmatmul.mubr.msk.f32.gmra.mrb[4].mxu0 %vm500_vm0, %v12077_v6  ;;  %10013 = vmatprep.mubr.msk.f32.mxu1 %vm500_vm0, %v12115_v17  ;;  %v12594_v17 = vld [vmem:[#allocation2 + $0x16a] sm:$0xff] }
  0xf4   : > { %10169 = vmatprep.mubr.msk.f32.mxu0 %vm500_vm0, %v12079_v7  ;;  %10985 = vmatpush3.msk.msra.mxu1 %vm724_vm2, %v11881_v1  ;;  %v1488_v1 = vld [vmem:[#allocation2 + $0x189] sm:$0xff] }
  0xf6   : > { %10014 = vmatmul.mubr.msk.f32.gmra.mrb[2].mxu1 %vm500_vm0, %v12117_v18  ;;  %v12600_v18 = vld [vmem:[#allocation2 + $0x172] sm:$0xff] }
  0xf7   : > { %10170 = vmatmul.mubr.msk.f32.gmra.mrb[6].mxu0 %vm500_vm0, %v12085_v8  ;;  %10016 = vmatprep.mubr.msk.f32.mxu1 %vm500_vm0, %v11929_v25  ;;  %v12370_v25 = vld [vmem:[#allocation6 + $0x14] sm:$0x7] }
  0xf8   : > { %10172 = vmatprep.mubr.msk.f32.mxu0 %vm500_vm0, %v12087_v9 }
  0xfa   : > { %10017 = vmatmul.mubr.msk.f32.gmra.mrb[4].mxu1 %vm500_vm0, %v11938_v28  ;;  %v14463_v28 = vld [vmem:[#allocation21_spill] sm:$0xff] }
  0xfb   : > { %10173 = vmatmul.mubr.msk.f32.gmra.mrb[8].mxu0 %vm500_vm0, %v12093_v10  ;;  %10019 = vmatprep.mubr.msk.f32.mxu1 %vm500_vm0, %v11940_v29  ;;  %v623_v29 = vld [vmem:[#allocation2 + $0x198] sm:$0xff] }
  0xfc   : > { %10175 = vmatprep.mubr.msk.f32.mxu0 %vm500_vm0, %v12095_v11 }
  0xfe   : > { %10020 = vmatmul.mubr.msk.f32.gmra.mrb[6].mxu1 %vm500_vm0, %v11949_v30  ;;  %v624_v30 = vld [vmem:[#allocation2 + $0x1a0] sm:$0xff] }
  0xff   : > { %10176 = vmatmul.mubr.msk.f32.gmra.mrb[10].mxu0 %vm500_vm0, %v12101_v12  ;;  %10022 = vmatprep.mubr.msk.f32.mxu1 %vm500_vm0, %v11951_v31  ;;  %v1489_v31 = vld [vmem:[#allocation2 + $0x199] sm:$0xff] }
 0x100   : > { %10178 = vmatprep.mubr.msk.f32.mxu0 %vm500_vm0, %v12103_v13 }
 0x102   : > { %10023 = vmatmul.mubr.msk.f32.gmra.mrb[8].mxu1 %vm500_vm0, %v11957_v32  ;;  %v1490_v32 = vld [vmem:[#allocation2 + $0x1a1] sm:$0xff] }
 0x103   : > { %10179 = vmatmul.mubr.msk.f32.gmra.mrb[12].mxu0 %vm500_vm0, %v12109_v14  ;;  %10025 = vmatprep.mubr.msk.f32.mxu1 %vm500_vm0, %v11959_v33  ;;  %v2385_v33 = vld [vmem:[#allocation2 + $0x2] sm:$0xff] }
 0x104   : > { %10181 = vmatprep.mubr.msk.f32.mxu0 %vm500_vm0, %v12111_v15 }
 0x106   : > { %10026 = vmatmul.mubr.msk.f32.gmra.mrb[10].mxu1 %vm500_vm0, %v11969_v37  ;;  %v2386_v37 = vld [vmem:[#allocation2 + $0xa] sm:$0xff] }
 0x107   : > { %10182 = vmatmul.mubr.msk.f32.gmra.mrb[14].mxu0 %vm500_vm0, %v12121_v19  ;;  %10028 = vmatprep.mubr.msk.f32.mxu1 %vm500_vm0, %v11972_v38  ;;  %v12480_v38 = vld [vmem:[#allocation2 + $0x1a] sm:$0xff] }
 0x108   : > { %10184 = vmatprep.mubr.msk.f32.mxu0 %vm500_vm0, %v12124_v20 }
 0x10a   : > { %10029 = vmatmul.mubr.msk.f32.gmra.mrb[12].mxu1 %vm500_vm0, %v11978_v39  ;;  %v12482_v39 = vld [vmem:[#allocation6 + $0x20] sm:$0x7] }
 0x10b   : > { %10185 = vmatmul.mubr.msk.f32.gmra.mrb[16].mxu0 %vm500_vm0, %v12137_v21  ;;  %10031 = vmatprep.mubr.msk.f32.mxu1 %vm500_vm0, %v11980_v40  ;;  %v2388_v40 = vld [vmem:[#allocation2 + $0x22] sm:$0xff] }
 0x10c   : > { %10187 = vmatprep.mubr.msk.f32.mxu0 %vm500_vm0, %v12139_v22 }
 0x10e   : > { %10032 = vmatmul.mubr.msk.f32.gmra.mrb[14].mxu1 %vm500_vm0, %v11984_v41  ;;  %v12489_v41 = vld [vmem:[#allocation2 + $0x32] sm:$0xff] }
 0x10f   : > { %10188 = vmatmul.mubr.msk.f32.gmra.mrb[18].mxu0 %vm500_vm0, %v12149_v23  ;;  %10034 = vmatprep.mubr.msk.f32.mxu1 %vm500_vm0, %v11991_v45  ;;  %v12496_v45 = vld [vmem:[#allocation2 + $0x3a] sm:$0xff] }
 0x110   : > { %10190 = vmatprep.mubr.msk.f32.mxu0 %vm500_vm0, %v12151_v24 }
 0x112   : > { %10035 = vmatmul.mubr.msk.f32.gmra.mrb[16].mxu1 %vm500_vm0, %v12002_v47  ;;  %v12498_v47 = vld [vmem:[#allocation2 + $0x4a] sm:$0xff] }
 0x113   : > { %10191 = vmatmul.mubr.msk.f32.gmra.mrb[20].mxu0 %vm500_vm0, %v12161_v26  ;;  %10037 = vmatprep.mubr.msk.f32.mxu1 %vm500_vm0, %v12004_v48  ;;  %v12504_v48 = vld [vmem:[#allocation2 + $0x52] sm:$0xff] }
 0x114   : > { %10193 = vmatprep.mubr.msk.f32.mxu0 %vm500_vm0, %v12163_v27 }
 0x116   : > { %10038 = vmatmul.mubr.msk.f32.gmra.mrb[18].mxu1 %vm500_vm0, %v12010_v49  ;;  %v12506_v49 = vld [vmem:[#allocation2 + $0x62] sm:$0xff] }
 0x117   : > { %10194 = vmatmul.mubr.msk.f32.gmra.mrb[22].mxu0 %vm500_vm0, %v12173_v34  ;;  %10040 = vmatprep.mubr.msk.f32.mxu1 %vm500_vm0, %v12012_v50  ;;  %v12512_v50 = vld [vmem:[#allocation2 + $0x6a] sm:$0xff] }
 0x118   : > { %10196 = vmatprep.mubr.msk.f32.mxu0 %vm500_vm0, %v12175_v35 }
 0x11a   : > { %10041 = vmatmul.mubr.msk.f32.gmra.mrb[20].mxu1 %vm500_vm0, %v12018_v51  ;;  %v12514_v51 = vld [vmem:[#allocation2 + $0x7a] sm:$0xff] }
 0x11b   : > { %10197 = vmatmul.mubr.msk.f32.gmra.mrb[24].mxu0 %vm500_vm0, %v12185_v36  ;;  %10043 = vmatprep.mubr.msk.f32.mxu1 %vm500_vm0, %v12020_v52  ;;  %v12520_v52 = vld [vmem:[#allocation2 + $0x82] sm:$0xff] }
 0x11c   : > { %10199 = vmatprep.mubr.msk.f32.mxu0 %vm500_vm0, %v12187_v42 }
 0x11e   : > { %10044 = vmatmul.mubr.msk.f32.gmra.mrb[22].mxu1 %vm500_vm0, %v12026_v53  ;;  %v12522_v53 = vld [vmem:[#allocation2 + $0x92] sm:$0xff] }
 0x11f   : > { %10200 = vmatmul.mubr.msk.f32.gmra.mrb[26].mxu0 %vm500_vm0, %v12197_v43  ;;  %10046 = vmatprep.mubr.msk.f32.mxu1 %vm500_vm0, %v12028_v54  ;;  %v12528_v54 = vld [vmem:[#allocation2 + $0x9a] sm:$0xff] }
 0x120   : > { %10202 = vmatprep.mubr.msk.f32.mxu0 %vm500_vm0, %v12199_v44 }
 0x122   : > { %10047 = vmatmul.mubr.msk.f32.gmra.mrb[24].mxu1 %vm500_vm0, %v12038_v57  ;;  %v12530_v57 = vld [vmem:[#allocation2 + $0xaa] sm:$0xff] }
 0x123   : > { %10203 = vmatmul.mubr.msk.f32.gmra.mrb[28].mxu0 %vm500_vm0, %v12209_v46  ;;  %10049 = vmatprep.mubr.msk.f32.mxu1 %vm500_vm0, %v12040_v58  ;;  %v12536_v58 = vld [vmem:[#allocation2 + $0xb2] sm:$0xff] }
 0x124   : > { %10205 = vmatprep.mubr.msk.f32.mxu0 %vm500_vm0, %v12353_v0 }
 0x126   : > { %10050 = vmatmul.mubr.msk.f32.gmra.mrb[26].mxu1 %vm500_vm0, %v12046_v59  ;;  %v12538_v59 = vld [vmem:[#allocation2 + $0xc2] sm:$0xff] }
 0x127   : > { %10206 = vmatmul.mubr.msk.f32.gmra.mrb[30].mxu0 %vm500_vm0, %v1488_v1  ;;  %10052 = vmatprep.mubr.msk.f32.mxu1 %vm500_vm0, %v12261_v56 }
 0x128   : > { %10210 = vmatprep.mubr.msk.f32.mxu0 %vm500_vm0, %v12061_v3  ;;  %v12544_v3 = vld [vmem:[#allocation2 + $0xca] sm:$0xff] }
 0x12a   : > { %10053 = vmatmul.mubr.msk.f32.gmra.mrb[28].mxu1 %vm500_vm0, %v12263_v60 }
 0x12b   : > { %10211 = vmatmul.mubr.msk.f32.vlgmr.msra.gmra.mrb[0].mxu0 %vm500_vm0, %v12069_v4  ;;  %10055 = vmatprep.mubr.msk.f32.mxu1 %vm500_vm0, %v12273_v61  ;;  %v12546_v4 = vld [vmem:[#allocation2 + $0xda] sm:$0xff] }
 0x12c   : > { %10259 = vmatpush3.msk.msra.mxu0 %vm724_vm2, %v12219_v55  ;;  %10213 = vmatprep.mubr.msk.f32.mxu0 %vm500_vm0, %v12071_v5  ;;  %v12552_v5 = vld [vmem:[#allocation2 + $0xe2] sm:$0xff] }
 0x12d   : > { %10308 = vmatprep.subr.msk.mxu0 %vm724_vm2, %v12370_v25 }
 0x12e   : > { %10056 = vmatmul.mubr.msk.f32.gmra.mrb[30].mxu1 %vm500_vm0, %v14463_v28 }
 0x12f   : > { %10214 = vmatmul.mubr.msk.f32.gmra.mrb[2].mxu0 %vm500_vm0, %v12077_v6  ;;  %10096 = vmatprep.mubr.msk.f32.mxu1 %vm500_vm0, %v12261_v56  ;;  %v12554_v6 = vld [vmem:[#allocation2 + $0xf2] sm:$0xff] }
 0x130   : > { %10216 = vmatprep.mubr.msk.f32.mxu0 %vm500_vm0, %v12079_v7  ;;  %v12560_v7 = vld [vmem:[#allocation2 + $0xfa] sm:$0xff] }
 0x132   : > { %10097 = vmatmul.mubr.msk.f32.vlgmr.msra.gmra.mrb[24].mxu1 %vm500_vm0, %v12263_v60 }
 0x133   : > { %10217 = vmatmul.mubr.msk.f32.gmra.mrb[4].mxu0 %vm500_vm0, %v12085_v8  ;;  %10099 = vmatprep.mubr.msk.f32.mxu1 %vm500_vm0, %v12273_v61  ;;  %v12562_v8 = vld [vmem:[#allocation2 + $0x10a] sm:$0xff] }
 0x134   : > { %10219 = vmatprep.mubr.msk.f32.mxu0 %vm500_vm0, %v12087_v9  ;;  %v12568_v9 = vld [vmem:[#allocation2 + $0x112] sm:$0xff] }
 0x136   : > { %10100 = vmatmul.mubr.msk.f32.gmra.mrb[26].mxu1 %vm500_vm0, %v14463_v28 }
 0x137   : > { %10220 = vmatmul.mubr.msk.f32.gmra.mrb[6].mxu0 %vm500_vm0, %v12093_v10  ;;  %10102 = vmatprep.mubr.msk.f32.mxu1 %vm500_vm0, %v12285_v63  ;;  %v12570_v10 = vld [vmem:[#allocation2 + $0x122] sm:$0xff] }
 0x138   : > { %10222 = vmatprep.mubr.msk.f32.mxu0 %vm500_vm0, %v12095_v11  ;;  %v12576_v11 = vld [vmem:[#allocation2 + $0x12a] sm:$0xff] }
 0x13a   : > { %10103 = vmatmul.mubr.msk.f32.gmra.mrb[28].mxu1 %vm500_vm0, %v12287_v2 }
 0x13b   : > { %10223 = vmatmul.mubr.msk.f32.gmra.mrb[8].mxu0 %vm500_vm0, %v12101_v12  ;;  %10105 = vmatprep.mubr.msk.f32.mxu1 %vm500_vm0, %v623_v29  ;;  %v12578_v12 = vld [vmem:[#allocation2 + $0x13a] sm:$0xff] }
 0x13c   : > { %10225 = vmatprep.mubr.msk.f32.mxu0 %vm500_vm0, %v12103_v13  ;;  %v12584_v13 = vld [vmem:[#allocation2 + $0x142] sm:$0xff] }
 0x13e   : > { %10106 = vmatmul.mubr.msk.f32.gmra.mrb[30].mxu1 %vm500_vm0, %v624_v30  ;;  %v2419_v30 = vld [vmem:[#allocation2 + $0x19a] sm:$0xff] }
 0x13f   : > { %10226 = vmatmul.mubr.msk.f32.gmra.mrb[10].mxu0 %vm500_vm0, %v12109_v14  ;;  %v12586_v14 = vld [vmem:[#allocation2 + $0x152] sm:$0xff] }
 0x140   : > { %10228 = vmatprep.mubr.msk.f32.mxu0 %vm500_vm0, %v12111_v15  ;;  %v12592_v15 = vld [vmem:[#allocation2 + $0x15a] sm:$0xff] }
 0x143   : > { %10229 = vmatmul.mubr.msk.f32.gmra.mrb[12].mxu0 %vm500_vm0, %v12121_v19 }
 0x144   : > { %10231 = vmatprep.mubr.msk.f32.mxu0 %vm500_vm0, %v12124_v20 }
 0x147   : > { %10232 = vmatmul.mubr.msk.f32.gmra.mrb[14].mxu0 %vm500_vm0, %v12137_v21  ;;  %v2417_v21 = vld [vmem:[#allocation2 + $0x182] sm:$0xff] }
 0x148   : > { %10234 = vmatprep.mubr.msk.f32.mxu0 %vm500_vm0, %v12139_v22 }
 0x14b   : > { %10235 = vmatmul.mubr.msk.f32.gmra.mrb[16].mxu0 %vm500_vm0, %v12149_v23 }
 0x14c   : > { %10237 = vmatprep.mubr.msk.f32.mxu0 %vm500_vm0, %v12151_v24  ;;  %v2418_v24 = vld [vmem:[#allocation2 + $0x18a] sm:$0xff] }
 0x14f   : > { %10238 = vmatmul.mubr.msk.f32.gmra.mrb[18].mxu0 %vm500_vm0, %v12161_v26 }
 0x150   : > { %10240 = vmatprep.mubr.msk.f32.mxu0 %vm500_vm0, %v12163_v27 }
 0x153   : > { %10241 = vmatmul.mubr.msk.f32.gmra.mrb[20].mxu0 %vm500_vm0, %v12173_v34 }
 0x154   : > { %10243 = vmatprep.mubr.msk.f32.mxu0 %vm500_vm0, %v12175_v35 }
 0x157   : > { %10244 = vmatmul.mubr.msk.f32.gmra.mrb[22].mxu0 %vm500_vm0, %v12185_v36 }
 0x158   : > { %10246 = vmatprep.mubr.msk.f32.mxu0 %vm500_vm0, %v12187_v42 }
 0x15b   : > { %10247 = vmatmul.mubr.msk.f32.gmra.mrb[24].mxu0 %vm500_vm0, %v12197_v43 }
 0x15c   : > { %10249 = vmatprep.mubr.msk.f32.mxu0 %vm500_vm0, %v12199_v44 }
 0x15f   : > { %10250 = vmatmul.mubr.msk.f32.gmra.mrb[26].mxu0 %vm500_vm0, %v12209_v46 }
 0x160   : > { %10252 = vmatprep.mubr.msk.f32.mxu0 %vm500_vm0, %v12353_v0 }
 0x163   : > { %10253 = vmatmul.mubr.msk.f32.gmra.mrb[28].mxu0 %vm500_vm0, %v1488_v1 }
 0x164   : > { %10255 = vmatprep.mubr.msk.f32.mxu0 %vm500_vm0, %v1489_v31 }
 0x167   : > { %10256 = vmatmul.mubr.msk.f32.gmra.mrb[30].mxu0 %vm500_vm0, %v1490_v32 }
 0x168   : > { %10260 = vmatprep.mubr.msk.f32.mxu0 %vm500_vm0, %v2385_v33  ;;  %v2420_v33 = vld [vmem:[#allocation2 + $0x1a2] sm:$0xff] }
 0x16b   : > { %10261 = vmatmul.mubr.msk.f32.vlgmr.msra.gmra.mrb[0].mxu0 %vm500_vm0, %v2386_v37 }
 0x16c   : > { %10309 = vmatpush3.msk.msra.mxu0 %vm724_vm2, %v12370_v25  ;;  %10263 = vmatprep.mubr.msk.f32.mxu0 %vm500_vm0, %v12480_v38 }
 0x16d   : > { %10358 = vmatprep.subr.msk.mxu0 %vm724_vm2, %v12482_v39 }
 0x16f   : > { %10264 = vmatmul.mubr.msk.f32.gmra.mrb[2].mxu0 %vm500_vm0, %v2388_v40 }
 0x170   : > { %10266 = vmatprep.mubr.msk.f32.mxu0 %vm500_vm0, %v12489_v41 }
 0x173   : > { %10267 = vmatmul.mubr.msk.f32.gmra.mrb[4].mxu0 %vm500_vm0, %v12496_v45 }
 0x174   : > { %10269 = vmatprep.mubr.msk.f32.mxu0 %vm500_vm0, %v12498_v47 }
 0x177   : > { %10270 = vmatmul.mubr.msk.f32.gmra.mrb[6].mxu0 %vm500_vm0, %v12504_v48 }
 0x178   : > { %10272 = vmatprep.mubr.msk.f32.mxu0 %vm500_vm0, %v12506_v49 }
 0x17b   : > { %10273 = vmatmul.mubr.msk.f32.gmra.mrb[8].mxu0 %vm500_vm0, %v12512_v50 }
 0x17c   : > { %10275 = vmatprep.mubr.msk.f32.mxu0 %vm500_vm0, %v12514_v51 }
 0x17f   : > { %10276 = vmatmul.mubr.msk.f32.gmra.mrb[10].mxu0 %vm500_vm0, %v12520_v52 }
 0x180   : > { %10278 = vmatprep.mubr.msk.f32.mxu0 %vm500_vm0, %v12522_v53 }
 0x183   : > { %10279 = vmatmul.mubr.msk.f32.gmra.mrb[12].mxu0 %vm500_vm0, %v12528_v54 }
 0x184   : > { %10281 = vmatprep.mubr.msk.f32.mxu0 %vm500_vm0, %v12530_v57 }
 0x187   : > { %10282 = vmatmul.mubr.msk.f32.gmra.mrb[14].mxu0 %vm500_vm0, %v12536_v58 }
 0x188   : > { %10284 = vmatprep.mubr.msk.f32.mxu0 %vm500_vm0, %v12538_v59 }
 0x18b   : > { %10285 = vmatmul.mubr.msk.f32.gmra.mrb[16].mxu0 %vm500_vm0, %v12544_v3 }
 0x18c   : > { %10287 = vmatprep.mubr.msk.f32.mxu0 %vm500_vm0, %v12546_v4 }
 0x18f   : > { %10288 = vmatmul.mubr.msk.f32.gmra.mrb[18].mxu0 %vm500_vm0, %v12552_v5 }
 0x190   : > { %10290 = vmatprep.mubr.msk.f32.mxu0 %vm500_vm0, %v12554_v6 }
 0x193   : > { %10291 = vmatmul.mubr.msk.f32.gmra.mrb[20].mxu0 %vm500_vm0, %v12560_v7 }
 0x194   : > { %10293 = vmatprep.mubr.msk.f32.mxu0 %vm500_vm0, %v12562_v8 }
 0x197   : > { %10294 = vmatmul.mubr.msk.f32.gmra.mrb[22].mxu0 %vm500_vm0, %v12568_v9 }
 0x198   : > { %10296 = vmatprep.mubr.msk.f32.mxu0 %vm500_vm0, %v12570_v10 }
 0x19b   : > { %10297 = vmatmul.mubr.msk.f32.gmra.mrb[24].mxu0 %vm500_vm0, %v12576_v11 }
 0x19c   : > { %10299 = vmatprep.mubr.msk.f32.mxu0 %vm500_vm0, %v12578_v12 }
 0x19f   : > { %10300 = vmatmul.mubr.msk.f32.gmra.mrb[26].mxu0 %vm500_vm0, %v12584_v13 }
 0x1a0   : > { %10302 = vmatprep.mubr.msk.f32.mxu0 %vm500_vm0, %v12586_v14 }
 0x1a3   : > { %10303 = vmatmul.mubr.msk.f32.gmra.mrb[28].mxu0 %vm500_vm0, %v12592_v15 }
 0x1a4   : > { %10305 = vmatprep.mubr.msk.f32.mxu0 %vm500_vm0, %v12594_v17 }
 0x1a7   : > { %10306 = vmatmul.mubr.msk.f32.gmra.mrb[30].mxu0 %vm500_vm0, %v12600_v18 }
 0x1a8   : > { %10310 = vmatprep.mubr.msk.f32.mxu0 %vm500_vm0, %v12480_v38 }
 0x1ab   : > { %10311 = vmatmul.mubr.msk.f32.vlgmr.msra.gmra.mrb[0].mxu0 %vm500_vm0, %v2388_v40 }
 0x1ac   : > { %10359 = vmatpush3.msk.msra.mxu0 %vm724_vm2, %v12482_v39  ;;  %10313 = vmatprep.mubr.msk.f32.mxu0 %vm500_vm0, %v12489_v41 }
 0x1af   : > { %10314 = vmatmul.mubr.msk.f32.gmra.mrb[2].mxu0 %vm500_vm0, %v12496_v45 }
 0x1b0   : > { %10316 = vmatprep.mubr.msk.f32.mxu0 %vm500_vm0, %v12498_v47 }
 0x1b3   : > { %10317 = vmatmul.mubr.msk.f32.gmra.mrb[4].mxu0 %vm500_vm0, %v12504_v48 }
 0x1b4   : > { %10319 = vmatprep.mubr.msk.f32.mxu0 %vm500_vm0, %v12506_v49 }
 0x1b7   : > { %10320 = vmatmul.mubr.msk.f32.gmra.mrb[6].mxu0 %vm500_vm0, %v12512_v50 }
 0x1b8   : > { %10322 = vmatprep.mubr.msk.f32.mxu0 %vm500_vm0, %v12514_v51 }
 0x1bb   : > { %10323 = vmatmul.mubr.msk.f32.gmra.mrb[8].mxu0 %vm500_vm0, %v12520_v52 }
 0x1bc   : > { %10325 = vmatprep.mubr.msk.f32.mxu0 %vm500_vm0, %v12522_v53 }
 0x1bf   : > { %10326 = vmatmul.mubr.msk.f32.gmra.mrb[10].mxu0 %vm500_vm0, %v12528_v54 }
 0x1c0   : > { %10328 = vmatprep.mubr.msk.f32.mxu0 %vm500_vm0, %v12530_v57 }
 0x1c3   : > { %10329 = vmatmul.mubr.msk.f32.gmra.mrb[12].mxu0 %vm500_vm0, %v12536_v58 }
 0x1c4   : > { %10331 = vmatprep.mubr.msk.f32.mxu0 %vm500_vm0, %v12538_v59 }
 0x1c5   : > { %v12659_v19 = vpop.f32.mrb[0].mxu1 }
 0x1c6   : > { %v12661_v20 = vpop.f32.mrb[1].mxu1 }
 0x1c7   : > { %10332 = vmatmul.mubr.msk.f32.gmra.mrb[14].mxu0 %vm500_vm0, %v12544_v3 }
 0x1c8   : > { %10334 = vmatprep.mubr.msk.f32.mxu0 %vm500_vm0, %v12546_v4 }
 0x1c9   : > { %v12667_v22 = vpop.f32.mrb[2].mxu1 }
 0x1ca   : > { %v12669_v23 = vpop.f32.mrb[3].mxu1 }
 0x1cb   : > { %10335 = vmatmul.mubr.msk.f32.gmra.mrb[16].mxu0 %vm500_vm0, %v12552_v5 }
 0x1cc   : > { %10337 = vmatprep.mubr.msk.f32.mxu0 %vm500_vm0, %v12554_v6 }
 0x1cd   : > { %v12674_v26 = vpop.f32.mrb[4].mxu1 }
 0x1ce   : > { %v12676_v27 = vpop.f32.mrb[5].mxu1 }
 0x1cf   : > { %10338 = vmatmul.mubr.msk.f32.gmra.mrb[18].mxu0 %vm500_vm0, %v12560_v7 }
 0x1d0   : > { %10340 = vmatprep.mubr.msk.f32.mxu0 %vm500_vm0, %v12562_v8 }
 0x1d1   : > { %v12681_v34 = vpop.f32.mrb[6].mxu1 }
 0x1d2   : > { %v12683_v35 = vpop.f32.mrb[7].mxu1 }
 0x1d3   : > { %10341 = vmatmul.mubr.msk.f32.gmra.mrb[20].mxu0 %vm500_vm0, %v12568_v9 }
 0x1d4   : > { %10343 = vmatprep.mubr.msk.f32.mxu0 %vm500_vm0, %v12570_v10 }
 0x1d5   : > { %v12689_v36 = vpop.f32.mrb[8].mxu1 }
 0x1d6   : > { %v12691_v42 = vpop.f32.mrb[9].mxu1 }
 0x1d7   : > { %10344 = vmatmul.mubr.msk.f32.gmra.mrb[22].mxu0 %vm500_vm0, %v12576_v11 }
 0x1d8   : > { %10346 = vmatprep.mubr.msk.f32.mxu0 %vm500_vm0, %v12578_v12 }
 0x1d9   : > { %v12697_v43 = vpop.f32.mrb[10].mxu1 }
 0x1da   : > { %v12699_v44 = vpop.f32.mrb[11].mxu1 }
 0x1db   : > { %10347 = vmatmul.mubr.msk.f32.gmra.mrb[24].mxu0 %vm500_vm0, %v12584_v13 }
 0x1dc   : > { %10349 = vmatprep.mubr.msk.f32.mxu0 %vm500_vm0, %v12586_v14 }
 0x1dd   : > { %v12705_v46 = vpop.f32.mrb[12].mxu1 }
 0x1de   : > { %v12707_v55 = vpop.f32.mrb[13].mxu1 }
 0x1df   : > { %10350 = vmatmul.mubr.msk.f32.gmra.mrb[26].mxu0 %vm500_vm0, %v12592_v15 }
 0x1e0   : > { %10352 = vmatprep.mubr.msk.f32.mxu0 %vm500_vm0, %v12594_v17 }
 0x1e1   : > { %v12713_v56 = vpop.f32.mrb[14].mxu1 }
 0x1e2   : > { %v12715_v60 = vpop.f32.mrb[15].mxu1 }
 0x1e3   : > { %10353 = vmatmul.mubr.msk.f32.gmra.mrb[28].mxu0 %vm500_vm0, %v12600_v18 }
 0x1e4   : > { %10355 = vmatprep.mubr.msk.f32.mxu0 %vm500_vm0, %v2417_v21 }
 0x1e5   : > { %v12721_v61 = vpop.f32.mrb[16].mxu1 }
 0x1e6   : > { %14464 = vst [vmem:[#allocation21_spill] sm:$0xff] %v12721_v61  ;;  %v12723_v62 = vpop.f32.mrb[17].mxu1 }
 0x1e7   : > { %10356 = vmatmul.mubr.msk.f32.gmra.mrb[30].mxu0 %vm500_vm0, %v2418_v24  ;;  %14465 = vst [vmem:[#allocation22_spill] sm:$0xff] %v12723_v62 }
 0x1e8   : > { %10360 = vmatprep.mubr.msk.f32.mxu0 %vm500_vm0, %v12489_v41  ;;  %v14480_v41 = vmov 0.0  }
 0x1e9   : > { %v12729_v63 = vpop.f32.mrb[18].mxu1  ;;  %5220 = vst.msk [vmem:[#allocation3 + $0x8] sm:$0x3] %vm4129_vm3, %v14480_v41  ;;  %5222 = vst.msk [vmem:[#allocation3 + $0x18] sm:$0x3] %vm4129_vm3, %v14480_v41 }
 0x1ea   : > { %14466 = vst [vmem:[#allocation23_spill] sm:$0xff] %v12729_v63  ;;  %v12731_v2 = vpop.f32.mrb[19].mxu1  ;;  %5224 = vst.msk [vmem:[#allocation3 + $0x28] sm:$0x3] %vm4129_vm3, %v14480_v41 }
 0x1eb   : > { %10361 = vmatmul.mubr.msk.f32.vlgmr.msra.gmra.mrb[0].mxu0 %vm500_vm0, %v12496_v45  ;;  %14467 = vst [vmem:[#allocation24_spill] sm:$0xff] %v12731_v2  ;;  %5226 = vst.msk [vmem:[#allocation3 + $0x38] sm:$0x3] %vm4129_vm3, %v14480_v41  ;;  %v11570_v45 = vmov 1983009808  }
 0x1ec   : > { %10363 = vmatprep.mubr.msk.f32.mxu0 %vm500_vm0, %v12498_v47  ;;  %5228 = vst.msk [vmem:[#allocation3 + $0x48] sm:$0x3] %vm4129_vm3, %v14480_v41  ;;  %5230 = vst.msk [vmem:[#allocation3 + $0x58] sm:$0x3] %vm4129_vm3, %v14480_v41  ;;  %v3459_v47 = vunpack.c.l.s4 %v11570_v45 }
 0x1ed   : > { %v12737_v16 = vpop.f32.mrb[20].mxu1  ;;  %5232 = vst.msk [vmem:[#allocation3 + $0x68] sm:$0x3] %vm4129_vm3, %v14480_v41  ;;  %5234 = vst.msk [vmem:[#allocation3 + $0x78] sm:$0x3] %vm4129_vm3, %v14480_v41 }
 0x1ee   : > { %14468 = vst [vmem:[#allocation25_spill] sm:$0xff] %v12737_v16  ;;  %v12739_v0 = vpop.f32.mrb[21].mxu1  ;;  %5236 = vst.msk [vmem:[#allocation3 + $0x88] sm:$0x3] %vm4129_vm3, %v14480_v41 }
 0x1ef   : > { %10364 = vmatmul.mubr.msk.f32.gmra.mrb[2].mxu0 %vm500_vm0, %v12504_v48  ;;  %14469 = vst [vmem:[#allocation26_spill] sm:$0xff] %v12739_v0  ;;  %5238 = vst.msk [vmem:[#allocation3 + $0x98] sm:$0x3] %vm4129_vm3, %v14480_v41  ;;  %v3461_v48 = vlaneseq }
 0x1f0   : > { %10366 = vmatprep.mubr.msk.f32.mxu0 %vm500_vm0, %v12506_v49  ;;  %5219 = vst.msk [vmem:[#allocation3] sm:$0xff] %vm5026_vm4, %v14480_v41  ;;  %5221 = vst.msk [vmem:[#allocation3 + $0x10] sm:$0xff] %vm5026_vm4, %v14480_v41 }
 0x1f1   : > { %v12745_v1 = vpop.f32.mrb[22].mxu1  ;;  %5223 = vst.msk [vmem:[#allocation3 + $0x20] sm:$0xff] %vm5026_vm4, %v14480_v41  ;;  %5225 = vst.msk [vmem:[#allocation3 + $0x30] sm:$0xff] %vm5026_vm4, %v14480_v41 }
 0x1f2   : > { %14470 = vst [vmem:[#allocation27_spill] sm:$0xff] %v12745_v1  ;;  %v12747_v25 = vpop.f32.mrb[23].mxu1  ;;  %5227 = vst.msk [vmem:[#allocation3 + $0x40] sm:$0xff] %vm5026_vm4, %v14480_v41 }
 0x1f3   : > { %10367 = vmatmul.mubr.msk.f32.gmra.mrb[4].mxu0 %vm500_vm0, %v12512_v50  ;;  %14471 = vst [vmem:[#allocation28_spill] sm:$0xff] %v12747_v25  ;;  %5229 = vst.msk [vmem:[#allocation3 + $0x50] sm:$0xff] %vm5026_vm4, %v14480_v41  ;;  %v12834_v50 = vld [vmem:[%s14419_s2] ss:$0 sm:$0xff] }
 0x1f4   : > { %10369 = vmatprep.mubr.msk.f32.mxu0 %vm500_vm0, %v12514_v51  ;;  %5231 = vst.msk [vmem:[#allocation3 + $0x60] sm:$0xff] %vm5026_vm4, %v14480_v41  ;;  %5233 = vst.msk [vmem:[#allocation3 + $0x70] sm:$0xff] %vm5026_vm4, %v14480_v41 }
 0x1f5   : > { %5235 = vst.msk [vmem:[#allocation3 + $0x80] sm:$0xff] %vm5026_vm4, %v14480_v41  ;;  %5237 = vst.msk [vmem:[#allocation3 + $0x90] sm:$0xff] %vm5026_vm4, %v14480_v41 }
 0x1f7   : > { %10370 = vmatmul.mubr.msk.f32.gmra.mrb[6].mxu0 %vm500_vm0, %v12520_v52  ;;  %v3460_v52 = vunpack.c.0.s8 %v3459_v47 }
 0x1f8   : > { %10372 = vmatprep.mubr.msk.f32.mxu0 %vm500_vm0, %v12522_v53  ;;  %v3462_v53 = vshrl.u32 %v3461_v48, 7 }
 0x1fb   : > { %10373 = vmatmul.mubr.msk.f32.gmra.mrb[8].mxu0 %vm500_vm0, %v12528_v54 }
 0x1fc   : > { %10375 = vmatprep.mubr.msk.f32.mxu0 %vm500_vm0, %v12530_v57  ;;  %v12840_v57 = vld [vmem:[%s14420_s3] ss:$0 sm:$0xff] }
 0x1ff   : > { %10376 = vmatmul.mubr.msk.f32.gmra.mrb[10].mxu0 %vm500_vm0, %v12536_v58 }
 0x200   : > { %10378 = vmatprep.mubr.msk.f32.mxu0 %vm500_vm0, %v12538_v59 }
 0x203   : > { %10379 = vmatmul.mubr.msk.f32.gmra.mrb[12].mxu0 %vm500_vm0, %v12544_v3 }
 0x204   : > { %10381 = vmatprep.mubr.msk.f32.mxu0 %vm500_vm0, %v12546_v4 }
 0x205   : > { %v12769_v28 = vpop.f32.mrb[24].mxu1 }
 0x206   : > { %14472 = vst [vmem:[#allocation29_spill] sm:$0xff] %v12769_v28  ;;  %v12771_v29 = vpop.f32.mrb[25].mxu1 }
 0x207   : > { %10382 = vmatmul.mubr.msk.f32.gmra.mrb[14].mxu0 %vm500_vm0, %v12552_v5  ;;  %14473 = vst [vmem:[#allocation30_spill] sm:$0xff] %v12771_v29 }
 0x208   : > { %10384 = vmatprep.mubr.msk.f32.mxu0 %vm500_vm0, %v12554_v6  ;;  %v12846_v6 = vsub.s32 %v3460_v52, %v3462_v53 }
 0x209   : > { %v12776_v31 = vpop.f32.mrb[26].mxu1 }
 0x20a   : > { %14474 = vst [vmem:[#allocation31_spill] sm:$0xff] %v12776_v31  ;;  %v12778_v32 = vpop.f32.mrb[27].mxu1 }
 0x20b   : > { %10385 = vmatmul.mubr.msk.f32.gmra.mrb[16].mxu0 %vm500_vm0, %v12560_v7  ;;  %14475 = vst [vmem:[#allocation32_spill] sm:$0xff] %v12778_v32 }
 0x20c   : > { %10387 = vmatprep.mubr.msk.f32.mxu0 %vm500_vm0, %v12562_v8 }
 0x20d   : > { %v12782_v37 = vpop.f32.mrb[28].mxu1 }
 0x20e   : > { %14476 = vst [vmem:[#allocation33_spill] sm:$0xff] %v12782_v37  ;;  %v12784_v38 = vpop.f32.mrb[29].mxu1 }
 0x20f   : > { %10388 = vmatmul.mubr.msk.f32.gmra.mrb[18].mxu0 %vm500_vm0, %v12568_v9  ;;  %14477 = vst [vmem:[#allocation34_spill] sm:$0xff] %v12784_v38 }
 0x210   : > { %10390 = vmatprep.mubr.msk.f32.mxu0 %vm500_vm0, %v12570_v10 }
 0x211   : > { %v12787_v39 = vpop.f32.mrb[30].mxu1 }
 0x212   : > { %14478 = vst [vmem:[#allocation35_spill] sm:$0xff] %v12787_v39  ;;  %v12789_v40 = vpop.f32.mrb[31].mxu1 }
 0x213   : > { %10391 = vmatmul.mubr.msk.f32.gmra.mrb[20].mxu0 %vm500_vm0, %v12576_v11  ;;  %14479 = vst [vmem:[#allocation36_spill] sm:$0xff] %v12789_v40 }
 0x214   : > { %10393 = vmatprep.mubr.msk.f32.mxu0 %vm500_vm0, %v12578_v12 }
 0x217   : > { %10394 = vmatmul.mubr.msk.f32.gmra.mrb[22].mxu0 %vm500_vm0, %v12584_v13 }
 0x218   : > { %10396 = vmatprep.mubr.msk.f32.mxu0 %vm500_vm0, %v12586_v14 }
 0x21b   : > { %10397 = vmatmul.mubr.msk.f32.gmra.mrb[24].mxu0 %vm500_vm0, %v12592_v15 }
 0x21c   : > { %10399 = vmatprep.mubr.msk.f32.mxu0 %vm500_vm0, %v12594_v17 }
 0x21f   : > { %10400 = vmatmul.mubr.msk.f32.gmra.mrb[26].mxu0 %vm500_vm0, %v12600_v18 }
 0x220   : > { %10402 = vmatprep.mubr.msk.f32.mxu0 %vm500_vm0, %v2417_v21 }
 0x223   : > { %10403 = vmatmul.mubr.msk.f32.gmra.mrb[28].mxu0 %vm500_vm0, %v2418_v24 }
 0x224   : > { %10405 = vmatprep.mubr.msk.f32.mxu0 %vm500_vm0, %v2419_v30 }
 0x227   : > { %10406 = vmatmul.mubr.msk.f32.gmra.mrb[30].mxu0 %vm500_vm0, %v2420_v33 }
 0x2be   : > { %v10362_v49 = vpop.f32.mrb[0].mxu0 }
 0x2bf   : > { %v10986_v51 = vadd.f32 %v10362_v49, %v12659_v19  ;;  %v3124_v54 = vpop.f32.mrb[1].mxu0 }
 0x2c0   : > { %v10987_v58 = vadd.f32 %v3124_v54, %v12661_v20 }
 0x2c1   : > { %v3323_v59 = vmul.f32 %v10986_v51, %v12834_v50 }
 0x2c2   : > { %v3322_v3 = vmul.f32 %v10987_v58, %v12834_v50  ;;  %v10365_v4 = vpop.f32.mrb[2].mxu0 }
 0x2c3   : > { %v3362_v5 = vadd.f32 %v12840_v57, %v3323_v59  ;;  %v10988_v7 = vadd.f32 %v10365_v4, %v12667_v22  ;;  %v3134_v8 = vpop.f32.mrb[3].mxu0 }
 0x2c4   : > { %v3361_v9 = vadd.f32 %v12840_v57, %v3322_v3  ;;  %v10989_v10 = vadd.f32 %v3134_v8, %v12669_v23 }
 0x2c5   : > { %v3394_v11 = vmax.f32 %v3362_v5, 0.0  ;;  %v3325_v12 = vmul.f32 %v10988_v7, %v12834_v50 }
 0x2c6   : > { %v3393_v13 = vmax.f32 %v3361_v9, 0.0  ;;  %v3324_v14 = vmul.f32 %v10989_v10, %v12834_v50  ;;  %v10368_v15 = vpop.f32.mrb[4].mxu0 }
 0x2c7   : > { %v3474_v17 = vcombine.high %v3394_v11, %v3394_v11  ;;  %v3481_v18 = vrot.slane %v3394_v11, %v12846_v6  ;;  %v3364_v19 = vadd.f32 %v12840_v57, %v3325_v12  ;;  %v12856_v20 = vadd.f32 %v10368_v15, %v12674_v26  ;;  %v3144_v21 = vpop.f32.mrb[5].mxu0 }
 0x2c8   : > { %v3457_v22 = vcombine.high %v3393_v13, %v3393_v13  ;;  %v3464_v24 = vrot.slane %v3393_v13, %v12846_v6  ;;  %v12860_v23 = vadd.f32 %v12840_v57, %v3324_v14  ;;  %v12863_v30 = vadd.f32 %v3144_v21, %v12676_v27 }
 0x2c9   : > { %v3488_v33 = vrot.slane %v3474_v17, %v12846_v6  ;;  %v3489_v45 = vcombine.high %v3481_v18, %v3481_v18  ;;  %v4158_v47 = vsel %vm4129_vm3, %v3481_v18, -inf  ;;  %v12867_v48 = vmax.f32 %v3364_v19, 0.0 }
 0x2ca   : > { %v4159_v49 = vrot.slane %v4158_v47, 4  ;;  %v3471_v26 = vrot.slane %v3457_v22, %v12846_v6  ;;  %v3472_v51 = vcombine.high %v3464_v24, %v3464_v24  ;;  %v4130_v52 = vsel %vm4129_vm3, %v3464_v24, -inf  ;;  %v12871_v53 = vpop.f32.mrb[6].mxu0 }
 0x2cb   : > { %v3490_v54 = vcombine.high %v3488_v33, %v3488_v33  ;;  %v4165_v58 = vsel %vm4129_vm3, %v3489_v45, -inf  ;;  %v4172_v27 = vsel %vm4129_vm3, %v3488_v33, -inf  ;;  %v4131_v59 = vrot.slane %v4130_v52, 4  ;;  %v12875_v3 = vpop.f32.mrb[7].mxu0 }
 0x2cc   : > { %v4160_v4 = vmax.f32 %v4158_v47, %v4159_v49  ;;  %v4166_v5 = vrot.slane %v4165_v58, 4  ;;  %v4173_v7 = vrot.slane %v4172_v27, 4  ;;  %v3473_v8 = vcombine.high %v3471_v26, %v3471_v26 }
 0x2cd   : > { %v4179_v9 = vsel %vm4129_vm3, %v3490_v54, -inf  ;;  %v4132_v10 = vmax.f32 %v4130_v52, %v4131_v59  ;;  %v4137_v11 = vsel %vm4129_vm3, %v3472_v51, -inf  ;;  %v4144_v12 = vsel %vm4129_vm3, %v3471_v26, -inf }
 0x2ce   : > { %v4161_v13 = vrot.slane %v4160_v4, 2  ;;  %v4167_v14 = vmax.f32 %v4165_v58, %v4166_v5  ;;  %v4174_v15 = vmax.f32 %v4172_v27, %v4173_v7  ;;  %v4180_v17 = vrot.slane %v4179_v9, 4  ;;  %v12880_v18 = vpop.f32.mrb[8].mxu0 }
 0x2cf   : > { %v4133_v19 = vrot.slane %v4132_v10, 2  ;;  %v4138_v21 = vrot.slane %v4137_v11, 4  ;;  %v4145_v22 = vrot.slane %v4144_v12, 4  ;;  %v4151_v24 = vsel %vm4129_vm3, %v3473_v8, -inf  ;;  %v12883_v33 = vpop.f32.mrb[9].mxu0 }
 0x2d0   : > { %v4162_v45 = vmax.f32 %v4160_v4, %v4161_v13  ;;  %v4168_v47 = vrot.slane %v4167_v14, 2  ;;  %v4175_v49 = vrot.slane %v4174_v15, 2  ;;  %v4181_v52 = vmax.f32 %v4179_v9, %v4180_v17 }
 0x2d1   : > { %v4134_v51 = vmax.f32 %v4132_v10, %v4133_v19  ;;  %v4139_v54 = vmax.f32 %v4137_v11, %v4138_v21  ;;  %v4146_v26 = vmax.f32 %v4144_v12, %v4145_v22  ;;  %v4152_v59 = vrot.slane %v4151_v24, 4 }
 0x2d2   : > { %v4163_v58 = vrot.slane %v4162_v45, 1  ;;  %v4169_v27 = vmax.f32 %v4167_v14, %v4168_v47  ;;  %v4176_v5 = vmax.f32 %v4174_v15, %v4175_v49  ;;  %v4182_v7 = vrot.slane %v4181_v52, 2  ;;  %v12885_v41 = vpop.f32.mrb[10].mxu0 }
 0x2d3   : > { %v4135_v40 = vrot.slane %v4134_v51, 1  ;;  %v4140_v39 = vrot.slane %v4139_v54, 2  ;;  %v4147_v38 = vrot.slane %v4146_v26, 2  ;;  %v4153_v8 = vmax.f32 %v4151_v24, %v4152_v59  ;;  %v12887_v37 = vpop.f32.mrb[11].mxu0 }
 0x2d4   : > { %v4164_v4 = vmax.f32 %v4162_v45, %v4163_v58  ;;  %v4170_v13 = vrot.slane %v4169_v27, 1  ;;  %v4177_v32 = vrot.slane %v4176_v5, 1  ;;  %v4183_v9 = vmax.f32 %v4181_v52, %v4182_v7 }
 0x2d5   : > { %v4136_v10 = vmax.f32 %v4134_v51, %v4135_v40  ;;  %v4141_v11 = vmax.f32 %v4139_v54, %v4140_v39  ;;  %v4148_v12 = vmax.f32 %v4146_v26, %v4147_v38  ;;  %v4154_v17 = vrot.slane %v4153_v8, 2 }
 0x2d6   : > { %v4171_v19 = vmax.f32 %v4169_v27, %v4170_v13  ;;  %v4178_v14 = vmax.f32 %v4176_v5, %v4177_v32  ;;  %v4184_v15 = vrot.slane %v4183_v9, 1  ;;  %v12890_v21 = vsel %vm5026_vm4, %v4164_v4, -inf  ;;  %v12892_v22 = vpop.f32.mrb[12].mxu0 }
 0x2d7   : > { %v4142_v47 = vrot.slane %v4141_v11, 1  ;;  %v4149_v24 = vrot.slane %v4148_v12, 1  ;;  %v4155_v49 = vmax.f32 %v4153_v8, %v4154_v17  ;;  %v12895_v45 = vsel %vm5026_vm4, %v4136_v10, -inf  ;;  %v12897_v59 = vpop.f32.mrb[13].mxu0 }
 0x2d8   : > { %v4185_v40 = vmax.f32 %v4183_v9, %v4184_v15  ;;  %v12900_v38 = vsel %vm5026_vm4, %v4171_v19, -inf  ;;  %v12903_v32 = vsel %vm5026_vm4, %v4178_v14, -inf  ;;  %v3508_v39 = vcombine.high %v12867_v48, %v12867_v48 }
 0x2d9   : > { %v4143_v52 = vmax.f32 %v4141_v11, %v4142_v47  ;;  %v4150_v51 = vmax.f32 %v4148_v12, %v4149_v24  ;;  %v4156_v54 = vrot.slane %v4155_v49, 1  ;;  %v3515_v26 = vrot.slane %v12867_v48, %v12846_v6 }
 0x2da   : > { %v12910_v58 = vsel %vm5026_vm4, %v4185_v40, -inf  ;;  %v3522_v27 = vrot.slane %v3508_v39, %v12846_v6  ;;  %v3395_v5 = vmax.f32 %v12860_v23, 0.0  ;;  %v3327_v7 = vmul.f32 %v12856_v20, %v12834_v50  ;;  %v12916_v8 = vpop.f32.mrb[14].mxu0 }
 0x2db   : > { %v4157_v4 = vmax.f32 %v4155_v49, %v4156_v54  ;;  %v12919_v13 = vsel %vm5026_vm4, %v4143_v52, -inf  ;;  %v12922_v9 = vsel %vm5026_vm4, %v4150_v51, -inf  ;;  %v3523_v48 = vcombine.high %v3515_v26, %v3515_v26  ;;  %v12924_v10 = vpop.f32.mrb[15].mxu0 }
 0x2dc   : > { %14481 = vst [vmem:[#allocation37_spill] sm:$0xff] %v12924_v10  ;;  %v3524_v11 = vcombine.high %v3522_v27, %v3522_v27  ;;  %v4214_v12 = vsel %vm4129_vm3, %v3515_v26, -inf  ;;  %v4228_v23 = vsel %vm4129_vm3, %v3522_v27, -inf  ;;  %v3491_v17 = vcombine.high %v3395_v5, %v3395_v5 }
 0x2dd   : > { %v12929_v20 = vsel %vm5026_vm4, %v4157_v4, -inf  ;;  %v4215_v19 = vrot.slane %v4214_v12, 4  ;;  %v4221_v14 = vsel %vm4129_vm3, %v3523_v48, -inf  ;;  %v4229_v15 = vrot.slane %v4228_v23, 4 }
 0x2de   : > { %v4222_v47 = vrot.slane %v4221_v14, 4  ;;  %v4235_v24 = vsel %vm4129_vm3, %v3524_v11, -inf  ;;  %v3498_v49 = vrot.slane %v3395_v5, %v12846_v6  ;;  %v3505_v40 = vrot.slane %v3491_v17, %v12846_v6  ;;  %v12937_v1 = vpop.f32.mrb[16].mxu0 }
 0x2df   : > { %v4216_v39 = vmax.f32 %v4214_v12, %v4215_v19  ;;  %v4230_v52 = vmax.f32 %v4228_v23, %v4229_v15  ;;  %v4236_v51 = vrot.slane %v4235_v24, 4  ;;  %v3366_v54 = vadd.f32 %v12840_v57, %v3327_v7  ;;  %14482 = vst [vmem:[#allocation38_spill] sm:$0xff] %v12937_v1 }
 0x2e0   : > { %v4223_v26 = vmax.f32 %v4221_v14, %v4222_v47  ;;  %v3506_v27 = vcombine.high %v3498_v49, %v3498_v49  ;;  %v3507_v4 = vcombine.high %v3505_v40, %v3505_v40  ;;  %v4186_v31 = vsel %vm4129_vm3, %v3498_v49, -inf }
 0x2e1   : > { %v4217_v29 = vrot.slane %v4216_v39, 2  ;;  %v4231_v48 = vrot.slane %v4230_v52, 2  ;;  %v4237_v28 = vmax.f32 %v4235_v24, %v4236_v51  ;;  %v4187_v25 = vrot.slane %v4186_v31, 4 }
 0x2e2   : > { %v4224_v11 = vrot.slane %v4223_v26, 2  ;;  %v4193_v5 = vsel %vm4129_vm3, %v3506_v27, -inf  ;;  %v4200_v12 = vsel %vm4129_vm3, %v3505_v40, -inf  ;;  %v4207_v23 = vsel %vm4129_vm3, %v3507_v4, -inf }
 0x2e3   : > { %v4218_v17 = vmax.f32 %v4216_v39, %v4217_v29  ;;  %v4232_v7 = vmax.f32 %v4230_v52, %v4231_v48  ;;  %v4238_v19 = vrot.slane %v4237_v28, 2  ;;  %v4188_v14 = vmax.f32 %v4186_v31, %v4187_v25 }
 0x2e4   : > { %v4225_v15 = vmax.f32 %v4223_v26, %v4224_v11  ;;  %v4194_v47 = vrot.slane %v4193_v5, 4  ;;  %v4201_v49 = vrot.slane %v4200_v12, 4  ;;  %v4208_v0 = vrot.slane %v4207_v23, 4 }
 0x2e5   : > { %v4219_v16 = vrot.slane %v4218_v17, 1  ;;  %v4233_v24 = vrot.slane %v4232_v7, 1  ;;  %v4239_v51 = vmax.f32 %v4237_v28, %v4238_v19  ;;  %v4189_v2 = vrot.slane %v4188_v14, 2 }
 0x2e6   : > { %v4226_v63 = vrot.slane %v4225_v15, 1  ;;  %v4195_v62 = vmax.f32 %v4193_v5, %v4194_v47  ;;  %v4202_v1 = vmax.f32 %v4200_v12, %v4201_v49  ;;  %v4209_v27 = vmax.f32 %v4207_v23, %v4208_v0  ;;  %v12952_v12 = vpop.f32.mrb[17].mxu0 }
 0x2e7   : > { %v4220_v61 = vmax.f32 %v4218_v17, %v4219_v16  ;;  %v4234_v40 = vmax.f32 %v4232_v7, %v4233_v24  ;;  %v4240_v10 = vrot.slane %v4239_v51, 1  ;;  %v4190_v4 = vmax.f32 %v4188_v14, %v4189_v2 }
 0x2e8   : > { %v4227_v29 = vmax.f32 %v4225_v15, %v4226_v63  ;;  %v4196_v39 = vrot.slane %v4195_v62, 2  ;;  %v4203_v52 = vrot.slane %v4202_v1, 2  ;;  %v4210_v25 = vrot.slane %v4209_v27, 2 }
 0x2e9   : > { %v4241_v31 = vmax.f32 %v4239_v51, %v4240_v10  ;;  %v5040_v26 = vsel %vm5026_vm4, %v4220_v61, -inf  ;;  %v12944_v48 = vsel %vm5026_vm4, %v4234_v40, -inf  ;;  %v4191_v28 = vrot.slane %v4190_v4, 1 }
 0x2ea   : > { %v5041_v11 = vmax.f32 %v12890_v21, %v5040_v26  ;;  %v5043_v16 = vsel %vm5026_vm4, %v4227_v29, -inf  ;;  %v5047_v2 = vmax.f32 %v12903_v32, %v12944_v48  ;;  %v4197_v63 = vmax.f32 %v4195_v62, %v4196_v39 }
 0x2eb   : > { %v5044_v0 = vmax.f32 %v12900_v38, %v5043_v16  ;;  %v5049_v10 = vsel %vm5026_vm4, %v4241_v31, -inf  ;;  %v4192_v5 = vmax.f32 %v4190_v4, %v4191_v28  ;;  %v4204_v61 = vmax.f32 %v4202_v1, %v4203_v52 }
 0x2ec   : > { %v5050_v23 = vmax.f32 %v12910_v58, %v5049_v10  ;;  %v4198_v17 = vrot.slane %v4197_v63, 1  ;;  %v4211_v21 = vmax.f32 %v4209_v27, %v4210_v25  ;;  %v3398_v7 = vmax.f32 %v3366_v54, 0.0 }
 0x2ed   : > { %v4205_v19 = vrot.slane %v4204_v61, 1  ;;  %v5028_v32 = vsel %vm5026_vm4, %v4192_v5, -inf  ;;  %v3326_v62 = vmul.f32 %v12863_v30, %v12834_v50  ;;  %v10992_v38 = vadd.f32 %v12871_v53, %v12681_v34 }
 0x2ee   : > { %v4199_v1 = vmax.f32 %v4197_v63, %v4198_v17  ;;  %v4212_v14 = vrot.slane %v4211_v21, 1  ;;  %v5029_v15 = vmax.f32 %v12895_v45, %v5028_v32  ;;  %v3542_v58 = vcombine.high %v3398_v7, %v3398_v7 }
 0x2ef   : > { %v4206_v47 = vmax.f32 %v4204_v61, %v4205_v19  ;;  %v3549_v49 = vrot.slane %v3398_v7, %v12846_v6  ;;  %v3365_v54 = vadd.f32 %v12840_v57, %v3326_v62  ;;  %v3329_v24 = vmul.f32 %v10992_v38, %v12834_v50 }
 0x2f0   : > { %v4213_v51 = vmax.f32 %v4211_v21, %v4212_v14  ;;  %v5031_v27 = vsel %vm5026_vm4, %v4199_v1, -inf  ;;  %v3556_v30 = vrot.slane %v3542_v58, %v12846_v6  ;;  %v12968_v34 = vadd.f32 %v12875_v3, %v12683_v35 }
 0x2f1   : > { %v5032_v53 = vmax.f32 %v12919_v13, %v5031_v27  ;;  %v5034_v45 = vsel %vm5026_vm4, %v4206_v47, -inf  ;;  %v3557_v40 = vcombine.high %v3549_v49, %v3549_v49  ;;  %v4270_v4 = vsel %vm4129_vm3, %v3549_v49, -inf }
 0x2f2   : > { %v5035_v29 = vmax.f32 %v12922_v9, %v5034_v45  ;;  %v5037_v39 = vsel %vm5026_vm4, %v4213_v51, -inf  ;;  %v3558_v52 = vcombine.high %v3556_v30, %v3556_v30  ;;  %v4271_v25 = vrot.slane %v4270_v4, 4  ;;  %v12992_v45 = vpop.f32.mrb[18].mxu0 }
 0x2f3   : > { %v5038_v31 = vmax.f32 %v12929_v20, %v5037_v39  ;;  %v5304_v26 = vsel %vm5303_vm5, %v5032_v53, %v5029_v15  ;;  %v4277_v35 = vsel %vm4129_vm3, %v3557_v40, -inf  ;;  %v4284_v3 = vsel %vm4129_vm3, %v3556_v30, -inf }
 0x2f4   : > { %v5306_v13 = vsel %vm5305_vm6, %v5035_v29, %v5304_v26  ;;  %v4272_v48 = vmax.f32 %v4270_v4, %v4271_v25  ;;  %v4278_v28 = vrot.slane %v4277_v35, 4  ;;  %v4285_v16 = vrot.slane %v4284_v3, 4 }
 0x2f5   : > { %v5308_v63 = vsel %vm5307_vm7, %v5038_v31, %v5306_v13  ;;  %v4291_v9 = vsel %vm4129_vm3, %v3558_v52, -inf  ;;  %v3397_v10 = vmax.f32 %v3365_v54, 0.0  ;;  %v3368_v5 = vadd.f32 %v12840_v57, %v3329_v24 }
 0x2f6   : > { %v5310_v20 = vsel %vm5309_vm8, %v5041_v11, %v5308_v63  ;;  %v4273_v61 = vrot.slane %v4272_v48, 2  ;;  %v4279_v17 = vmax.f32 %v4277_v35, %v4278_v28  ;;  %v4286_v21 = vmax.f32 %v4284_v3, %v4285_v16 }
 0x2f7   : > { %v5312_v7 = vsel %vm5311_vm9, %v5044_v0, %v5310_v20  ;;  %v4292_v19 = vrot.slane %v4291_v9, 4  ;;  %v3525_v32 = vcombine.high %v3397_v10, %v3397_v10  ;;  %v3532_v62 = vrot.slane %v3397_v10, %v12846_v6 }
 0x2f8   : > { %v5314_v38 = vsel %vm5313_vm10, %v5047_v2, %v5312_v7  ;;  %v4274_v1 = vmax.f32 %v4272_v48, %v4273_v61  ;;  %v4280_v14 = vrot.slane %v4279_v17, 2  ;;  %v4287_v15 = vrot.slane %v4286_v21, 2 }
 0x2f9   : > { %v5316_v58 = vsel %vm5315_vm11, %v5050_v23, %v5314_v38  ;;  %v4293_v47 = vmax.f32 %v4291_v9, %v4292_v19  ;;  %v3539_v49 = vrot.slane %v3525_v32, %v12846_v6  ;;  %v3540_v11 = vcombine.high %v3532_v62, %v3532_v62 }
 0x2fa   : > { %5375 = vst.msk [vmem:[#allocation3 + $0x11] sm:$0xff] %vm5026_vm4, %v5316_v58  ;;  %v4275_v54 = vrot.slane %v4274_v1, 1  ;;  %v4281_v24 = vmax.f32 %v4279_v17, %v4280_v14  ;;  %v4288_v0 = vmax.f32 %v4286_v21, %v4287_v15  ;;  %v4242_v51 = vsel %vm4129_vm3, %v3532_v62, -inf  ;;  %v13005_v17 = vpop.f32.mrb[19].mxu0 }
 0x2fb   : > { %v4294_v27 = vrot.slane %v4293_v47, 2  ;;  %v3541_v30 = vcombine.high %v3539_v49, %v3539_v49  ;;  %v4243_v53 = vrot.slane %v4242_v51, 4  ;;  %v4249_v2 = vsel %vm4129_vm3, %v3540_v11, -inf }
 0x2fc   : > { %v4276_v40 = vmax.f32 %v4274_v1, %v4275_v54  ;;  %v4282_v23 = vrot.slane %v4281_v24, 1  ;;  %v4289_v4 = vrot.slane %v4288_v0, 1  ;;  %v4250_v29 = vrot.slane %v4249_v2, 4 }
 0x2fd   : > { %v4295_v39 = vmax.f32 %v4293_v47, %v4294_v27  ;;  %v4244_v52 = vmax.f32 %v4242_v51, %v4243_v53  ;;  %v4256_v25 = vsel %vm4129_vm3, %v3539_v49, -inf  ;;  %v4263_v31 = vsel %vm4129_vm3, %v3541_v30, -inf }
 0x2fe   : > { %v4283_v26 = vmax.f32 %v4281_v24, %v4282_v23  ;;  %v4290_v35 = vmax.f32 %v4288_v0, %v4289_v4  ;;  %v12997_v3 = vsel %vm5026_vm4, %v4276_v40, -inf  ;;  %v4251_v13 = vmax.f32 %v4249_v2, %v4250_v29 }
 0x2ff   : > { %v4296_v48 = vrot.slane %v4295_v39, 1  ;;  %v4245_v28 = vrot.slane %v4244_v52, 2  ;;  %v4257_v16 = vrot.slane %v4256_v25, 4  ;;  %v4264_v63 = vrot.slane %v4263_v31, 4 }
 0x300   : > { %v13000_v9 = vsel %vm5026_vm4, %v4283_v26, -inf  ;;  %v13003_v10 = vsel %vm5026_vm4, %v4290_v35, -inf  ;;  %v4252_v20 = vrot.slane %v4251_v13, 2  ;;  %v3400_v61 = vmax.f32 %v3368_v5, 0.0 }
 0x301   : > { %v4297_v21 = vmax.f32 %v4295_v39, %v4296_v48  ;;  %v4246_v7 = vmax.f32 %v4244_v52, %v4245_v28  ;;  %v4258_v19 = vmax.f32 %v4256_v25, %v4257_v16  ;;  %v4265_v32 = vmax.f32 %v4263_v31, %v4264_v63 }
 0x302   : > { %v4253_v62 = vmax.f32 %v4251_v13, %v4252_v20  ;;  %v3576_v38 = vcombine.high %v3400_v61, %v3400_v61  ;;  %v3583_v1 = vrot.slane %v3400_v61, %v12846_v6  ;;  %v3328_v14 = vmul.f32 %v12968_v34, %v12834_v50 }
 0x303   : > { %v13011_v15 = vsel %vm5026_vm4, %v4297_v21, -inf  ;;  %v4247_v58 = vrot.slane %v4246_v7, 1  ;;  %v4259_v47 = vrot.slane %v4258_v19, 2  ;;  %v4266_v49 = vrot.slane %v4265_v32, 2 }
 0x304   : > { %v4254_v5 = vrot.slane %v4253_v62, 1  ;;  %v3590_v11 = vrot.slane %v3576_v38, %v12846_v6  ;;  %v3591_v54 = vcombine.high %v3583_v1, %v3583_v1  ;;  %v4326_v24 = vsel %vm4129_vm3, %v3583_v1, -inf }
 0x305   : > { %v4248_v0 = vmax.f32 %v4246_v7, %v4247_v58  ;;  %v4260_v51 = vmax.f32 %v4258_v19, %v4259_v47  ;;  %v4267_v27 = vmax.f32 %v4265_v32, %v4266_v49  ;;  %v4327_v30 = vrot.slane %v4326_v24, 4 }
 0x306   : > { %v4255_v53 = vmax.f32 %v4253_v62, %v4254_v5  ;;  %v3592_v2 = vcombine.high %v3590_v11, %v3590_v11  ;;  %v4333_v34 = vsel %vm4129_vm3, %v3591_v54, -inf  ;;  %v4340_v40 = vsel %vm4129_vm3, %v3590_v11, -inf }
 0x307   : > { %v4261_v23 = vrot.slane %v4260_v51, 1  ;;  %v4268_v4 = vrot.slane %v4267_v27, 1  ;;  %v13018_v29 = vsel %vm5026_vm4, %v4248_v0, -inf  ;;  %v4328_v39 = vmax.f32 %v4326_v24, %v4327_v30  ;;  %v13039_v24 = vpop.f32.mrb[20].mxu0 }
 0x308   : > { %v13021_v52 = vsel %vm5026_vm4, %v4255_v53, -inf  ;;  %v4334_v25 = vrot.slane %v4333_v34, 4  ;;  %v4341_v31 = vrot.slane %v4340_v40, 4  ;;  %v4347_v26 = vsel %vm4129_vm3, %v3592_v2, -inf }
 0x309   : > { %v4262_v35 = vmax.f32 %v4260_v51, %v4261_v23  ;;  %v4269_v13 = vmax.f32 %v4267_v27, %v4268_v4  ;;  %v4329_v48 = vrot.slane %v4328_v39, 2  ;;  %v4348_v28 = vrot.slane %v4347_v26, 4 }
 0x30a   : > { %v4335_v16 = vmax.f32 %v4333_v34, %v4334_v25  ;;  %v4342_v63 = vmax.f32 %v4340_v40, %v4341_v31  ;;  %v3367_v20 = vadd.f32 %v12840_v57, %v3328_v14  ;;  %v10994_v61 = vadd.f32 %v12880_v18, %v12689_v36 }
 0x30b   : > { %v13028_v21 = vsel %vm5026_vm4, %v4262_v35, -inf  ;;  %v13031_v7 = vsel %vm5026_vm4, %v4269_v13, -inf  ;;  %v4330_v19 = vmax.f32 %v4328_v39, %v4329_v48  ;;  %v4349_v32 = vmax.f32 %v4347_v26, %v4348_v28 }
 0x30c   : > { %v4336_v62 = vrot.slane %v4335_v16, 2  ;;  %v4343_v38 = vrot.slane %v4342_v63, 2  ;;  %v3399_v1 = vmax.f32 %v3367_v20, 0.0  ;;  %v3331_v58 = vmul.f32 %v10994_v61, %v12834_v50 }
 0x30d   : > { %v4331_v47 = vrot.slane %v4330_v19, 1  ;;  %v4350_v49 = vrot.slane %v4349_v32, 2  ;;  %v10995_v14 = vadd.f32 %v12883_v33, %v12691_v42  ;;  %v10996_v36 = vadd.f32 %v12885_v41, %v12697_v43 }
 0x30e   : > { %v4337_v18 = vmax.f32 %v4335_v16, %v4336_v62  ;;  %v4344_v5 = vmax.f32 %v4342_v63, %v4343_v38  ;;  %v3559_v11 = vcombine.high %v3399_v1, %v3399_v1  ;;  %v3566_v54 = vrot.slane %v3399_v1, %v12846_v6 }
 0x30f   : > { %v4332_v0 = vmax.f32 %v4330_v19, %v4331_v47  ;;  %v4351_v51 = vmax.f32 %v4349_v32, %v4350_v49  ;;  %v3370_v27 = vadd.f32 %v12840_v57, %v3331_v58  ;;  %v3330_v30 = vmul.f32 %v10995_v14, %v12834_v50 }
 0x310   : > { %v4338_v53 = vrot.slane %v4337_v18, 1  ;;  %v4345_v2 = vrot.slane %v4344_v5, 1  ;;  %v3573_v42 = vrot.slane %v3559_v11, %v12846_v6  ;;  %v3574_v33 = vcombine.high %v3566_v54, %v3566_v54 }
 0x311   : > { %v4352_v34 = vrot.slane %v4351_v51, 1  ;;  %v13045_v43 = vsel %vm5026_vm4, %v4332_v0, -inf  ;;  %v4298_v41 = vsel %vm4129_vm3, %v3566_v54, -inf  ;;  %v3402_v40 = vmax.f32 %v3370_v27, 0.0 }
 0x312   : > { %v4339_v23 = vmax.f32 %v4337_v18, %v4338_v53  ;;  %v4346_v4 = vmax.f32 %v4344_v5, %v4345_v2  ;;  %v5065_v39 = vmax.f32 %v12997_v3, %v13045_v43  ;;  %v3575_v25 = vcombine.high %v3573_v42, %v3573_v42 }
 0x313   : > { %v4353_v31 = vmax.f32 %v4351_v51, %v4352_v34  ;;  %v4299_v26 = vrot.slane %v4298_v41, 4  ;;  %v4305_v35 = vsel %vm4129_vm3, %v3574_v33, -inf  ;;  %v4312_v13 = vsel %vm4129_vm3, %v3573_v42, -inf }
 0x314   : > { %v13053_v48 = vsel %vm5026_vm4, %v4339_v23, -inf  ;;  %v13056_v28 = vsel %vm5026_vm4, %v4346_v4, -inf  ;;  %v4306_v16 = vrot.slane %v4305_v35, 4  ;;  %v4313_v63 = vrot.slane %v4312_v13, 4 }
 0x315   : > { %v5068_v20 = vmax.f32 %v13000_v9, %v13053_v48  ;;  %v5071_v61 = vmax.f32 %v13003_v10, %v13056_v28  ;;  %v13063_v19 = vsel %vm5026_vm4, %v4353_v31, -inf  ;;  %v4300_v32 = vmax.f32 %v4298_v41, %v4299_v26 }
 0x316   : > { %v5074_v62 = vmax.f32 %v13011_v15, %v13063_v19  ;;  %v4307_v38 = vmax.f32 %v4305_v35, %v4306_v16  ;;  %v4314_v1 = vmax.f32 %v4312_v13, %v4313_v63  ;;  %v4319_v58 = vsel %vm4129_vm3, %v3575_v25, -inf  ;;  %v13077_v35 = vpop.f32.mrb[21].mxu0 }
 0x317   : > { %v4301_v47 = vrot.slane %v4300_v32, 2  ;;  %v4320_v49 = vrot.slane %v4319_v58, 4  ;;  %v3610_v14 = vcombine.high %v3402_v40, %v3402_v40  ;;  %v3617_v18 = vrot.slane %v3402_v40, %v12846_v6 }
 0x318   : > { %v4308_v5 = vrot.slane %v4307_v38, 2  ;;  %v4315_v11 = vrot.slane %v4314_v1, 2  ;;  %v3369_v54 = vadd.f32 %v12840_v57, %v3330_v30  ;;  %v13071_v0 = vmul.f32 %v10996_v36, %v12834_v50 }
 0x319   : > { %v4302_v51 = vmax.f32 %v4300_v32, %v4301_v47  ;;  %v4321_v27 = vmax.f32 %v4319_v58, %v4320_v49  ;;  %v3624_v53 = vrot.slane %v3610_v14, %v12846_v6  ;;  %v3625_v2 = vcombine.high %v3617_v18, %v3617_v18 }
 0x31a   : > { %v4309_v42 = vmax.f32 %v4307_v38, %v4308_v5  ;;  %v4316_v33 = vmax.f32 %v4314_v1, %v4315_v11  ;;  %v4382_v34 = vsel %vm4129_vm3, %v3617_v18, -inf  ;;  %v3401_v41 = vmax.f32 %v3369_v54, 0.0 }
 0x31b   : > { %v4303_v23 = vrot.slane %v4302_v51, 1  ;;  %v4322_v4 = vrot.slane %v4321_v27, 2  ;;  %v3626_v40 = vcombine.high %v3624_v53, %v3624_v53  ;;  %v4383_v25 = vrot.slane %v4382_v34, 4 }
 0x31c   : > { %v4310_v31 = vrot.slane %v4309_v42, 1  ;;  %v4317_v26 = vrot.slane %v4316_v33, 1  ;;  %v4389_v30 = vsel %vm4129_vm3, %v3625_v2, -inf  ;;  %v4396_v36 = vsel %vm4129_vm3, %v3624_v53, -inf }
 0x31d   : > { %v4304_v13 = vmax.f32 %v4302_v51, %v4303_v23  ;;  %v4323_v16 = vmax.f32 %v4321_v27, %v4322_v4  ;;  %v4384_v63 = vmax.f32 %v4382_v34, %v4383_v25  ;;  %v4390_v32 = vrot.slane %v4389_v30, 4 }
 0x31e   : > { %v4311_v38 = vmax.f32 %v4309_v42, %v4310_v31  ;;  %v4318_v1 = vmax.f32 %v4316_v33, %v4317_v26  ;;  %v4397_v58 = vrot.slane %v4396_v36, 4  ;;  %v4403_v47 = vsel %vm4129_vm3, %v3626_v40, -inf }
 0x31f   : > { %v4324_v49 = vrot.slane %v4323_v16, 1  ;;  %v5052_v14 = vsel %vm5026_vm4, %v4304_v13, -inf  ;;  %v4385_v18 = vrot.slane %v4384_v63, 2  ;;  %v4391_v5 = vmax.f32 %v4389_v30, %v4390_v32 }
 0x320   : > { %v5053_v11 = vmax.f32 %v13018_v29, %v5052_v14  ;;  %v5055_v54 = vsel %vm5026_vm4, %v4311_v38, -inf  ;;  %v5058_v53 = vsel %vm5026_vm4, %v4318_v1, -inf  ;;  %v4398_v51 = vmax.f32 %v4396_v36, %v4397_v58  ;;  %v13094_v14 = vpop.f32.mrb[22].mxu0 }
 0x321   : > { %v4325_v27 = vmax.f32 %v4323_v16, %v4324_v49  ;;  %v5056_v2 = vmax.f32 %v13021_v52, %v5055_v54  ;;  %v5059_v42 = vmax.f32 %v13028_v21, %v5058_v53  ;;  %v4386_v33 = vmax.f32 %v4384_v63, %v4385_v18 }
 0x322   : > { %v4392_v34 = vrot.slane %v4391_v5, 2  ;;  %v4399_v23 = vrot.slane %v4398_v51, 2  ;;  %v4404_v4 = vrot.slane %v4403_v47, 4  ;;  %v3593_v40 = vcombine.high %v3401_v41, %v3401_v41 }
 0x323   : > { %v5061_v25 = vsel %vm5026_vm4, %v4325_v27, -inf  ;;  %v5317_v31 = vsel %vm5303_vm5, %v5056_v2, %v5053_v11  ;;  %v4387_v29 = vrot.slane %v4386_v33, 1  ;;  %v3600_v26 = vrot.slane %v3401_v41, %v12846_v6 }
 0x324   : > { %v5062_v30 = vmax.f32 %v13031_v7, %v5061_v25  ;;  %v5318_v36 = vsel %vm5305_vm6, %v5059_v42, %v5317_v31  ;;  %v4393_v13 = vmax.f32 %v4391_v5, %v4392_v34  ;;  %v4400_v52 = vmax.f32 %v4398_v51, %v4399_v23 }
 0x325   : > { %v4388_v16 = vmax.f32 %v4386_v33, %v4387_v29  ;;  %v4405_v21 = vmax.f32 %v4403_v47, %v4404_v4  ;;  %v3607_v63 = vrot.slane %v3593_v40, %v12846_v6  ;;  %v3608_v32 = vcombine.high %v3600_v26, %v3600_v26 }
 0x326   : > { %v5319_v38 = vsel %vm5307_vm7, %v5062_v30, %v5318_v36  ;;  %v4394_v1 = vrot.slane %v4393_v13, 1  ;;  %v4401_v58 = vrot.slane %v4400_v52, 1  ;;  %v4354_v49 = vsel %vm4129_vm3, %v3600_v26, -inf }
 0x327   : > { %v5320_v7 = vsel %vm5309_vm8, %v5065_v39, %v5319_v38  ;;  %v4406_v41 = vrot.slane %v4405_v21, 2  ;;  %v13101_v18 = vsel %vm5026_vm4, %v4388_v16, -inf  ;;  %v3609_v47 = vcombine.high %v3607_v63, %v3607_v63 }
 0x328   : > { %v5321_v5 = vsel %vm5311_vm9, %v5068_v20, %v5320_v7  ;;  %v4395_v11 = vmax.f32 %v4393_v13, %v4394_v1  ;;  %v4402_v54 = vmax.f32 %v4400_v52, %v4401_v58  ;;  %v4355_v53 = vrot.slane %v4354_v49, 4  ;;  %v13136_v13 = vpop.f32.mrb[23].mxu0 }
 0x329   : > { %v5322_v3 = vsel %vm5313_vm10, %v5071_v61, %v5321_v5  ;;  %v4407_v43 = vmax.f32 %v4405_v21, %v4406_v41  ;;  %v4361_v39 = vsel %vm4129_vm3, %v3608_v32, -inf  ;;  %v4368_v51 = vsel %vm4129_vm3, %v3607_v63, -inf }
 0x32a   : > { %v5323_v9 = vsel %vm5315_vm11, %v5074_v62, %v5322_v3  ;;  %v13118_v48 = vsel %vm5026_vm4, %v4395_v11, -inf  ;;  %v13121_v20 = vsel %vm5026_vm4, %v4402_v54, -inf  ;;  %v4356_v27 = vmax.f32 %v4354_v49, %v4355_v53 }
 0x32b   : > { %5376 = vst.msk [vmem:[#allocation3 + $0x21] sm:$0xff] %vm5026_vm4, %v5323_v9  ;;  %v4408_v10 = vrot.slane %v4407_v43, 1  ;;  %v4362_v28 = vrot.slane %v4361_v39, 4  ;;  %v4369_v61 = vrot.slane %v4368_v51, 4  ;;  %v4375_v2 = vsel %vm4129_vm3, %v3609_v47, -inf }
 0x32c   : > { %v4357_v42 = vrot.slane %v4356_v27, 2  ;;  %v4376_v33 = vrot.slane %v4375_v2, 4  ;;  %v3372_v15 = vadd.f32 %v12840_v57, %v13071_v0  ;;  %v10997_v19 = vadd.f32 %v12887_v37, %v12699_v44 }
 0x32d   : > { %v4409_v62 = vmax.f32 %v4407_v43, %v4408_v10  ;;  %v4363_v34 = vmax.f32 %v4361_v39, %v4362_v28  ;;  %v4370_v23 = vmax.f32 %v4368_v51, %v4369_v61  ;;  %v10998_v4 = vadd.f32 %v12892_v22, %v12705_v46 }
 0x32e   : > { %v4358_v40 = vmax.f32 %v4356_v27, %v4357_v42  ;;  %v4377_v25 = vmax.f32 %v4375_v2, %v4376_v33  ;;  %v3404_v31 = vmax.f32 %v3372_v15, 0.0  ;;  %v3332_v29 = vmul.f32 %v10997_v19, %v12834_v50 }
 0x32f   : > { %v13133_v26 = vsel %vm5026_vm4, %v4409_v62, -inf  ;;  %v4364_v30 = vrot.slane %v4363_v34, 2  ;;  %v4371_v36 = vrot.slane %v4370_v23, 2  ;;  %v3335_v0 = vmul.f32 %v10998_v4, %v12834_v50 }
 0x330   : > { %v4359_v44 = vrot.slane %v4358_v40, 1  ;;  %v4378_v37 = vrot.slane %v4377_v25, 2  ;;  %v3644_v52 = vcombine.high %v3404_v31, %v3404_v31  ;;  %v3651_v16 = vrot.slane %v3404_v31, %v12846_v6 }
 0x331   : > { %v4365_v46 = vmax.f32 %v4363_v34, %v4364_v30  ;;  %v4372_v22 = vmax.f32 %v4370_v23, %v4371_v36  ;;  %v3371_v21 = vadd.f32 %v12840_v57, %v3332_v29  ;;  %v3374_v63 = vadd.f32 %v12840_v57, %v3335_v0 }
 0x332   : > { %v4360_v32 = vmax.f32 %v4358_v40, %v4359_v44  ;;  %v4379_v38 = vmax.f32 %v4377_v25, %v4378_v37  ;;  %v3658_v1 = vrot.slane %v3644_v52, %v12846_v6  ;;  %v3659_v58 = vcombine.high %v3651_v16, %v3651_v16  ;;  %v13160_v40 = vpop.f32.mrb[24].mxu0 }
 0x333   : > { %v4366_v49 = vrot.slane %v4365_v46, 1  ;;  %v4373_v50 = vrot.slane %v4372_v22, 1  ;;  %v4438_v7 = vsel %vm4129_vm3, %v3651_v16, -inf  ;;  %v3403_v41 = vmax.f32 %v3371_v21, 0.0 }
 0x334   : > { %v4380_v47 = vrot.slane %v4379_v38, 1  ;;  %v13144_v5 = vsel %vm5026_vm4, %v4360_v32, -inf  ;;  %v3660_v11 = vcombine.high %v3658_v1, %v3658_v1  ;;  %v4439_v54 = vrot.slane %v4438_v7, 4 }
 0x335   : > { %v4367_v53 = vmax.f32 %v4365_v46, %v4366_v49  ;;  %v4374_v3 = vmax.f32 %v4372_v22, %v4373_v50  ;;  %v4445_v57 = vsel %vm4129_vm3, %v3659_v58, -inf  ;;  %v4452_v43 = vsel %vm4129_vm3, %v3658_v1, -inf }
 0x336   : > { %v4381_v39 = vmax.f32 %v4379_v38, %v4380_v47  ;;  %v4440_v51 = vmax.f32 %v4438_v7, %v4439_v54  ;;  %v4446_v9 = vrot.slane %v4445_v57, 4  ;;  %v4453_v27 = vrot.slane %v4452_v43, 4 }
 0x337   : > { %v13149_v10 = vsel %vm5026_vm4, %v4367_v53, -inf  ;;  %v13152_v28 = vsel %vm5026_vm4, %v4374_v3, -inf  ;;  %v4459_v61 = vsel %vm4129_vm3, %v3660_v11, -inf  ;;  %v3627_v2 = vcombine.high %v3403_v41, %v3403_v41 }
 0x338   : > { %v13156_v42 = vsel %vm5026_vm4, %v4381_v39, -inf  ;;  %v4441_v33 = vrot.slane %v4440_v51, 2  ;;  %v4447_v15 = vmax.f32 %v4445_v57, %v4446_v9  ;;  %v4454_v19 = vmax.f32 %v4452_v43, %v4453_v27 }
 0x339   : > { %v4460_v62 = vrot.slane %v4459_v61, 4  ;;  %v3634_v34 = vrot.slane %v3403_v41, %v12846_v6  ;;  %v3641_v23 = vrot.slane %v3627_v2, %v12846_v6  ;;  %v3406_v4 = vmax.f32 %v3374_v63, 0.0 }
 0x33a   : > { %v4442_v25 = vmax.f32 %v4440_v51, %v4441_v33  ;;  %v4448_v31 = vrot.slane %v4447_v15, 2  ;;  %v4455_v29 = vrot.slane %v4454_v19, 2  ;;  %v10999_v30 = vadd.f32 %v12897_v59, %v12707_v55 }
 0x33b   : > { %v4461_v36 = vmax.f32 %v4459_v61, %v4460_v62  ;;  %v3642_v0 = vcombine.high %v3634_v34, %v3634_v34  ;;  %v3643_v44 = vcombine.high %v3641_v23, %v3641_v23  ;;  %v4410_v37 = vsel %vm4129_vm3, %v3634_v34, -inf }
 0x33c   : > { %v4443_v52 = vrot.slane %v4442_v25, 1  ;;  %v4449_v16 = vmax.f32 %v4447_v15, %v4448_v31  ;;  %v4456_v46 = vmax.f32 %v4454_v19, %v4455_v29  ;;  %v4411_v22 = vrot.slane %v4410_v37, 4 }
 0x33d   : > { %v4462_v21 = vrot.slane %v4461_v36, 2  ;;  %v4417_v63 = vsel %vm4129_vm3, %v3642_v0, -inf  ;;  %v4424_v32 = vsel %vm4129_vm3, %v3641_v23, -inf  ;;  %v4431_v38 = vsel %vm4129_vm3, %v3643_v44, -inf  ;;  %v13190_v0 = vld [vmem:[%s14419_s2] ss:$0 sm:$0xff] }
 0x33e   : > { %v4444_v1 = vmax.f32 %v4442_v25, %v4443_v52  ;;  %v4450_v58 = vrot.slane %v4449_v16, 1  ;;  %v4457_v49 = vrot.slane %v4456_v46, 1  ;;  %v4412_v55 = vmax.f32 %v4410_v37, %v4411_v22 }
 0x33f   : > { %v4463_v59 = vmax.f32 %v4461_v36, %v4462_v21  ;;  %v4418_v50 = vrot.slane %v4417_v63, 4  ;;  %v4425_v7 = vrot.slane %v4424_v32, 4  ;;  %v4432_v41 = vrot.slane %v4431_v38, 4 }
 0x340   : > { %v4451_v47 = vmax.f32 %v4449_v16, %v4450_v58  ;;  %v4458_v11 = vmax.f32 %v4456_v46, %v4457_v49  ;;  %v13169_v54 = vsel %vm5026_vm4, %v4444_v1, -inf  ;;  %v4413_v53 = vrot.slane %v4412_v55, 2 }
 0x341   : > { %v4464_v3 = vrot.slane %v4463_v59, 1  ;;  %v5089_v57 = vmax.f32 %v13101_v18, %v13169_v54  ;;  %v4419_v43 = vmax.f32 %v4417_v63, %v4418_v50  ;;  %v4426_v39 = vmax.f32 %v4424_v32, %v4425_v7 }
 0x342   : > { %v13174_v51 = vsel %vm5026_vm4, %v4451_v47, -inf  ;;  %v13177_v9 = vsel %vm5026_vm4, %v4458_v11, -inf  ;;  %v4414_v27 = vmax.f32 %v4412_v55, %v4413_v53  ;;  %v4433_v61 = vmax.f32 %v4431_v38, %v4432_v41 }
 0x343   : > { %v4465_v2 = vmax.f32 %v4463_v59, %v4464_v3  ;;  %v5092_v33 = vmax.f32 %v13118_v48, %v13174_v51  ;;  %v5095_v15 = vmax.f32 %v13121_v20, %v13177_v9  ;;  %v4420_v19 = vrot.slane %v4419_v43, 2  ;;  %v13200_v59 = vpop.f32.mrb[25].mxu0 }
 0x344   : > { %v4415_v62 = vrot.slane %v4414_v27, 1  ;;  %v4427_v34 = vrot.slane %v4426_v39, 2  ;;  %v4434_v23 = vrot.slane %v4433_v61, 2  ;;  %v3678_v25 = vcombine.high %v3406_v4, %v3406_v4 }
 0x345   : > { %v13184_v31 = vsel %vm5026_vm4, %v4465_v2, -inf  ;;  %v4421_v29 = vmax.f32 %v4419_v43, %v4420_v19  ;;  %v3685_v36 = vrot.slane %v3406_v4, %v12846_v6  ;;  %v3334_v44 = vmul.f32 %v13190_v0, %v10999_v30  ;;  %v13208_v43 = vld [vmem:[%s14420_s3] ss:$0 sm:$0xff] }
 0x346   : > { %v5098_v37 = vmax.f32 %v13133_v26, %v13184_v31  ;;  %v4416_v52 = vmax.f32 %v4414_v27, %v4415_v62  ;;  %v4428_v16 = vmax.f32 %v4426_v39, %v4427_v34  ;;  %v4435_v46 = vmax.f32 %v4433_v61, %v4434_v23 }
 0x347   : > { %v4422_v22 = vrot.slane %v4421_v29, 1  ;;  %v3692_v21 = vrot.slane %v3678_v25, %v12846_v6  ;;  %v3693_v63 = vcombine.high %v3685_v36, %v3685_v36  ;;  %v4494_v32 = vsel %vm4129_vm3, %v3685_v36, -inf }
 0x348   : > { %v4429_v4 = vrot.slane %v4428_v16, 1  ;;  %v4436_v38 = vrot.slane %v4435_v46, 1  ;;  %v5076_v1 = vsel %vm5026_vm4, %v4416_v52, -inf  ;;  %v4495_v58 = vrot.slane %v4494_v32, 4 }
 0x349   : > { %v4423_v49 = vmax.f32 %v4421_v29, %v4422_v22  ;;  %v5077_v30 = vmax.f32 %v13144_v5, %v5076_v1  ;;  %v3694_v55 = vcombine.high %v3692_v21, %v3692_v21  ;;  %v4501_v26 = vsel %vm4129_vm3, %v3693_v63, -inf }
 0x34a   : > { %v4430_v50 = vmax.f32 %v4428_v16, %v4429_v4  ;;  %v4437_v7 = vmax.f32 %v4435_v46, %v4436_v38  ;;  %v4496_v41 = vmax.f32 %v4494_v32, %v4495_v58  ;;  %v4502_v47 = vrot.slane %v4501_v26, 4  ;;  %v5384_v46 = vld [vmem:[#allocation3 + $0x10] sm:$0xff] }
 0x34b   : > { %v5079_v11 = vsel %vm5026_vm4, %v4423_v49, -inf  ;;  %v4508_v53 = vsel %vm4129_vm3, %v3692_v21, -inf  ;;  %v4515_v3 = vsel %vm4129_vm3, %v3694_v55, -inf  ;;  %v3373_v5 = vadd.f32 %v13208_v43, %v3334_v44  ;;  %10416 = vmatprep.mubr.msk.f32.mxu1 %vm5026_vm4, %v5384_v46  ;;  %v14484_v46 = vld [vmem:[#allocation21_spill] sm:$0xff] }
 0x34c   : > { %v5080_v39 = vmax.f32 %v13149_v10, %v5079_v11  ;;  %v5082_v27 = vsel %vm5026_vm4, %v4430_v50, -inf  ;;  %v5085_v61 = vsel %vm5026_vm4, %v4437_v7, -inf  ;;  %v4497_v2 = vrot.slane %v4496_v41, 2 }
 0x34d   : > { %v5083_v19 = vmax.f32 %v13152_v28, %v5082_v27  ;;  %v5086_v62 = vmax.f32 %v13156_v42, %v5085_v61  ;;  %v4503_v34 = vmax.f32 %v4501_v26, %v4502_v47  ;;  %v4509_v23 = vrot.slane %v4508_v53, 4 }
 0x34e   : > { %v5324_v25 = vsel %vm5303_vm5, %v5080_v39, %v5077_v30  ;;  %v4498_v31 = vmax.f32 %v4496_v41, %v4497_v2  ;;  %v4516_v29 = vrot.slane %v4515_v3, 4  ;;  %v3405_v36 = vmax.f32 %v3373_v5, 0.0  ;;  %v13236_v30 = vpop.f32.mrb[26].mxu0 }
 0x34f   : > { %v5325_v44 = vsel %vm5305_vm6, %v5083_v19, %v5324_v25  ;;  %v4504_v52 = vrot.slane %v4503_v34, 2  ;;  %v4510_v10 = vmax.f32 %v4508_v53, %v4509_v23  ;;  %v11000_v16 = vadd.f32 %v12916_v8, %v12713_v56 }
 0x350   : > { %v5326_v22 = vsel %vm5307_vm7, %v5086_v62, %v5325_v44  ;;  %v4499_v28 = vrot.slane %v4498_v31, 1  ;;  %v4517_v21 = vmax.f32 %v4515_v3, %v4516_v29  ;;  %v3661_v42 = vcombine.high %v3405_v36, %v3405_v36 }
 0x351   : > { %v5327_v63 = vsel %vm5309_vm8, %v5089_v57, %v5326_v22  ;;  %v4505_v32 = vmax.f32 %v4503_v34, %v4504_v52  ;;  %v4511_v4 = vrot.slane %v4510_v10, 2  ;;  %v3668_v38 = vrot.slane %v3405_v36, %v12846_v6  ;;  %v14483_v34 = vld [vmem:[#allocation37_spill] sm:$0xff]  ;;  %v14485_v22 = vld [vmem:[#allocation38_spill] sm:$0xff] }
 0x352   : > { %v5328_v56 = vsel %vm5311_vm9, %v5092_v33, %v5327_v63  ;;  %v4500_v8 = vmax.f32 %v4498_v31, %v4499_v28  ;;  %v4518_v1 = vrot.slane %v4517_v21, 2  ;;  %v3675_v58 = vrot.slane %v3661_v42, %v12846_v6  ;;  %v14486_v63 = vld [vmem:[#allocation22_spill] sm:$0xff] }
 0x353   : > { %v5329_v18 = vsel %vm5313_vm10, %v5095_v15, %v5328_v56  ;;  %v4506_v54 = vrot.slane %v4505_v32, 1  ;;  %v4512_v57 = vmax.f32 %v4510_v10, %v4511_v4  ;;  %v3676_v49 = vcombine.high %v3668_v38, %v3668_v38 }
 0x354   : > { %v5330_v55 = vsel %vm5315_vm11, %v5098_v37, %v5329_v18  ;;  %v4519_v26 = vmax.f32 %v4517_v21, %v4518_v1  ;;  %v13240_v48 = vsel %vm5026_vm4, %v4500_v8, -inf  ;;  %v3677_v51 = vcombine.high %v3675_v58, %v3675_v58 }
 0x355   : > { %5377 = vst.msk [vmem:[#allocation3 + $0x31] sm:$0xff] %vm5026_vm4, %v5330_v55  ;;  %v4507_v33 = vmax.f32 %v4505_v32, %v4506_v54  ;;  %v4513_v50 = vrot.slane %v4512_v57, 1  ;;  %v4466_v20 = vsel %vm4129_vm3, %v3668_v38, -inf  ;;  %v4473_v9 = vsel %vm4129_vm3, %v3676_v49, -inf  ;;  %v13270_v54 = vpop.f32.mrb[27].mxu0 }
 0x356   : > { %v4520_v15 = vrot.slane %v4519_v26, 1  ;;  %v4467_v7 = vrot.slane %v4466_v20, 4  ;;  %v4474_v41 = vrot.slane %v4473_v9, 4  ;;  %v4480_v47 = vsel %vm4129_vm3, %v3675_v58, -inf }
 0x357   : > { %v4514_v11 = vmax.f32 %v4512_v57, %v4513_v50  ;;  %v13247_v37 = vsel %vm5026_vm4, %v4507_v33, -inf  ;;  %v4481_v53 = vrot.slane %v4480_v47, 4  ;;  %v4487_v3 = vsel %vm4129_vm3, %v3677_v51, -inf }
 0x358   : > { %v4521_v5 = vmax.f32 %v4519_v26, %v4520_v15  ;;  %v4468_v39 = vmax.f32 %v4466_v20, %v4467_v7  ;;  %v4475_v27 = vmax.f32 %v4473_v9, %v4474_v41  ;;  %v4488_v61 = vrot.slane %v4487_v3, 4 }
 0x359   : > { %v13251_v2 = vsel %vm5026_vm4, %v4514_v11, -inf  ;;  %v4482_v19 = vmax.f32 %v4480_v47, %v4481_v53  ;;  %v3337_v62 = vmul.f32 %v13190_v0, %v11000_v16  ;;  %v11001_v23 = vadd.f32 %v14483_v34, %v12715_v60 }
 0x35a   : > { %v13257_v25 = vsel %vm5026_vm4, %v4521_v5, -inf  ;;  %v4469_v31 = vrot.slane %v4468_v39, 2  ;;  %v4476_v29 = vrot.slane %v4475_v27, 2  ;;  %v4489_v36 = vmax.f32 %v4487_v3, %v4488_v61 }
 0x35b   : > { %v4483_v44 = vrot.slane %v4482_v19, 2  ;;  %v3376_v52 = vadd.f32 %v13208_v43, %v3337_v62  ;;  %v3336_v10 = vmul.f32 %v13190_v0, %v11001_v23  ;;  %v11002_v28 = vadd.f32 %v14485_v22, %v14484_v46 }
 0x35c   : > { %v4470_v21 = vmax.f32 %v4468_v39, %v4469_v31  ;;  %v4477_v42 = vmax.f32 %v4475_v27, %v4476_v29  ;;  %v4490_v16 = vrot.slane %v4489_v36, 2  ;;  %v11003_v60 = vadd.f32 %v12952_v12, %v14486_v63 }
 0x35d   : > { %v4484_v32 = vmax.f32 %v4482_v19, %v4483_v44  ;;  %v3408_v4 = vmax.f32 %v3376_v52, 0.0  ;;  %v3375_v38 = vadd.f32 %v13208_v43, %v3336_v10  ;;  %v3339_v56 = vmul.f32 %v13190_v0, %v11002_v28 }
 0x35e   : > { %v4471_v8 = vrot.slane %v4470_v21, 1  ;;  %v4478_v1 = vrot.slane %v4477_v42, 1  ;;  %v4491_v58 = vmax.f32 %v4489_v36, %v4490_v16  ;;  %v13268_v18 = vmul.f32 %v13190_v0, %v11003_v60 }
 0x35f   : > { %v4485_v57 = vrot.slane %v4484_v32, 1  ;;  %v3712_v49 = vcombine.high %v3408_v4, %v3408_v4  ;;  %v3719_v55 = vrot.slane %v3408_v4, %v12846_v6  ;;  %v3407_v26 = vmax.f32 %v3375_v38, 0.0 }
 0x360   : > { %v4472_v12 = vmax.f32 %v4470_v21, %v4471_v8  ;;  %v4479_v51 = vmax.f32 %v4477_v42, %v4478_v1  ;;  %v4492_v33 = vrot.slane %v4491_v58, 1  ;;  %v3378_v50 = vadd.f32 %v13208_v43, %v3339_v56 }
 0x361   : > { %v4486_v20 = vmax.f32 %v4484_v32, %v4485_v57  ;;  %v3726_v9 = vrot.slane %v3712_v49, %v12846_v6  ;;  %v3727_v15 = vcombine.high %v3719_v55, %v3719_v55  ;;  %v4550_v7 = vsel %vm4129_vm3, %v3719_v55, -inf  ;;  %v13296_v55 = vpop.f32.mrb[28].mxu0 }
 0x362   : > { %v4493_v41 = vmax.f32 %v4491_v58, %v4492_v33  ;;  %v13277_v47 = vsel %vm5026_vm4, %v4472_v12, -inf  ;;  %v13280_v11 = vsel %vm5026_vm4, %v4479_v51, -inf  ;;  %v4551_v53 = vrot.slane %v4550_v7, 4 }
 0x363   : > { %v13283_v3 = vsel %vm5026_vm4, %v4486_v20, -inf  ;;  %v3728_v5 = vcombine.high %v3726_v9, %v3726_v9  ;;  %v4557_v39 = vsel %vm4129_vm3, %v3727_v15, -inf  ;;  %v4564_v27 = vsel %vm4129_vm3, %v3726_v9, -inf }
 0x364   : > { %v13288_v61 = vsel %vm5026_vm4, %v4493_v41, -inf  ;;  %v4552_v19 = vmax.f32 %v4550_v7, %v4551_v53  ;;  %v4558_v62 = vrot.slane %v4557_v39, 4  ;;  %v4565_v34 = vrot.slane %v4564_v27, 4 }
 0x365   : > { %v4571_v23 = vsel %vm4129_vm3, %v3728_v5, -inf  ;;  %v3695_v31 = vcombine.high %v3407_v26, %v3407_v26  ;;  %v3702_v29 = vrot.slane %v3407_v26, %v12846_v6  ;;  %v3410_v36 = vmax.f32 %v3378_v50, 0.0 }
 0x366   : > { %v4553_v44 = vrot.slane %v4552_v19, 2  ;;  %v4559_v52 = vmax.f32 %v4557_v39, %v4558_v62  ;;  %v4566_v10 = vmax.f32 %v4564_v27, %v4565_v34  ;;  %v4572_v46 = vrot.slane %v4571_v23, 4 }
 0x367   : > { %v3709_v22 = vrot.slane %v3695_v31, %v12846_v6  ;;  %v3710_v28 = vcombine.high %v3702_v29, %v3702_v29  ;;  %v4522_v21 = vsel %vm4129_vm3, %v3702_v29, -inf  ;;  %v3746_v42 = vcombine.high %v3410_v36, %v3410_v36 }
 0x368   : > { %v4554_v16 = vmax.f32 %v4552_v19, %v4553_v44  ;;  %v4560_v63 = vrot.slane %v4559_v52, 2  ;;  %v4567_v60 = vrot.slane %v4566_v10, 2  ;;  %v4573_v32 = vmax.f32 %v4571_v23, %v4572_v46 }
 0x369   : > { %v3711_v4 = vcombine.high %v3709_v22, %v3709_v22  ;;  %v4523_v38 = vrot.slane %v4522_v21, 4  ;;  %v4529_v56 = vsel %vm4129_vm3, %v3710_v28, -inf  ;;  %v4536_v8 = vsel %vm4129_vm3, %v3709_v22, -inf }
 0x36a   : > { %v4555_v1 = vrot.slane %v4554_v16, 1  ;;  %v4561_v58 = vmax.f32 %v4559_v52, %v4560_v63  ;;  %v4568_v57 = vmax.f32 %v4566_v10, %v4567_v60  ;;  %v4574_v49 = vrot.slane %v4573_v32, 2 }
 0x36b   : > { %v4524_v26 = vmax.f32 %v4522_v21, %v4523_v38  ;;  %v4530_v12 = vrot.slane %v4529_v56, 4  ;;  %v4537_v51 = vrot.slane %v4536_v8, 4  ;;  %v4543_v33 = vsel %vm4129_vm3, %v3711_v4, -inf }
 0x36c   : > { %v4556_v50 = vmax.f32 %v4554_v16, %v4555_v1  ;;  %v4562_v20 = vrot.slane %v4561_v58, 1  ;;  %v4569_v9 = vrot.slane %v4568_v57, 1  ;;  %v4575_v15 = vmax.f32 %v4573_v32, %v4574_v49 }
 0x36d   : > { %v4525_v7 = vrot.slane %v4524_v26, 2  ;;  %v4531_v41 = vmax.f32 %v4529_v56, %v4530_v12  ;;  %v4538_v53 = vmax.f32 %v4536_v8, %v4537_v51  ;;  %v4544_v5 = vrot.slane %v4543_v33, 4 }
 0x36e   : > { %v4563_v39 = vmax.f32 %v4561_v58, %v4562_v20  ;;  %v4570_v27 = vmax.f32 %v4568_v57, %v4569_v9  ;;  %v4576_v19 = vrot.slane %v4575_v15, 1  ;;  %v13300_v62 = vsel %vm5026_vm4, %v4556_v50, -inf }
 0x36f   : > { %v5113_v34 = vmax.f32 %v13240_v48, %v13300_v62  ;;  %v4526_v23 = vmax.f32 %v4524_v26, %v4525_v7  ;;  %v4532_v31 = vrot.slane %v4531_v41, 2  ;;  %v4539_v29 = vrot.slane %v4538_v53, 2 }
 0x370   : > { %v4577_v44 = vmax.f32 %v4575_v15, %v4576_v19  ;;  %v5115_v52 = vsel %vm5026_vm4, %v4563_v39, -inf  ;;  %v13306_v10 = vsel %vm5026_vm4, %v4570_v27, -inf  ;;  %v4545_v46 = vmax.f32 %v4543_v33, %v4544_v5  ;;  %v13328_v19 = vpop.f32.mrb[29].mxu0 }
 0x371   : > { %v5116_v22 = vmax.f32 %v13247_v37, %v5115_v52  ;;  %v5119_v28 = vmax.f32 %v13251_v2, %v13306_v10  ;;  %v4527_v21 = vrot.slane %v4526_v23, 1  ;;  %v4533_v16 = vmax.f32 %v4531_v41, %v4532_v31 }
 0x372   : > { %v13312_v63 = vsel %vm5026_vm4, %v4577_v44, -inf  ;;  %v4540_v48 = vmax.f32 %v4538_v53, %v4539_v29  ;;  %v4546_v60 = vrot.slane %v4545_v46, 2  ;;  %v3753_v32 = vrot.slane %v3410_v36, %v12846_v6 }
 0x373   : > { %v5122_v4 = vmax.f32 %v13257_v25, %v13312_v63  ;;  %v4528_v38 = vmax.f32 %v4526_v23, %v4527_v21  ;;  %v4534_v56 = vrot.slane %v4533_v16, 1  ;;  %v3760_v8 = vrot.slane %v3746_v42, %v12846_v6 }
 0x374   : > { %v4541_v37 = vrot.slane %v4540_v48, 1  ;;  %v4547_v1 = vmax.f32 %v4545_v46, %v4546_v60  ;;  %v3761_v58 = vcombine.high %v3753_v32, %v3753_v32  ;;  %v4606_v2 = vsel %vm4129_vm3, %v3753_v32, -inf }
 0x375   : > { %v4535_v57 = vmax.f32 %v4533_v16, %v4534_v56  ;;  %v5100_v49 = vsel %vm5026_vm4, %v4528_v38, -inf  ;;  %v3762_v26 = vcombine.high %v3760_v8, %v3760_v8  ;;  %v4607_v12 = vrot.slane %v4606_v2, 4  ;;  %v14487_v16 = vld [vmem:[#allocation23_spill] sm:$0xff]  ;;  %v14488_v38 = vld [vmem:[#allocation24_spill] sm:$0xff] }
 0x376   : > { %v4542_v51 = vmax.f32 %v4540_v48, %v4541_v37  ;;  %v4548_v33 = vrot.slane %v4547_v1, 1  ;;  %v5101_v36 = vmax.f32 %v13277_v47, %v5100_v49  ;;  %v4613_v25 = vsel %vm4129_vm3, %v3761_v58, -inf }
 0x377   : > { %v5103_v50 = vsel %vm5026_vm4, %v4535_v57, -inf  ;;  %v4608_v20 = vmax.f32 %v4606_v2, %v4607_v12  ;;  %v4614_v42 = vrot.slane %v4613_v25, 4  ;;  %v4620_v9 = vsel %vm4129_vm3, %v3760_v8, -inf }
 0x378   : > { %v4549_v15 = vmax.f32 %v4547_v1, %v4548_v33  ;;  %v5104_v7 = vmax.f32 %v13280_v11, %v5103_v50  ;;  %v5106_v41 = vsel %vm5026_vm4, %v4542_v51, -inf  ;;  %v4621_v53 = vrot.slane %v4620_v9, 4  ;;  %v13345_v51 = vpop.f32.mrb[30].mxu0 }
 0x379   : > { %v5107_v5 = vmax.f32 %v13283_v3, %v5106_v41  ;;  %v4609_v39 = vrot.slane %v4608_v20, 2  ;;  %v4615_v27 = vmax.f32 %v4613_v25, %v4614_v42  ;;  %v4627_v47 = vsel %vm4129_vm3, %v3762_v26, -inf }
 0x37a   : > { %v5109_v62 = vsel %vm5026_vm4, %v4549_v15, -inf  ;;  %v5331_v23 = vsel %vm5303_vm5, %v5104_v7, %v5101_v36  ;;  %v4622_v31 = vmax.f32 %v4620_v9, %v4621_v53  ;;  %v4628_v29 = vrot.slane %v4627_v47, 4 }
 0x37b   : > { %v5110_v44 = vmax.f32 %v13288_v61, %v5109_v62  ;;  %v5332_v11 = vsel %vm5305_vm6, %v5107_v5, %v5331_v23  ;;  %v4610_v52 = vmax.f32 %v4608_v20, %v4609_v39  ;;  %v4616_v10 = vrot.slane %v4615_v27, 2 }
 0x37c   : > { %v4623_v46 = vrot.slane %v4622_v31, 2  ;;  %v4629_v3 = vmax.f32 %v4627_v47, %v4628_v29  ;;  %v3377_v21 = vadd.f32 %v13208_v43, %v13268_v18  ;;  %v11004_v63 = vadd.f32 %v12992_v45, %v14487_v16 }
 0x37d   : > { %v5333_v48 = vsel %vm5307_vm7, %v5110_v44, %v5332_v11  ;;  %v4611_v60 = vrot.slane %v4610_v52, 1  ;;  %v4617_v32 = vmax.f32 %v4615_v27, %v4616_v10  ;;  %v11005_v56 = vadd.f32 %v13005_v17, %v14488_v38 }
 0x37e   : > { %v5334_v61 = vsel %vm5309_vm8, %v5113_v34, %v5333_v48  ;;  %v4624_v8 = vmax.f32 %v4622_v31, %v4623_v46  ;;  %v4630_v37 = vrot.slane %v4629_v3, 2  ;;  %v3409_v1 = vmax.f32 %v3377_v21, 0.0 }
 0x37f   : > { %v5335_v58 = vsel %vm5311_vm9, %v5116_v22, %v5334_v61  ;;  %v4612_v2 = vmax.f32 %v4610_v52, %v4611_v60  ;;  %v4618_v57 = vrot.slane %v4617_v32, 1  ;;  %v3341_v18 = vmul.f32 %v13190_v0, %v11004_v63 }
 0x380   : > { %v5336_v45 = vsel %vm5313_vm10, %v5119_v28, %v5335_v58  ;;  %v4625_v49 = vrot.slane %v4624_v8, 1  ;;  %v4631_v26 = vmax.f32 %v4629_v3, %v4630_v37  ;;  %v3729_v12 = vcombine.high %v3409_v1, %v3409_v1 }
 0x381   : > { %v5337_v17 = vsel %vm5315_vm11, %v5122_v4, %v5336_v45  ;;  %v4619_v33 = vmax.f32 %v4617_v32, %v4618_v57  ;;  %v13349_v34 = vsel %vm5026_vm4, %v4612_v2, -inf  ;;  %v3736_v36 = vrot.slane %v3409_v1, %v12846_v6 }
 0x382   : > { %5378 = vst.msk [vmem:[#allocation3 + $0x41] sm:$0xff] %vm5026_vm4, %v5337_v17  ;;  %v4626_v22 = vmax.f32 %v4624_v8, %v4625_v49  ;;  %v4632_v25 = vrot.slane %v4631_v26, 1  ;;  %v3743_v50 = vrot.slane %v3729_v12, %v12846_v6  ;;  %v3380_v28 = vadd.f32 %v13208_v43, %v3341_v18 }
 0x383   : > { %v13356_v20 = vsel %vm5026_vm4, %v4619_v33, -inf  ;;  %v3744_v42 = vcombine.high %v3736_v36, %v3736_v36  ;;  %v4578_v4 = vsel %vm4129_vm3, %v3736_v36, -inf  ;;  %v3340_v9 = vmul.f32 %v13190_v0, %v11005_v56 }
 0x384   : > { %v4633_v15 = vmax.f32 %v4631_v26, %v4632_v25  ;;  %v13361_v7 = vsel %vm5026_vm4, %v4626_v22, -inf  ;;  %v3745_v41 = vcombine.high %v3743_v50, %v3743_v50  ;;  %v4579_v53 = vrot.slane %v4578_v4, 4  ;;  %v13375_v26 = vpop.f32.mrb[31].mxu0 }
 0x385   : > { %v4585_v5 = vsel %vm4129_vm3, %v3744_v42, -inf  ;;  %v4592_v39 = vsel %vm4129_vm3, %v3743_v50, -inf  ;;  %v3412_v27 = vmax.f32 %v3380_v28, 0.0  ;;  %v3379_v47 = vadd.f32 %v13208_v43, %v3340_v9 }
 0x386   : > { %v13367_v62 = vsel %vm5026_vm4, %v4633_v15, -inf  ;;  %v4580_v23 = vmax.f32 %v4578_v4, %v4579_v53  ;;  %v4586_v31 = vrot.slane %v4585_v5, 4  ;;  %v4593_v29 = vrot.slane %v4592_v39, 4 }
 0x387   : > { %v4599_v44 = vsel %vm4129_vm3, %v3745_v41, -inf  ;;  %v3780_v11 = vcombine.high %v3412_v27, %v3412_v27  ;;  %v3787_v52 = vrot.slane %v3412_v27, %v12846_v6  ;;  %v3411_v10 = vmax.f32 %v3379_v47, 0.0 }
 0x388   : > { %v4581_v46 = vrot.slane %v4580_v23, 2  ;;  %v4587_v3 = vmax.f32 %v4585_v5, %v4586_v31  ;;  %v4594_v21 = vmax.f32 %v4592_v39, %v4593_v29  ;;  %v4600_v16 = vrot.slane %v4599_v44, 4 }
 0x389   : > { %v3794_v63 = vrot.slane %v3780_v11, %v12846_v6  ;;  %v3795_v48 = vcombine.high %v3787_v52, %v3787_v52  ;;  %v4662_v60 = vsel %vm4129_vm3, %v3787_v52, -inf  ;;  %v3763_v32 = vcombine.high %v3411_v10, %v3411_v10 }
 0x38a   : > { %v4582_v38 = vmax.f32 %v4580_v23, %v4581_v46  ;;  %v4588_v56 = vrot.slane %v4587_v3, 2  ;;  %v4595_v61 = vrot.slane %v4594_v21, 2  ;;  %v4601_v8 = vmax.f32 %v4599_v44, %v4600_v16 }
 0x38b   : > { %v3796_v37 = vcombine.high %v3794_v63, %v3794_v63  ;;  %v4663_v1 = vrot.slane %v4662_v60, 4  ;;  %v4669_v58 = vsel %vm4129_vm3, %v3795_v48, -inf  ;;  %v4676_v2 = vsel %vm4129_vm3, %v3794_v63, -inf }
 0x38c   : > { %v4583_v57 = vrot.slane %v4582_v38, 1  ;;  %v4589_v18 = vmax.f32 %v4587_v3, %v4588_v56  ;;  %v4596_v45 = vmax.f32 %v4594_v21, %v4595_v61  ;;  %v4602_v49 = vrot.slane %v4601_v8, 2 }
 0x38d   : > { %v4664_v12 = vmax.f32 %v4662_v60, %v4663_v1  ;;  %v4670_v17 = vrot.slane %v4669_v58, 4  ;;  %v4677_v33 = vrot.slane %v4676_v2, 4  ;;  %v4683_v36 = vsel %vm4129_vm3, %v3796_v37, -inf }
 0x38e   : > { %v4584_v22 = vmax.f32 %v4582_v38, %v4583_v57  ;;  %v4590_v25 = vrot.slane %v4589_v18, 1  ;;  %v4597_v50 = vrot.slane %v4596_v45, 1  ;;  %v4603_v28 = vmax.f32 %v4601_v8, %v4602_v49 }
 0x38f   : > { %v4665_v42 = vrot.slane %v4664_v12, 2  ;;  %v4671_v4 = vmax.f32 %v4669_v58, %v4670_v17  ;;  %v4678_v9 = vmax.f32 %v4676_v2, %v4677_v33  ;;  %v4684_v15 = vrot.slane %v4683_v36, 4 }
 0x390   : > { %v4591_v41 = vmax.f32 %v4589_v18, %v4590_v25  ;;  %v4598_v53 = vmax.f32 %v4596_v45, %v4597_v50  ;;  %v4604_v5 = vrot.slane %v4603_v28, 1  ;;  %v13379_v39 = vsel %vm5026_vm4, %v4584_v22, -inf }
 0x391   : > { %v4666_v27 = vmax.f32 %v4664_v12, %v4665_v42  ;;  %v4672_v47 = vrot.slane %v4671_v4, 2  ;;  %v4679_v23 = vrot.slane %v4678_v9, 2  ;;  %v4685_v31 = vmax.f32 %v4683_v36, %v4684_v15 }
 0x392   : > { %v4605_v29 = vmax.f32 %v4603_v28, %v4604_v5  ;;  %v13382_v44 = vsel %vm5026_vm4, %v4591_v41, -inf  ;;  %v13385_v11 = vsel %vm5026_vm4, %v4598_v53, -inf  ;;  %v3770_v52 = vrot.slane %v3411_v10, %v12846_v6  ;;  %v14489_v5 = vld [vmem:[#allocation25_spill] sm:$0xff] }
 0x393   : > { %v4667_v46 = vrot.slane %v4666_v27, 1  ;;  %v4673_v3 = vmax.f32 %v4671_v4, %v4672_v47  ;;  %v4680_v21 = vmax.f32 %v4678_v9, %v4679_v23  ;;  %v4686_v16 = vrot.slane %v4685_v31, 2 }
 0x394   : > { %v13389_v63 = vsel %vm5026_vm4, %v4605_v29, -inf  ;;  %v3777_v48 = vrot.slane %v3763_v32, %v12846_v6  ;;  %v3778_v60 = vcombine.high %v3770_v52, %v3770_v52  ;;  %v4634_v38 = vsel %vm4129_vm3, %v3770_v52, -inf  ;;  %v14490_v29 = vld [vmem:[#allocation26_spill] sm:$0xff] }
 0x395   : > { %v4668_v56 = vmax.f32 %v4666_v27, %v4667_v46  ;;  %v4674_v61 = vrot.slane %v4673_v3, 1  ;;  %v4681_v8 = vrot.slane %v4680_v21, 1  ;;  %v4687_v37 = vmax.f32 %v4685_v31, %v4686_v16  ;;  %v14491_v16 = vld [vmem:[#allocation27_spill] sm:$0xff] }
 0x396   : > { %v3779_v1 = vcombine.high %v3777_v48, %v3777_v48  ;;  %v4635_v58 = vrot.slane %v4634_v38, 4  ;;  %v4641_v10 = vsel %vm4129_vm3, %v3778_v60, -inf  ;;  %v4648_v2 = vsel %vm4129_vm3, %v3777_v48, -inf }
 0x397   : > { %v4675_v57 = vmax.f32 %v4673_v3, %v4674_v61  ;;  %v4682_v18 = vmax.f32 %v4680_v21, %v4681_v8  ;;  %v4688_v45 = vrot.slane %v4687_v37, 1  ;;  %v13396_v49 = vsel %vm5026_vm4, %v4668_v56, -inf }
 0x398   : > { %v5137_v32 = vmax.f32 %v13349_v34, %v13396_v49  ;;  %v4636_v12 = vmax.f32 %v4634_v38, %v4635_v58  ;;  %v4642_v17 = vrot.slane %v4641_v10, 4  ;;  %v4649_v33 = vrot.slane %v4648_v2, 4 }
 0x399   : > { %v4689_v36 = vmax.f32 %v4687_v37, %v4688_v45  ;;  %v13401_v22 = vsel %vm5026_vm4, %v4675_v57, -inf  ;;  %v13404_v25 = vsel %vm5026_vm4, %v4682_v18, -inf  ;;  %v4655_v50 = vsel %vm4129_vm3, %v3779_v1, -inf }
 0x39a   : > { %v5140_v28 = vmax.f32 %v13356_v20, %v13401_v22  ;;  %v5143_v42 = vmax.f32 %v13361_v7, %v13404_v25  ;;  %v4637_v4 = vrot.slane %v4636_v12, 2  ;;  %v4643_v9 = vmax.f32 %v4641_v10, %v4642_v17 }
 0x39b   : > { %v13412_v15 = vsel %vm5026_vm4, %v4689_v36, -inf  ;;  %v4650_v41 = vmax.f32 %v4648_v2, %v4649_v33  ;;  %v4656_v53 = vrot.slane %v4655_v50, 4  ;;  %v11006_v27 = vadd.f32 %v13039_v24, %v14489_v5  ;;  %v14492_v24 = vld [vmem:[#allocation28_spill] sm:$0xff] }
 0x39c   : > { %v5146_v47 = vmax.f32 %v13367_v62, %v13412_v15  ;;  %v4638_v23 = vmax.f32 %v4636_v12, %v4637_v4  ;;  %v4644_v31 = vrot.slane %v4643_v9, 2  ;;  %v11007_v52 = vadd.f32 %v13077_v35, %v14490_v29 }
 0x39d   : > { %v4651_v46 = vrot.slane %v4650_v41, 2  ;;  %v4657_v3 = vmax.f32 %v4655_v50, %v4656_v53  ;;  %v3343_v21 = vmul.f32 %v13190_v0, %v11006_v27  ;;  %v11008_v48 = vadd.f32 %v13094_v14, %v14491_v16 }
 0x39e   : > { %v4639_v60 = vrot.slane %v4638_v23, 1  ;;  %v4645_v38 = vmax.f32 %v4643_v9, %v4644_v31  ;;  %v3342_v56 = vmul.f32 %v13190_v0, %v11007_v52  ;;  %v11009_v61 = vadd.f32 %v13136_v13, %v14492_v24 }
 0x39f   : > { %v4652_v8 = vmax.f32 %v4650_v41, %v4651_v46  ;;  %v4658_v37 = vrot.slane %v4657_v3, 2  ;;  %v3382_v1 = vadd.f32 %v13208_v43, %v3343_v21  ;;  %v3345_v35 = vmul.f32 %v13190_v0, %v11008_v48 }
 0x3a0   : > { %v4640_v58 = vmax.f32 %v4638_v23, %v4639_v60  ;;  %v4646_v10 = vrot.slane %v4645_v38, 1  ;;  %v3381_v2 = vadd.f32 %v13208_v43, %v3342_v56  ;;  %v3344_v57 = vmul.f32 %v13190_v0, %v11009_v61 }
 0x3a1   : > { %v4653_v14 = vrot.slane %v4652_v8, 1  ;;  %v4659_v18 = vmax.f32 %v4657_v3, %v4658_v37  ;;  %v3414_v45 = vmax.f32 %v3382_v1, 0.0  ;;  %v13431_v12 = vadd.f32 %v13208_v43, %v3345_v35 }
 0x3a2   : > { %v4647_v17 = vmax.f32 %v4645_v38, %v4646_v10  ;;  %v5124_v13 = vsel %vm5026_vm4, %v4640_v58, -inf  ;;  %v3413_v33 = vmax.f32 %v3381_v2, 0.0  ;;  %v13435_v36 = vadd.f32 %v13208_v43, %v3344_v57 }
 0x3a3   : > { %v4654_v50 = vmax.f32 %v4652_v8, %v4653_v14  ;;  %v4660_v4 = vrot.slane %v4659_v18, 1  ;;  %v5125_v9 = vmax.f32 %v13379_v39, %v5124_v13  ;;  %v3814_v41 = vcombine.high %v3414_v45, %v3414_v45 }
 0x3a4   : > { %v5127_v0 = vsel %vm5026_vm4, %v4647_v17, -inf  ;;  %v3821_v53 = vrot.slane %v3414_v45, %v12846_v6  ;;  %v3797_v5 = vcombine.high %v3413_v33, %v3413_v33  ;;  %v3804_v27 = vrot.slane %v3413_v33, %v12846_v6 }
 0x3a5   : > { %v4661_v23 = vmax.f32 %v4659_v18, %v4660_v4  ;;  %v5128_v31 = vmax.f32 %v13382_v44, %v5127_v0  ;;  %v5130_v29 = vsel %vm5026_vm4, %v4654_v50, -inf  ;;  %v3828_v43 = vrot.slane %v3814_v41, %v12846_v6 }
 0x3a6   : > { %v5131_v52 = vmax.f32 %v13385_v11, %v5130_v29  ;;  %v3829_v46 = vcombine.high %v3821_v53, %v3821_v53  ;;  %v4718_v39 = vsel %vm4129_vm3, %v3821_v53, -inf  ;;  %v3811_v3 = vrot.slane %v3797_v5, %v12846_v6 }
 0x3a7   : > { %v5133_v21 = vsel %vm5026_vm4, %v4661_v23, -inf  ;;  %v5338_v16 = vsel %vm5303_vm5, %v5128_v31, %v5125_v9  ;;  %v3830_v48 = vcombine.high %v3828_v43, %v3828_v43  ;;  %v4719_v60 = vrot.slane %v4718_v39, 4 }
 0x3a8   : > { %v5134_v38 = vmax.f32 %v13389_v63, %v5133_v21  ;;  %v5339_v44 = vsel %vm5305_vm6, %v5131_v52, %v5338_v16  ;;  %v4725_v56 = vsel %vm4129_vm3, %v3829_v46, -inf  ;;  %v4732_v24 = vsel %vm4129_vm3, %v3828_v43, -inf }
 0x3a9   : > { %v4720_v11 = vmax.f32 %v4718_v39, %v4719_v60  ;;  %v4726_v61 = vrot.slane %v4725_v56, 4  ;;  %v4733_v8 = vrot.slane %v4732_v24, 4  ;;  %v4739_v37 = vsel %vm4129_vm3, %v3830_v48, -inf }
 0x3aa   : > { %v5340_v1 = vsel %vm5307_vm7, %v5134_v38, %v5339_v44  ;;  %v4740_v35 = vrot.slane %v4739_v37, 4  ;;  %v3812_v58 = vcombine.high %v3804_v27, %v3804_v27  ;;  %v3813_v10 = vcombine.high %v3811_v3, %v3811_v3 }
 0x3ab   : > { %v5341_v63 = vsel %vm5309_vm8, %v5137_v32, %v5340_v1  ;;  %v4721_v2 = vrot.slane %v4720_v11, 2  ;;  %v4727_v57 = vmax.f32 %v4725_v56, %v4726_v61  ;;  %v4734_v14 = vmax.f32 %v4732_v24, %v4733_v8 }
 0x3ac   : > { %v5342_v18 = vsel %vm5311_vm9, %v5140_v28, %v5341_v63  ;;  %v4741_v45 = vmax.f32 %v4739_v37, %v4740_v35  ;;  %v4690_v17 = vsel %vm4129_vm3, %v3804_v27, -inf  ;;  %v4697_v13 = vsel %vm4129_vm3, %v3812_v58, -inf }
 0x3ad   : > { %v5343_v34 = vsel %vm5313_vm10, %v5143_v42, %v5342_v18  ;;  %v4722_v49 = vmax.f32 %v4720_v11, %v4721_v2  ;;  %v4728_v32 = vrot.slane %v4727_v57, 2  ;;  %v4735_v33 = vrot.slane %v4734_v14, 2 }
 0x3ae   : > { %v5344_v20 = vsel %vm5315_vm11, %v5146_v47, %v5343_v34  ;;  %v4742_v22 = vrot.slane %v4741_v45, 2  ;;  %v4691_v28 = vrot.slane %v4690_v17, 4  ;;  %v4698_v50 = vrot.slane %v4697_v13, 4 }
 0x3af   : > { %5379 = vst.msk [vmem:[#allocation3 + $0x51] sm:$0xff] %vm5026_vm4, %v5344_v20  ;;  %v4723_v4 = vrot.slane %v4722_v49, 1  ;;  %v4729_v9 = vmax.f32 %v4727_v57, %v4728_v32  ;;  %v4736_v41 = vmax.f32 %v4734_v14, %v4735_v33  ;;  %v4704_v7 = vsel %vm4129_vm3, %v3811_v3, -inf  ;;  %v14493_v57 = vld [vmem:[#allocation29_spill] sm:$0xff] }
 0x3b0   : > { %v4743_v25 = vmax.f32 %v4741_v45, %v4742_v22  ;;  %v4692_v42 = vmax.f32 %v4690_v17, %v4691_v28  ;;  %v4699_v0 = vmax.f32 %v4697_v13, %v4698_v50  ;;  %v4705_v53 = vrot.slane %v4704_v7, 4 }
 0x3b1   : > { %v4724_v5 = vmax.f32 %v4722_v49, %v4723_v4  ;;  %v4730_v27 = vrot.slane %v4729_v9, 1  ;;  %v4737_v23 = vrot.slane %v4736_v41, 1  ;;  %v4711_v62 = vsel %vm4129_vm3, %v3813_v10, -inf }
 0x3b2   : > { %v4744_v15 = vrot.slane %v4743_v25, 1  ;;  %v4693_v47 = vrot.slane %v4692_v42, 2  ;;  %v4700_v31 = vrot.slane %v4699_v0, 2  ;;  %v4706_v29 = vmax.f32 %v4704_v7, %v4705_v53 }
 0x3b3   : > { %v4731_v43 = vmax.f32 %v4729_v9, %v4730_v27  ;;  %v4738_v52 = vmax.f32 %v4736_v41, %v4737_v23  ;;  %v13477_v46 = vsel %vm5026_vm4, %v4724_v5, -inf  ;;  %v4712_v39 = vrot.slane %v4711_v62, 4 }
 0x3b4   : > { %v4745_v3 = vmax.f32 %v4743_v25, %v4744_v15  ;;  %v4694_v21 = vmax.f32 %v4692_v42, %v4693_v47  ;;  %v4701_v16 = vmax.f32 %v4699_v0, %v4700_v31  ;;  %v4707_v48 = vrot.slane %v4706_v29, 2 }
 0x3b5   : > { %v13480_v60 = vsel %vm5026_vm4, %v4731_v43, -inf  ;;  %v13483_v38 = vsel %vm5026_vm4, %v4738_v52, -inf  ;;  %v4713_v44 = vmax.f32 %v4711_v62, %v4712_v39  ;;  %v3416_v56 = vmax.f32 %v13431_v12, 0.0 }
 0x3b6   : > { %v13487_v24 = vsel %vm5026_vm4, %v4745_v3, -inf  ;;  %v4695_v11 = vrot.slane %v4694_v21, 1  ;;  %v4702_v61 = vrot.slane %v4701_v16, 1  ;;  %v4708_v8 = vmax.f32 %v4706_v29, %v4707_v48 }
 0x3b7   : > { %v4714_v37 = vrot.slane %v4713_v44, 2  ;;  %v3848_v1 = vcombine.high %v3416_v56, %v3416_v56  ;;  %v3855_v35 = vrot.slane %v3416_v56, %v12846_v6  ;;  %v3415_v58 = vmax.f32 %v13435_v36, 0.0 }
 0x3b8   : > { %v4696_v10 = vmax.f32 %v4694_v21, %v4695_v11  ;;  %v4703_v63 = vmax.f32 %v4701_v16, %v4702_v61  ;;  %v4709_v2 = vrot.slane %v4708_v8, 1  ;;  %v13493_v14 = vadd.f32 %v13160_v40, %v14493_v57 }
 0x3b9   : > { %v4715_v12 = vmax.f32 %v4713_v44, %v4714_v37  ;;  %v3862_v18 = vrot.slane %v3848_v1, %v12846_v6  ;;  %v3863_v45 = vcombine.high %v3855_v35, %v3855_v35  ;;  %v4774_v17 = vsel %vm4129_vm3, %v3855_v35, -inf }
 0x3ba   : > { %v4710_v13 = vmax.f32 %v4708_v8, %v4709_v2  ;;  %v13498_v34 = vsel %vm5026_vm4, %v4696_v10, -inf  ;;  %v13501_v49 = vsel %vm5026_vm4, %v4703_v63, -inf  ;;  %v4775_v36 = vrot.slane %v4774_v17, 4 }
 0x3bb   : > { %v4716_v32 = vrot.slane %v4715_v12, 1  ;;  %v3864_v33 = vcombine.high %v3862_v18, %v3862_v18  ;;  %v4781_v20 = vsel %vm4129_vm3, %v3863_v45, -inf  ;;  %v4788_v40 = vsel %vm4129_vm3, %v3862_v18, -inf }
 0x3bc   : > { %v13506_v22 = vsel %vm5026_vm4, %v4710_v13, -inf  ;;  %v4776_v28 = vmax.f32 %v4774_v17, %v4775_v36  ;;  %v4782_v50 = vrot.slane %v4781_v20, 4  ;;  %v4789_v4 = vrot.slane %v4788_v40, 4 }
 0x3bd   : > { %v4717_v9 = vmax.f32 %v4715_v12, %v4716_v32  ;;  %v4795_v41 = vsel %vm4129_vm3, %v3864_v33, -inf  ;;  %v3831_v7 = vcombine.high %v3415_v58, %v3415_v58  ;;  %v3838_v25 = vrot.slane %v3415_v58, %v12846_v6 }
 0x3be   : > { %v4777_v42 = vrot.slane %v4776_v28, 2  ;;  %v4783_v0 = vmax.f32 %v4781_v20, %v4782_v50  ;;  %v4790_v53 = vmax.f32 %v4788_v40, %v4789_v4  ;;  %v4796_v5 = vrot.slane %v4795_v41, 4 }
 0x3bf   : > { %v13511_v27 = vsel %vm5026_vm4, %v4717_v9, -inf  ;;  %v3845_v23 = vrot.slane %v3831_v7, %v12846_v6  ;;  %v3846_v62 = vcombine.high %v3838_v25, %v3838_v25  ;;  %v4746_v15 = vsel %vm4129_vm3, %v3838_v25, -inf }
 0x3c0   : > { %v4778_v47 = vmax.f32 %v4776_v28, %v4777_v42  ;;  %v4784_v31 = vrot.slane %v4783_v0, 2  ;;  %v4791_v29 = vrot.slane %v4790_v53, 2  ;;  %v4797_v43 = vmax.f32 %v4795_v41, %v4796_v5  ;;  %v9281_v42 = vld [vmem:[%s14421_s4 + $0x60] sm:$0xff] }
 0x3c1   : > { %v3847_v52 = vcombine.high %v3845_v23, %v3845_v23  ;;  %v4747_v39 = vrot.slane %v4746_v15, 4  ;;  %v4753_v3 = vsel %vm4129_vm3, %v3846_v62, -inf  ;;  %v4760_v21 = vsel %vm4129_vm3, %v3845_v23, -inf  ;;  %v13545_v62 = vld [vmem:[%s14419_s2] ss:$0 sm:$0xff] }
 0x3c2   : > { %v4779_v16 = vrot.slane %v4778_v47, 1  ;;  %v4785_v48 = vmax.f32 %v4783_v0, %v4784_v31  ;;  %v4792_v44 = vmax.f32 %v4790_v53, %v4791_v29  ;;  %v4798_v56 = vrot.slane %v4797_v43, 2  ;;  %v9282_v0 = vld [vmem:[%s14421_s4 + $0x68] sm:$0xff] }
 0x3c3   : > { %v4748_v11 = vmax.f32 %v4746_v15, %v4747_v39  ;;  %v4754_v61 = vrot.slane %v4753_v3, 4  ;;  %v4761_v8 = vrot.slane %v4760_v21, 4  ;;  %v4767_v37 = vsel %vm4129_vm3, %v3847_v52, -inf }
 0x3c4   : > { %v4780_v1 = vmax.f32 %v4778_v47, %v4779_v16  ;;  %v4786_v35 = vrot.slane %v4785_v48, 1  ;;  %v4793_v58 = vrot.slane %v4792_v44, 1  ;;  %v4799_v10 = vmax.f32 %v4797_v43, %v4798_v56  ;;  %v14494_v43 = vld [vmem:[#allocation30_spill] sm:$0xff]  ;;  %v14495_v56 = vld [vmem:[#allocation31_spill] sm:$0xff] }
 0x3c5   : > { %v4749_v63 = vrot.slane %v4748_v11, 2  ;;  %v4755_v2 = vmax.f32 %v4753_v3, %v4754_v61  ;;  %v4762_v57 = vmax.f32 %v4760_v21, %v4761_v8  ;;  %v4768_v12 = vrot.slane %v4767_v37, 4  ;;  %v13556_v21 = vld [vmem:[%s14420_s3] ss:$0 sm:$0xff] }
 0x3c6   : > { %v4787_v18 = vmax.f32 %v4785_v48, %v4786_v35  ;;  %v4794_v45 = vmax.f32 %v4792_v44, %v4793_v58  ;;  %v4800_v17 = vrot.slane %v4799_v10, 1  ;;  %v13519_v13 = vsel %vm5026_vm4, %v4780_v1, -inf }
 0x3c7   : > { %v5161_v36 = vmax.f32 %v13477_v46, %v13519_v13  ;;  %v4750_v32 = vmax.f32 %v4748_v11, %v4749_v63  ;;  %v4756_v33 = vrot.slane %v4755_v2, 2  ;;  %v4763_v20 = vrot.slane %v4762_v57, 2 }
 0x3c8   : > { %v4801_v40 = vmax.f32 %v4799_v10, %v4800_v17  ;;  %v13524_v28 = vsel %vm5026_vm4, %v4787_v18, -inf  ;;  %v13527_v50 = vsel %vm5026_vm4, %v4794_v45, -inf  ;;  %v4769_v4 = vmax.f32 %v4767_v37, %v4768_v12  ;;  %v14496_v10 = vld [vmem:[#allocation32_spill] sm:$0xff] }
 0x3c9   : > { %v5164_v9 = vmax.f32 %v13480_v60, %v13524_v28  ;;  %v5167_v41 = vmax.f32 %v13483_v38, %v13527_v50  ;;  %v4751_v7 = vrot.slane %v4750_v32, 1  ;;  %v4757_v25 = vmax.f32 %v4755_v2, %v4756_v33 }
 0x3ca   : > { %v13540_v53 = vsel %vm5026_vm4, %v4801_v40, -inf  ;;  %v4764_v5 = vmax.f32 %v4762_v57, %v4763_v20  ;;  %v4770_v23 = vrot.slane %v4769_v4, 2  ;;  %v3347_v15 = vmul.f32 %v13545_v62, %v13493_v14 }
 0x3cb   : > { %v5170_v47 = vmax.f32 %v13487_v24, %v13540_v53  ;;  %v4752_v31 = vmax.f32 %v4750_v32, %v4751_v7  ;;  %v4758_v29 = vrot.slane %v4757_v25, 1  ;;  %v11011_v52 = vadd.f32 %v13200_v59, %v14494_v43 }
 0x3cc   : > { %v4765_v39 = vrot.slane %v4764_v5, 1  ;;  %v4771_v3 = vmax.f32 %v4769_v4, %v4770_v23  ;;  %v3386_v16 = vadd.f32 %v13556_v21, %v3347_v15  ;;  %v10786_v48 = vpack.c.bf16 %v9282_v0, %v9281_v42 }
 0x3cd   : > { %v4759_v44 = vmax.f32 %v4757_v25, %v4758_v29  ;;  %v5148_v14 = vsel %vm5026_vm4, %v4752_v31, -inf  ;;  %v3346_v24 = vmul.f32 %v13545_v62, %v11011_v52  ;;  %v11012_v11 = vadd.f32 %v13236_v30, %v14495_v56 }
 0x3ce   : > { %v4766_v61 = vmax.f32 %v4764_v5, %v4765_v39  ;;  %v4772_v59 = vrot.slane %v4771_v3, 1  ;;  %v5149_v8 = vmax.f32 %v13498_v34, %v5148_v14  ;;  %v3418_v37 = vmax.f32 %v3386_v16, 0.0  ;;  %10787 = vmatprep.subr.bf16.mxu1 %v10786_v48 }
 0x3cf   : > { %v5151_v1 = vsel %vm5026_vm4, %v4759_v44, -inf  ;;  %v3385_v35 = vadd.f32 %v13556_v21, %v3346_v24  ;;  %10789 = vmatpush3.bf16.msra.mxu1 %v10786_v48  ;;  %v3349_v58 = vmul.f32 %v13545_v62, %v11012_v11  ;;  %v11013_v63 = vadd.f32 %v13270_v54, %v14496_v10 }
 0x3d0   : > { %v4773_v2 = vmax.f32 %v4771_v3, %v4772_v59  ;;  %v5152_v57 = vmax.f32 %v13501_v49, %v5151_v1  ;;  %v5154_v30 = vsel %vm5026_vm4, %v4766_v61, -inf  ;;  %v3882_v12 = vcombine.high %v3418_v37, %v3418_v37 }
 0x3d1   : > { %v5155_v34 = vmax.f32 %v13506_v22, %v5154_v30  ;;  %v3889_v18 = vrot.slane %v3418_v37, %v12846_v6  ;;  %v3417_v45 = vmax.f32 %v3385_v35, 0.0  ;;  %v13574_v17 = vadd.f32 %v13556_v21, %v3349_v58 }
 0x3d2   : > { %v5157_v32 = vsel %vm5026_vm4, %v4773_v2, -inf  ;;  %v5345_v33 = vsel %vm5303_vm5, %v5152_v57, %v5149_v8  ;;  %v3896_v54 = vrot.slane %v3882_v12, %v12846_v6  ;;  %v13580_v20 = vmul.f32 %v13545_v62, %v11013_v63 }
 0x3d3   : > { %v5158_v49 = vmax.f32 %v13511_v27, %v5157_v32  ;;  %v5346_v40 = vsel %vm5305_vm6, %v5155_v34, %v5345_v33  ;;  %v3897_v22 = vcombine.high %v3889_v18, %v3889_v18  ;;  %v4830_v4 = vsel %vm4129_vm3, %v3889_v18, -inf }
 0x3d4   : > { %v3898_v7 = vcombine.high %v3896_v54, %v3896_v54  ;;  %v4831_v25 = vrot.slane %v4830_v4, 4  ;;  %v4844_v42 = vsel %vm4129_vm3, %v3896_v54, -inf  ;;  %v3865_v0 = vcombine.high %v3417_v45, %v3417_v45 }
 0x3d5   : > { %v5347_v53 = vsel %vm5307_vm7, %v5158_v49, %v5346_v40  ;;  %v4837_v5 = vsel %vm4129_vm3, %v3897_v22, -inf  ;;  %v4845_v23 = vrot.slane %v4844_v42, 4  ;;  %v3872_v15 = vrot.slane %v3417_v45, %v12846_v6 }
 0x3d6   : > { %v5348_v27 = vsel %vm5309_vm8, %v5161_v36, %v5347_v53  ;;  %v4832_v31 = vmax.f32 %v4830_v4, %v4831_v25  ;;  %v4838_v29 = vrot.slane %v4837_v5, 4  ;;  %v4851_v43 = vsel %vm4129_vm3, %v3898_v7, -inf }
 0x3d7   : > { %v5349_v52 = vsel %vm5311_vm9, %v5164_v9, %v5348_v27  ;;  %v4846_v39 = vmax.f32 %v4844_v42, %v4845_v23  ;;  %v4852_v3 = vrot.slane %v4851_v43, 4  ;;  %v3879_v16 = vrot.slane %v3865_v0, %v12846_v6  ;;  %v9284_v23 = vld [vmem:[%s14421_s4 + $0x78] sm:$0xff] }
 0x3d8   : > { %v5350_v46 = vsel %vm5313_vm10, %v5167_v41, %v5349_v52  ;;  %v4833_v13 = vrot.slane %v4832_v31, 2  ;;  %v4839_v36 = vmax.f32 %v4837_v5, %v4838_v29  ;;  %v3880_v48 = vcombine.high %v3872_v15, %v3872_v15  ;;  %v9283_v5 = vld [vmem:[%s14421_s4 + $0x70] sm:$0xff] }
 0x3d9   : > { %v5351_v44 = vsel %vm5315_vm11, %v5170_v47, %v5350_v46  ;;  %v4847_v14 = vrot.slane %v4846_v39, 2  ;;  %v4853_v24 = vmax.f32 %v4851_v43, %v4852_v3  ;;  %v3881_v56 = vcombine.high %v3879_v16, %v3879_v16 }
 0x3da   : > { %5380 = vst.msk [vmem:[#allocation3 + $0x61] sm:$0xff] %vm5026_vm4, %v5351_v44  ;;  %v4834_v60 = vmax.f32 %v4832_v31, %v4833_v13  ;;  %v4840_v28 = vrot.slane %v4839_v36, 2  ;;  %v4802_v9 = vsel %vm4129_vm3, %v3872_v15, -inf  ;;  %v4809_v11 = vsel %vm4129_vm3, %v3880_v48, -inf }
 0x3db   : > { %v4848_v61 = vmax.f32 %v4846_v39, %v4847_v14  ;;  %v4854_v38 = vrot.slane %v4853_v24, 2  ;;  %v4803_v50 = vrot.slane %v4802_v9, 4  ;;  %v4810_v41 = vrot.slane %v4809_v11, 4 }
 0x3dc   : > { %v4835_v59 = vrot.slane %v4834_v60, 1  ;;  %v4841_v8 = vmax.f32 %v4839_v36, %v4840_v28  ;;  %v4816_v37 = vsel %vm4129_vm3, %v3879_v16, -inf  ;;  %v4823_v47 = vsel %vm4129_vm3, %v3881_v56, -inf }
 0x3dd   : > { %v4849_v1 = vrot.slane %v4848_v61, 1  ;;  %v4855_v35 = vmax.f32 %v4853_v24, %v4854_v38  ;;  %v4804_v58 = vmax.f32 %v4802_v9, %v4803_v50  ;;  %v4811_v10 = vmax.f32 %v4809_v11, %v4810_v41  ;;  %v13639_v38 = vld [vmem:[#allocation3 + $0x20] sm:$0xff] }
 0x3de   : > { %v4836_v63 = vmax.f32 %v4834_v60, %v4835_v59  ;;  %v4842_v2 = vrot.slane %v4841_v8, 1  ;;  %v4817_v57 = vrot.slane %v4816_v37, 4  ;;  %v4824_v30 = vrot.slane %v4823_v47, 4 }
 0x3df   : > { %v4850_v12 = vmax.f32 %v4848_v61, %v4849_v1  ;;  %v4856_v34 = vrot.slane %v4855_v35, 1  ;;  %v4805_v18 = vrot.slane %v4804_v58, 2  ;;  %v4812_v45 = vrot.slane %v4811_v10, 2 }
 0x3e0   : > { %v4843_v32 = vmax.f32 %v4841_v8, %v4842_v2  ;;  %v13610_v33 = vsel %vm5026_vm4, %v4836_v63, -inf  ;;  %v4818_v54 = vmax.f32 %v4816_v37, %v4817_v57  ;;  %v4825_v49 = vmax.f32 %v4823_v47, %v4824_v30  ;;  %v13645_v37 = vld [vmem:[#allocation3 + $0x30] sm:$0xff] }
 0x3e1   : > { %v4857_v40 = vmax.f32 %v4855_v35, %v4856_v34  ;;  %v13613_v22 = vsel %vm5026_vm4, %v4850_v12, -inf  ;;  %v4806_v4 = vmax.f32 %v4804_v58, %v4805_v18  ;;  %v4813_v7 = vmax.f32 %v4811_v10, %v4812_v45  ;;  %v13659_v45 = vld [vmem:[#allocation3 + $0x40] sm:$0xff] }
 0x3e2   : > { %v13616_v25 = vsel %vm5026_vm4, %v4843_v32, -inf  ;;  %v4819_v42 = vrot.slane %v4818_v54, 2  ;;  %v4826_v0 = vrot.slane %v4825_v49, 2  ;;  %v3420_v53 = vmax.f32 %v13574_v17, 0.0 }
 0x3e3   : > { %v13626_v15 = vsel %vm5026_vm4, %v4857_v40, -inf  ;;  %v4807_v27 = vrot.slane %v4806_v4, 1  ;;  %v4814_v31 = vrot.slane %v4813_v7, 1  ;;  %v3387_v29 = vadd.f32 %v13556_v21, %v13580_v20 }
 0x3e4   : > { %v4820_v43 = vmax.f32 %v4818_v54, %v4819_v42  ;;  %v4827_v52 = vmax.f32 %v4825_v49, %v4826_v0  ;;  %v3916_v39 = vcombine.high %v3420_v53, %v3420_v53  ;;  %v3923_v17 = vrot.slane %v3420_v53, %v12846_v6 }
 0x3e5   : > { %v4808_v3 = vmax.f32 %v4806_v4, %v4807_v27  ;;  %v4815_v16 = vmax.f32 %v4813_v7, %v4814_v31  ;;  %v3419_v46 = vmax.f32 %v3387_v29, 0.0  ;;  %v10790_v13 = vpack.c.bf16 %v9284_v23, %v9283_v5  ;;  %v13663_v4 = vld [vmem:[#allocation3 + $0x50] sm:$0xff] }
 0x3e6   : > { %v4821_v36 = vrot.slane %v4820_v43, 1  ;;  %v4828_v48 = vrot.slane %v4827_v52, 1  ;;  %v3930_v44 = vrot.slane %v3916_v39, %v12846_v6  ;;  %v3931_v14 = vcombine.high %v3923_v17, %v3923_v17 }
 0x3e7   : > { %v13633_v24 = vsel %vm5026_vm4, %v4808_v3, -inf  ;;  %v13636_v56 = vsel %vm5026_vm4, %v4815_v16, -inf  ;;  %v4886_v20 = vsel %vm4129_vm3, %v3923_v17, -inf  ;;  %v3899_v60 = vcombine.high %v3419_v46, %v3419_v46  ;;  %10791 = vmatprep.subr.bf16.mxu1 %v10790_v13  ;;  %v13670_v17 = vld [vmem:[#allocation3 + $0x60] sm:$0xff] }
 0x3e8   : > { %v4822_v28 = vmax.f32 %v4820_v43, %v4821_v36  ;;  %v4829_v9 = vmax.f32 %v4827_v52, %v4828_v48  ;;  %v3932_v11 = vcombine.high %v3930_v44, %v3930_v44  ;;  %v4887_v61 = vrot.slane %v4886_v20, 4  ;;  %10793 = vmatpush3.bf16.msra.mxu1 %v10790_v13 }
 0x3e9   : > { %v4893_v50 = vsel %vm4129_vm3, %v3931_v14, -inf  ;;  %v4900_v41 = vsel %vm4129_vm3, %v3930_v44, -inf  ;;  %v3906_v59 = vrot.slane %v3419_v46, %v12846_v6  ;;  %v3913_v8 = vrot.slane %v3899_v60, %v12846_v6 }
 0x3ea   : > { %v13648_v47 = vsel %vm5026_vm4, %v4822_v28, -inf  ;;  %v13651_v1 = vsel %vm5026_vm4, %v4829_v9, -inf  ;;  %v4888_v35 = vmax.f32 %v4886_v20, %v4887_v61  ;;  %v4894_v58 = vrot.slane %v4893_v50, 4 }
 0x3eb   : > { %v4901_v10 = vrot.slane %v4900_v41, 4  ;;  %v4907_v63 = vsel %vm4129_vm3, %v3932_v11, -inf  ;;  %v3914_v2 = vcombine.high %v3906_v59, %v3906_v59  ;;  %v3915_v57 = vcombine.high %v3913_v8, %v3913_v8  ;;  %10417 = vmatmul.mubr.msk.f32.vlgmr.msra.gmra.mrb[32].mxu1 %vm5026_vm4, %v13639_v38 }
 0x3ec   : > { %v4889_v30 = vrot.slane %v4888_v35, 2  ;;  %v4895_v12 = vmax.f32 %v4893_v50, %v4894_v58  ;;  %v4908_v34 = vrot.slane %v4907_v63, 4  ;;  %v4858_v18 = vsel %vm4129_vm3, %v3906_v59, -inf  ;;  %10419 = vmatprep.mubr.msk.f32.mxu1 %vm5026_vm4, %v13645_v37 }
 0x3ed   : > { %v4902_v32 = vmax.f32 %v4900_v41, %v4901_v10  ;;  %v4859_v54 = vrot.slane %v4858_v18, 4  ;;  %v4865_v49 = vsel %vm4129_vm3, %v3914_v2, -inf  ;;  %v4872_v40 = vsel %vm4129_vm3, %v3913_v8, -inf }
 0x3ee   : > { %v4890_v7 = vmax.f32 %v4888_v35, %v4889_v30  ;;  %v4896_v42 = vrot.slane %v4895_v12, 2  ;;  %v4909_v0 = vmax.f32 %v4907_v63, %v4908_v34  ;;  %v4866_v53 = vrot.slane %v4865_v49, 4 }
 0x3ef   : > { %v4903_v5 = vrot.slane %v4902_v32, 2  ;;  %v4860_v23 = vmax.f32 %v4858_v18, %v4859_v54  ;;  %v4873_v27 = vrot.slane %v4872_v40, 4  ;;  %v4879_v31 = vsel %vm4129_vm3, %v3915_v57, -inf  ;;  %10420 = vmatmul.mubr.msk.f32.gmra.mrb[34].mxu1 %vm5026_vm4, %v13659_v45 }
 0x3f0   : > { %v4891_v29 = vrot.slane %v4890_v7, 1  ;;  %v4897_v43 = vmax.f32 %v4895_v12, %v4896_v42  ;;  %v4910_v52 = vrot.slane %v4909_v0, 2  ;;  %v4867_v39 = vmax.f32 %v4865_v49, %v4866_v53  ;;  %10422 = vmatprep.mubr.msk.f32.mxu1 %vm5026_vm4, %v13663_v4 }
 0x3f1   : > { %v4904_v3 = vmax.f32 %v4902_v32, %v4903_v5  ;;  %v4861_v16 = vrot.slane %v4860_v23, 2  ;;  %v4874_v46 = vmax.f32 %v4872_v40, %v4873_v27  ;;  %v4880_v13 = vrot.slane %v4879_v31, 4  ;;  %v14498_v27 = vld [vmem:[#allocation34_spill] sm:$0xff] }
 0x3f2   : > { %v4892_v36 = vmax.f32 %v4890_v7, %v4891_v29  ;;  %v4898_v48 = vrot.slane %v4897_v43, 1  ;;  %v4911_v44 = vmax.f32 %v4909_v0, %v4910_v52  ;;  %v4868_v14 = vrot.slane %v4867_v39, 2  ;;  %v14497_v0 = vld [vmem:[#allocation33_spill] sm:$0xff] }
 0x3f3   : > { %v4905_v20 = vrot.slane %v4904_v3, 1  ;;  %v4862_v60 = vmax.f32 %v4860_v23, %v4861_v16  ;;  %v4875_v28 = vrot.slane %v4874_v46, 2  ;;  %v4881_v9 = vmax.f32 %v4879_v31, %v4880_v13  ;;  %10423 = vmatmul.mubr.msk.f32.gmra.mrb[36].mxu1 %vm5026_vm4, %v13670_v17  ;;  %v5393_v31 = vld [vmem:[%s14421_s4] sm:$0xff]  ;;  %v14500_v16 = vld [vmem:[#allocation36_spill] sm:$0xff] }
 0x3f4   : > { %v4899_v11 = vmax.f32 %v4897_v43, %v4898_v48  ;;  %v4912_v61 = vrot.slane %v4911_v44, 1  ;;  %v13675_v50 = vsel %vm5026_vm4, %v4892_v36, -inf  ;;  %v4869_v41 = vmax.f32 %v4867_v39, %v4868_v14  ;;  %v5395_v13 = vld [vmem:[%s14421_s4 + $0x10] sm:$0xff] }
 0x3f5   : > { %v4906_v59 = vmax.f32 %v4904_v3, %v4905_v20  ;;  %v5185_v8 = vmax.f32 %v13610_v33, %v13675_v50  ;;  %v4863_v35 = vrot.slane %v4862_v60, 1  ;;  %v4876_v58 = vmax.f32 %v4874_v46, %v4875_v28  ;;  %v9302_v28 = vld [vmem:[%s14421_s4 + $0xc8] sm:$0xff] }
 0x3f6   : > { %v4913_v10 = vmax.f32 %v4911_v44, %v4912_v61  ;;  %v5187_v63 = vsel %vm5026_vm4, %v4899_v11, -inf  ;;  %v4870_v2 = vrot.slane %v4869_v41, 1  ;;  %v4882_v57 = vrot.slane %v4881_v9, 2 }
 0x3f7   : > { %v5188_v30 = vmax.f32 %v13616_v25, %v5187_v63  ;;  %v5190_v12 = vsel %vm5026_vm4, %v4906_v59, -inf  ;;  %v4864_v34 = vmax.f32 %v4862_v60, %v4863_v35  ;;  %v4877_v18 = vrot.slane %v4876_v58, 1  ;;  %v9301_v60 = vld [vmem:[%s14421_s4 + $0xc0] sm:$0xff] }
 0x3f8   : > { %v5191_v32 = vmax.f32 %v13613_v22, %v5190_v12  ;;  %v5193_v54 = vsel %vm5026_vm4, %v4913_v10, -inf  ;;  %v4871_v49 = vmax.f32 %v4869_v41, %v4870_v2  ;;  %v4883_v40 = vmax.f32 %v4881_v9, %v4882_v57 }
 0x3f9   : > { %v5194_v33 = vmax.f32 %v13626_v15, %v5193_v54  ;;  %v4878_v7 = vmax.f32 %v4876_v58, %v4877_v18  ;;  %v5172_v42 = vsel %vm5026_vm4, %v4864_v34, -inf  ;;  %v11014_v53 = vadd.f32 %v13296_v55, %v14497_v0  ;;  %v5394_v15 = vld [vmem:[%s14421_s4 + $0x8] sm:$0xff] }
 0x3fa   : > { %v4884_v5 = vrot.slane %v4883_v40, 1  ;;  %v5173_v25 = vmax.f32 %v13633_v24, %v5172_v42  ;;  %v5175_v23 = vsel %vm5026_vm4, %v4871_v49, -inf  ;;  %v11015_v22 = vadd.f32 %v13328_v19, %v14498_v27  ;;  %v14499_v24 = vld [vmem:[#allocation35_spill] sm:$0xff] }
 0x3fb   : > { %v5176_v29 = vmax.f32 %v13636_v56, %v5175_v23  ;;  %v5178_v55 = vsel %vm5026_vm4, %v4878_v7, -inf  ;;  %v3351_v43 = vmul.f32 %v13545_v62, %v11014_v53  ;;  %v11016_v52 = vadd.f32 %v13345_v51, %v14499_v24  ;;  %v5396_v56 = vld [vmem:[%s14421_s4 + $0x18] sm:$0xff] }
 0x3fc   : > { %v4885_v39 = vmax.f32 %v4883_v40, %v4884_v5  ;;  %v5179_v19 = vmax.f32 %v13648_v47, %v5178_v55  ;;  %v3350_v3 = vmul.f32 %v13545_v62, %v11015_v22  ;;  %v11017_v46 = vadd.f32 %v13375_v26, %v14500_v16 }
 0x3fd   : > { %v5352_v36 = vsel %vm5303_vm5, %v5176_v29, %v5173_v25  ;;  %v3390_v51 = vadd.f32 %v13556_v21, %v3351_v43  ;;  %v3353_v48 = vmul.f32 %v13545_v62, %v11016_v52  ;;  %v10794_v47 = vpack.c.bf16 %v5394_v15, %v5393_v31 }
 0x3fe   : > { %v5181_v44 = vsel %vm5026_vm4, %v4885_v39, -inf  ;;  %v5353_v14 = vsel %vm5305_vm6, %v5179_v19, %v5352_v36  ;;  %v3389_v26 = vadd.f32 %v13556_v21, %v3350_v3  ;;  %v3352_v20 = vmul.f32 %v13545_v62, %v11017_v46 }
 0x3ff   : > { %v5182_v9 = vmax.f32 %v13651_v1, %v5181_v44  ;;  %v3422_v11 = vmax.f32 %v3390_v51, 0.0  ;;  %v3392_v61 = vadd.f32 %v13556_v21, %v3353_v48  ;;  %10795 = vmatprep.subr.bf16.mxu1 %v10794_v47  ;;  %v10798_v50 = vpack.c.bf16 %v5396_v56, %v5395_v13 }
 0x400   : > { %v3421_v41 = vmax.f32 %v3389_v26, 0.0  ;;  %v13729_v59 = vadd.f32 %v13556_v21, %v3352_v20  ;;  %10797 = vmatpush3.bf16.msra.mxu1 %v10794_v47  ;;  %v13733_v10 = vpack.c.bf16 %v9302_v28, %v9301_v60 }
 0x401   : > { %v5354_v62 = vsel %vm5307_vm7, %v5182_v9, %v5353_v14  ;;  %v3950_v35 = vcombine.high %v3422_v11, %v3422_v11  ;;  %v3957_v58 = vrot.slane %v3422_v11, %v12846_v6  ;;  %10799 = vmatprep.subr.bf16.mxu1 %v10798_v50  ;;  %v13737_v57 = vmax.f32 %v3392_v61, 0.0 }
 0x402   : > { %v5355_v1 = vsel %vm5309_vm8, %v5185_v8, %v5354_v62  ;;  %v3933_v63 = vcombine.high %v3421_v41, %v3421_v41  ;;  %v3940_v2 = vrot.slane %v3421_v41, %v12846_v6 }
 0x403   : > { %v5356_v12 = vsel %vm5311_vm9, %v5188_v30, %v5355_v1  ;;  %v3964_v21 = vrot.slane %v3950_v35, %v12846_v6  ;;  %v3965_v34 = vcombine.high %v3957_v58, %v3957_v58  ;;  %v4942_v18 = vsel %vm4129_vm3, %v3957_v58, -inf }
 0x404   : > { %v5357_v54 = vsel %vm5313_vm10, %v5191_v32, %v5356_v12  ;;  %v4943_v49 = vrot.slane %v4942_v18, 4  ;;  %v3947_v40 = vrot.slane %v3933_v63, %v12846_v6  ;;  %v3948_v7 = vcombine.high %v3940_v2, %v3940_v2  ;;  %10801 = vmatpush3.bf16.msra.mxu1 %v10798_v50 }
 0x405   : > { %v5358_v8 = vsel %vm5315_vm11, %v5194_v33, %v5357_v54  ;;  %v3966_v42 = vcombine.high %v3964_v21, %v3964_v21  ;;  %v4949_v0 = vsel %vm4129_vm3, %v3965_v34, -inf  ;;  %v4956_v53 = vsel %vm4129_vm3, %v3964_v21, -inf  ;;  %10803 = vmatprep.subr.bf16.mxu1 %v13733_v10 }
 0x406   : > { %5381 = vst.msk [vmem:[#allocation3 + $0x71] sm:$0xff] %vm5026_vm4, %v5358_v8  ;;  %v4944_v30 = vmax.f32 %v4942_v18, %v4943_v49  ;;  %v4950_v5 = vrot.slane %v4949_v0, 4  ;;  %v4957_v25 = vrot.slane %v4956_v53, 4  ;;  %v3949_v32 = vcombine.high %v3947_v40, %v3947_v40 }
 0x407   : > { %v4963_v23 = vsel %vm4129_vm3, %v3966_v42, -inf  ;;  %v4914_v27 = vsel %vm4129_vm3, %v3940_v2, -inf  ;;  %v4921_v22 = vsel %vm4129_vm3, %v3948_v7, -inf  ;;  %v4928_v33 = vsel %vm4129_vm3, %v3947_v40, -inf }
 0x408   : > { %v4945_v31 = vrot.slane %v4944_v30, 2  ;;  %v4951_v15 = vmax.f32 %v4949_v0, %v4950_v5  ;;  %v4958_v29 = vmax.f32 %v4956_v53, %v4957_v25  ;;  %v4964_v55 = vrot.slane %v4963_v23, 4 }
 0x409   : > { %v4915_v43 = vrot.slane %v4914_v27, 4  ;;  %v4922_v24 = vrot.slane %v4921_v22, 4  ;;  %v4929_v52 = vrot.slane %v4928_v33, 4  ;;  %v4935_v39 = vsel %vm4129_vm3, %v3949_v32, -inf }
 0x40a   : > { %v4946_v19 = vmax.f32 %v4944_v30, %v4945_v31  ;;  %v4952_v3 = vrot.slane %v4951_v15, 2  ;;  %v4959_v16 = vrot.slane %v4958_v29, 2  ;;  %v4965_v46 = vmax.f32 %v4963_v23, %v4964_v55 }
 0x40b   : > { %v4916_v13 = vmax.f32 %v4914_v27, %v4915_v43  ;;  %v4923_v56 = vmax.f32 %v4921_v22, %v4922_v24  ;;  %v4930_v36 = vmax.f32 %v4928_v33, %v4929_v52  ;;  %v4936_v51 = vrot.slane %v4935_v39, 4 }
 0x40c   : > { %v4947_v48 = vrot.slane %v4946_v19, 1  ;;  %v4953_v47 = vmax.f32 %v4951_v15, %v4952_v3  ;;  %v4960_v44 = vmax.f32 %v4958_v29, %v4959_v16  ;;  %v4966_v14 = vrot.slane %v4965_v46, 2 }
 0x40d   : > { %v4917_v26 = vrot.slane %v4916_v13, 2  ;;  %v4924_v20 = vrot.slane %v4923_v56, 2  ;;  %v4931_v60 = vrot.slane %v4930_v36, 2  ;;  %v4937_v28 = vmax.f32 %v4935_v39, %v4936_v51  ;;  %v13754_v9 = vld [vmem:[#allocation3 + $0x70] sm:$0xff] }
 0x40e   : > { %v4948_v11 = vmax.f32 %v4946_v19, %v4947_v48  ;;  %v4954_v61 = vrot.slane %v4953_v47, 1  ;;  %v4961_v50 = vrot.slane %v4960_v44, 1  ;;  %v4967_v41 = vmax.f32 %v4965_v46, %v4966_v14  ;;  %10425 = vmatprep.mubr.msk.f32.mxu1 %vm5026_vm4, %v13754_v9 }
 0x40f   : > { %v4918_v62 = vmax.f32 %v4916_v13, %v4917_v26  ;;  %v4925_v35 = vmax.f32 %v4923_v56, %v4924_v20  ;;  %v4932_v58 = vmax.f32 %v4930_v36, %v4931_v60  ;;  %v4938_v1 = vrot.slane %v4937_v28, 2 }
 0x410   : > { %v4955_v63 = vmax.f32 %v4953_v47, %v4954_v61  ;;  %v4968_v2 = vrot.slane %v4967_v41, 1  ;;  %v3423_v12 = vmax.f32 %v13729_v59, 0.0  ;;  %v4962_v21 = vmax.f32 %v4960_v44, %v4961_v50 }
 0x411   : > { %v4919_v34 = vrot.slane %v4918_v62, 1  ;;  %v4926_v18 = vrot.slane %v4925_v35, 1  ;;  %v4933_v54 = vrot.slane %v4932_v58, 1  ;;  %v3984_v49 = vcombine.high %v13737_v57, %v13737_v57 }
 0x412   : > { %v4969_v40 = vmax.f32 %v4967_v41, %v4968_v2  ;;  %v13762_v7 = vsel %vm5026_vm4, %v4948_v11, -inf  ;;  %v13764_v8 = vmax.f32 %v4937_v28, %v4938_v1  ;;  %v13767_v42 = vsel %vm5026_vm4, %v4955_v63, -inf }
 0x413   : > { %v3991_v0 = vrot.slane %v13737_v57, %v12846_v6  ;;  %v3998_v59 = vrot.slane %v3984_v49, %v12846_v6  ;;  %v3967_v53 = vcombine.high %v3423_v12, %v3423_v12  ;;  %v13773_v30 = vsel %vm5026_vm4, %v4962_v21, -inf }
 0x414   : > { %v13775_v5 = vmax.f32 %v4918_v62, %v4919_v34  ;;  %v13777_v25 = vmax.f32 %v4925_v35, %v4926_v18  ;;  %v13779_v32 = vmax.f32 %v4932_v58, %v4933_v54  ;;  %v4940_v57 = vrot.slane %v13764_v8, 1 }
 0x415   : > { %v3999_v23 = vcombine.high %v3991_v0, %v3991_v0  ;;  %v4000_v27 = vcombine.high %v3998_v59, %v3998_v59  ;;  %v4998_v22 = vsel %vm4129_vm3, %v3991_v0, -inf  ;;  %v5012_v33 = vsel %vm4129_vm3, %v3998_v59, -inf }
 0x416   : > { %v4999_v31 = vrot.slane %v4998_v22, 4  ;;  %v5013_v15 = vrot.slane %v5012_v33, 4  ;;  %v3974_v29 = vrot.slane %v3423_v12, %v12846_v6  ;;  %v13786_v55 = vsel %vm5026_vm4, %v4969_v40, -inf }
 0x417   : > { %v5005_v43 = vsel %vm4129_vm3, %v3999_v23, -inf  ;;  %v5019_v24 = vsel %vm4129_vm3, %v4000_v27, -inf  ;;  %v3981_v52 = vrot.slane %v3967_v53, %v12846_v6 }
 0x418   : > { %v5000_v39 = vmax.f32 %v4998_v22, %v4999_v31  ;;  %v5006_v19 = vrot.slane %v5005_v43, 4  ;;  %v5014_v3 = vmax.f32 %v5012_v33, %v5013_v15  ;;  %v5020_v16 = vrot.slane %v5019_v24, 4 }
 0x419   : > { %v3982_v46 = vcombine.high %v3974_v29, %v3974_v29  ;;  %v3983_v13 = vcombine.high %v3981_v52, %v3981_v52  ;;  %v4970_v56 = vsel %vm4129_vm3, %v3974_v29, -inf  ;;  %v4984_v36 = vsel %vm4129_vm3, %v3981_v52, -inf }
 0x41a   : > { %v5001_v51 = vrot.slane %v5000_v39, 2  ;;  %v5007_v48 = vmax.f32 %v5005_v43, %v5006_v19  ;;  %v5015_v47 = vrot.slane %v5014_v3, 2  ;;  %v5021_v44 = vmax.f32 %v5019_v24, %v5020_v16 }
 0x41b   : > { %v4971_v14 = vrot.slane %v4970_v56, 4  ;;  %v4977_v26 = vsel %vm4129_vm3, %v3982_v46, -inf  ;;  %v4985_v20 = vrot.slane %v4984_v36, 4  ;;  %v4991_v60 = vsel %vm4129_vm3, %v3983_v13, -inf }
 0x41c   : > { %v5002_v28 = vmax.f32 %v5000_v39, %v5001_v51  ;;  %v5008_v11 = vrot.slane %v5007_v48, 2  ;;  %v5016_v61 = vmax.f32 %v5014_v3, %v5015_v47  ;;  %v5022_v50 = vrot.slane %v5021_v44, 2 }
 0x41d   : > { %v4972_v41 = vmax.f32 %v4970_v56, %v4971_v14  ;;  %v4978_v62 = vrot.slane %v4977_v26, 4  ;;  %v4986_v35 = vmax.f32 %v4984_v36, %v4985_v20  ;;  %v4992_v58 = vrot.slane %v4991_v60, 4 }
 0x41e   : > { %v5003_v1 = vrot.slane %v5002_v28, 1  ;;  %v5009_v63 = vmax.f32 %v5007_v48, %v5008_v11  ;;  %v5017_v2 = vrot.slane %v5016_v61, 1  ;;  %v5023_v12 = vmax.f32 %v5021_v44, %v5022_v50 }
 0x41f   : > { %v4973_v21 = vrot.slane %v4972_v41, 2  ;;  %v4979_v34 = vmax.f32 %v4977_v26, %v4978_v62  ;;  %v4987_v18 = vrot.slane %v4986_v35, 2  ;;  %v4993_v54 = vmax.f32 %v4991_v60, %v4992_v58 }
 0x420   : > { %v5004_v49 = vmax.f32 %v5002_v28, %v5003_v1  ;;  %v5010_v40 = vrot.slane %v5009_v63, 1  ;;  %v5018_v0 = vmax.f32 %v5016_v61, %v5017_v2  ;;  %v5024_v59 = vrot.slane %v5023_v12, 1  ;;  %v5383_v1 = vld [vmem:[#allocation3] sm:$0xff] }
 0x421   : > { %v4974_v53 = vmax.f32 %v4972_v41, %v4973_v21  ;;  %v4980_v23 = vrot.slane %v4979_v34, 2  ;;  %v4988_v27 = vmax.f32 %v4986_v35, %v4987_v18  ;;  %v4994_v22 = vrot.slane %v4993_v54, 2  ;;  %v9303_v2 = vld [vmem:[%s14421_s4 + $0xd0] sm:$0xff]  ;;  %v9314_v18 = vld [vmem:[%s14421_s4 + $0x28] sm:$0xff] }
 0x422   : > { %v5011_v33 = vmax.f32 %v5009_v63, %v5010_v40  ;;  %v5025_v31 = vmax.f32 %v5023_v12, %v5024_v59  ;;  %v5208_v15 = vsel %vm5026_vm4, %v5004_v49, -inf  ;;  %v5214_v29 = vsel %vm5026_vm4, %v5018_v0, -inf  ;;  %v9304_v12 = vld [vmem:[%s14421_s4 + $0xd8] sm:$0xff]  ;;  %v9325_v59 = vld [vmem:[%s14421_s4 + $0x80] sm:$0xff] }
 0x423   : > { %v5209_v43 = vmax.f32 %v13762_v7, %v5208_v15  ;;  %v5215_v24 = vmax.f32 %v13773_v30, %v5214_v29  ;;  %v4975_v52 = vrot.slane %v4974_v53, 1  ;;  %v4981_v39 = vmax.f32 %v4979_v34, %v4980_v23  ;;  %v9313_v34 = vld [vmem:[%s14421_s4 + $0x20] sm:$0xff]  ;;  %v9316_v40 = vld [vmem:[%s14421_s4 + $0x38] sm:$0xff] }
 0x424   : > { %v5211_v19 = vsel %vm5026_vm4, %v5011_v33, -inf  ;;  %v5217_v3 = vsel %vm5026_vm4, %v5025_v31, -inf  ;;  %v4989_v16 = vrot.slane %v4988_v27, 1  ;;  %v4995_v46 = vmax.f32 %v4993_v54, %v4994_v22  ;;  %v11434_v54 = vld [vmem:[#allocation3 + $0x10] sm:$0xff]  ;;  %v9338_v22 = vld [vmem:[%s14421_s4 + $0xe8] sm:$0xff]  ;;  %v5762_v33 = vld [vmem:[#allocation3 + $0x21] sm:$0xff] }
 0x425   : > { %v5212_v13 = vmax.f32 %v13767_v42, %v5211_v19  ;;  %v5218_v56 = vmax.f32 %v13786_v55, %v5217_v3  ;;  %v4976_v36 = vmax.f32 %v4974_v53, %v4975_v52  ;;  %v4982_v51 = vrot.slane %v4981_v39, 1  ;;  %v9326_v53 = vld [vmem:[%s14421_s4 + $0x88] sm:$0xff]  ;;  %v5764_v29 = vld [vmem:[#allocation3 + $0x41] sm:$0xff] }
 0x426   : > { %v4941_v7 = vmax.f32 %v13764_v8, %v4940_v57  ;;  %v4990_v48 = vmax.f32 %v4988_v27, %v4989_v16  ;;  %v4996_v30 = vrot.slane %v4995_v46, 1  ;;  %v5195_v47 = vsel %vm5026_vm4, %v13775_v5, -inf  ;;  %v5761_v27 = vld [vmem:[#allocation3 + $0x11] sm:$0xff]  ;;  %v9340_v19 = vld [vmem:[%s14421_s4 + $0xf8] sm:$0xff] }
 0x427   : > { %v4983_v44 = vmax.f32 %v4981_v39, %v4982_v51  ;;  %v5196_v14 = vsel %vm5026_vm4, %v4976_v36, -inf  ;;  %v5201_v26 = vsel %vm5026_vm4, %v13779_v32, -inf  ;;  %v5198_v60 = vsel %vm5026_vm4, %v13777_v25, -inf  ;;  %v5763_v15 = vld [vmem:[#allocation3 + $0x31] sm:$0xff]  ;;  %v9339_v39 = vld [vmem:[%s14421_s4 + $0xf0] sm:$0xff]  ;;  %v9352_v51 = vld [vmem:[%s14421_s4 + $0x58] sm:$0xff] }
 0x428   : > { %v4997_v42 = vmax.f32 %v4995_v46, %v4996_v30  ;;  %v5197_v20 = vmax.f32 %v5195_v47, %v5196_v14  ;;  %v5202_v55 = vsel %vm5026_vm4, %v4990_v48, -inf  ;;  %v5204_v28 = vsel %vm5026_vm4, %v4941_v7, -inf  ;;  %v5767_v52 = vld [vmem:[#allocation3 + $0x71] sm:$0xff]  ;;  %v9351_v36 = vld [vmem:[%s14421_s4 + $0x50] sm:$0xff] }
 0x429   : > { %v5199_v8 = vsel %vm5026_vm4, %v4983_v44, -inf  ;;  %v5203_v57 = vmax.f32 %v5201_v26, %v5202_v55  ;;  %v10806_v21 = vpack.c.bf16 %v9304_v12, %v9303_v2  ;;  %v10810_v49 = vpack.c.bf16 %v9314_v18, %v9313_v34  ;;  %v9349_v16 = vld [vmem:[%s14421_s4 + $0x40] sm:$0xff]  ;;  %v9350_v46 = vld [vmem:[%s14421_s4 + $0x48] sm:$0xff]  ;;  %v6154_v14 = vld [vmem:[#allocation3 + $0x2] sm:$0xff] }
 0x42a   : > { %v5200_v11 = vmax.f32 %v5198_v60, %v5199_v8  ;;  %v5205_v5 = vsel %vm5026_vm4, %v4997_v42, -inf  ;;  %v10818_v23 = vpack.c.bf16 %v9326_v53, %v9325_v59  ;;  %v10830_v3 = vpack.c.bf16 %v9340_v19, %v9339_v39  ;;  %v9361_v48 = vld [vmem:[%s14421_s4 + $0xa0] sm:$0xff]  ;;  %v9362_v30 = vld [vmem:[%s14421_s4 + $0xa8] sm:$0xff]  ;;  %v9363_v26 = vld [vmem:[%s14421_s4 + $0xb0] sm:$0xff] }
 0x42b   : > { %v5206_v61 = vmax.f32 %v5204_v28, %v5205_v5  ;;  %v10838_v7 = vpack.c.bf16 %v9352_v51, %v9351_v36  ;;  %v10842_v47 = vpack.c.bf16 %v9362_v30, %v9361_v48  ;;  %v5769_v44 = vld [vmem:[#allocation3 + $0x91] sm:$0xff]  ;;  %v9364_v42 = vld [vmem:[%s14421_s4 + $0xb8] sm:$0xff]  ;;  %v9389_v12 = vld [vmem:[%s14424_s7 + $0x70] sm:$0xff] }
 0x42c   : > { %v5359_v50 = vsel %vm5303_vm5, %v5200_v11, %v5197_v20  ;;  %v10846_v20 = vpack.c.bf16 %v9364_v42, %v9363_v26  ;;  %v6155_v55 = vld [vmem:[#allocation3 + $0x12] sm:$0xff]  ;;  %v6158_v5 = vld [vmem:[#allocation3 + $0x42] sm:$0xff]  ;;  %v14024_v59 = vld [vmem:[%s14423_s6] ss:$0 sm:$0xff] }
 0x42d   : > { %v5360_v32 = vsel %vm5305_vm6, %v5203_v57, %v5359_v50  ;;  %v9373_v60 = vld [vmem:[%s14421_s4 + $0x100] sm:$0xff]  ;;  %v9374_v8 = vld [vmem:[%s14421_s4 + $0x108] sm:$0xff]  ;;  %v6156_v57 = vld [vmem:[#allocation3 + $0x22] sm:$0xff] }
 0x42e   : > { %v5361_v41 = vsel %vm5307_vm7, %v5206_v61, %v5360_v32  ;;  %v10850_v28 = vpack.c.bf16 %v9374_v8, %v9373_v60  ;;  %v6157_v11 = vld [vmem:[#allocation3 + $0x32] sm:$0xff]  ;;  %v6160_v50 = vld [vmem:[#allocation3 + $0x62] sm:$0xff] }
 0x42f   : > { %v5362_v62 = vsel %vm5309_vm8, %v5209_v43, %v5361_v41  ;;  %v5765_v43 = vld [vmem:[#allocation3 + $0x51] sm:$0xff]  ;;  %v9375_v41 = vld [vmem:[%s14421_s4 + $0x110] sm:$0xff]  ;;  %v9390_v34 = vld [vmem:[%s14424_s7 + $0x78] sm:$0xff] }
 0x430   : > { %v5363_v35 = vsel %vm5311_vm9, %v5212_v13, %v5362_v62  ;;  %v10834_v13 = vpack.c.bf16 %v9350_v46, %v9349_v16  ;;  %v6159_v61 = vld [vmem:[#allocation3 + $0x52] sm:$0xff]  ;;  %v9376_v62 = vld [vmem:[%s14421_s4 + $0x118] sm:$0xff]  ;;  %v10862_v18 = vpack.c.bf16 %v9390_v34, %v9389_v12 }
 0x431   : > { %v5364_v25 = vsel %vm5313_vm10, %v5215_v24, %v5363_v35  ;;  %v5766_v24 = vld [vmem:[#allocation3 + $0x61] sm:$0xff]  ;;  %v6161_v32 = vld [vmem:[#allocation3 + $0x72] sm:$0xff]  ;;  %v10854_v35 = vpack.c.bf16 %v9376_v62, %v9375_v41 }
 0x432   : > { %v5365_v58 = vsel %vm5315_vm11, %v5218_v56, %v5364_v25  ;;  %v9388_v2 = vld [vmem:[%s14424_s7 + $0x68] sm:$0xff] }
 0x433   : > { %5382 = vst.msk [vmem:[#allocation3 + $0x81] sm:$0xff] %vm5026_vm4, %v5365_v58  ;;  %v6163_v58 = vld [vmem:[#allocation3 + $0x92] sm:$0xff] }
 0x43a   : > { %v5391_v63 = vld [vmem:[#allocation3 + $0x80] sm:$0xff] }
 0x43b   : > { %10426 = vmatmul.mubr.msk.f32.gmra.mrb[38].mxu1 %vm5026_vm4, %v5391_v63  ;;  %v5768_v56 = vld [vmem:[#allocation3 + $0x81] sm:$0xff] }
 0x43c   : > { %10436 = vmatprep.mubr.msk.f32.mxu1 %vm5026_vm4, %v5383_v1  ;;  %v6162_v25 = vld [vmem:[#allocation3 + $0x82] sm:$0xff]  ;;  %v14501_v1 = vmov 0.0  }
 0x43d   : > { %7036 = vst.msk [vmem:[#allocation4 + $0x8] sm:$0x3f] %vm7034_vm12, %v14501_v1  ;;  %7035 = vst.msk [vmem:[#allocation4] sm:$0x3f] %vm7034_vm12, %v14501_v1 }
 0x43e   : > { %7037 = vst.msk [vmem:[#allocation4 + $0x10] sm:$0x3f] %vm7034_vm12, %v14501_v1  ;;  %7038 = vst.msk [vmem:[#allocation4 + $0x18] sm:$0x3f] %vm7034_vm12, %v14501_v1 }
 0x43f   : > { %10437 = vmatmul.mubr.msk.f32.vlgmr.msra.gmra.mrb[32].mxu1 %vm5026_vm4, %v11434_v54  ;;  %7039 = vst.msk [vmem:[#allocation4 + $0x20] sm:$0x3f] %vm7034_vm12, %v14501_v1  ;;  %7040 = vst.msk [vmem:[#allocation4 + $0x28] sm:$0x3f] %vm7034_vm12, %v14501_v1  ;;  %v7085_v54 = vld [vmem:[%s14424_s7] sm:$0xff] }
 0x440   : > { %10805 = vmatpush3.bf16.msra.mxu1 %v13733_v10  ;;  %10439 = vmatprep.mubr.msk.f32.mxu1 %vm5026_vm4, %v13639_v38  ;;  %v9315_v10 = vld [vmem:[%s14421_s4 + $0x30] sm:$0xff]  ;;  %8025 = vst.msk [vmem:[#allocation5] sm:$0xf] %vm7074_vm13, %v14501_v1  ;;  %8026 = vst.msk [vmem:[#allocation5 + $0x4] sm:$0xf] %vm7074_vm13, %v14501_v1 }
 0x441   : > { %10807 = vmatprep.subr.bf16.mxu1 %v10806_v21  ;;  %v10814_v0 = vpack.c.bf16 %v9316_v40, %v9315_v10  ;;  %8027 = vst.msk [vmem:[#allocation5 + $0x8] sm:$0xf] %vm7074_vm13, %v14501_v1  ;;  %8028 = vst.msk [vmem:[#allocation5 + $0xc] sm:$0xf] %vm7074_vm13, %v14501_v1  ;;  %v14019_v40 = vld [vmem:[%s14422_s5] ss:$0 sm:$0xff] }
 0x443   : > { %10440 = vmatmul.mubr.msk.f32.gmra.mrb[34].mxu1 %vm5026_vm4, %v13645_v37 }
 0x444   : > { %10442 = vmatprep.mubr.msk.f32.mxu1 %vm5026_vm4, %v13659_v45  ;;  %10809 = vmatpush3.bf16.msra.mxu1 %v10806_v21 }
 0x445   : > { %10811 = vmatprep.subr.bf16.mxu1 %v10810_v49 }
 0x447   : > { %10443 = vmatmul.mubr.msk.f32.gmra.mrb[36].mxu1 %vm5026_vm4, %v13663_v4 }
 0x448   : > { %10445 = vmatprep.mubr.msk.f32.mxu1 %vm5026_vm4, %v13670_v17 }
 0x44b   : > { %10446 = vmatmul.mubr.msk.f32.gmra.mrb[38].mxu1 %vm5026_vm4, %v13754_v9 }
 0x44c   : > { %10456 = vmatprep.mubr.msk.f32.mxu1 %vm5026_vm4, %v13639_v38  ;;  %v5392_v38 = vld [vmem:[#allocation3 + $0x90] sm:$0xff] }
 0x44f   : > { %10457 = vmatmul.mubr.msk.f32.vlgmr.msra.gmra.mrb[32].mxu1 %vm5026_vm4, %v13645_v37  ;;  %v5760_v37 = vld [vmem:[#allocation3 + $0x1] sm:$0xff] }
 0x450   : > { %10813 = vmatpush3.bf16.msra.mxu1 %v10810_v49  ;;  %10459 = vmatprep.mubr.msk.f32.mxu1 %vm5026_vm4, %v13659_v45  ;;  %v9327_v45 = vld [vmem:[%s14421_s4 + $0x90] sm:$0xff]  ;;  %v7086_v49 = vld [vmem:[%s14424_s7 + $0x8] sm:$0xff] }
 0x451   : > { %10815 = vmatprep.subr.bf16.mxu1 %v10814_v0  ;;  %v14013_v10 = vpack.c.bf16 %v7086_v49, %v7085_v54 }
 0x453   : > { %10460 = vmatmul.mubr.msk.f32.gmra.mrb[34].mxu1 %vm5026_vm4, %v13663_v4  ;;  %v9328_v4 = vld [vmem:[%s14421_s4 + $0x98] sm:$0xff] }
 0x454   : > { %10462 = vmatprep.mubr.msk.f32.mxu1 %vm5026_vm4, %v13670_v17  ;;  %10817 = vmatpush3.bf16.msra.mxu1 %v10814_v0  ;;  %v10822_v17 = vpack.c.bf16 %v9328_v4, %v9327_v45 }
 0x455   : > { %10819 = vmatprep.subr.bf16.mxu1 %v10818_v23 }
 0x457   : > { %10463 = vmatmul.mubr.msk.f32.gmra.mrb[36].mxu1 %vm5026_vm4, %v13754_v9  ;;  %v9337_v9 = vld [vmem:[%s14421_s4 + $0xe0] sm:$0xff] }
 0x458   : > { %10465 = vmatprep.mubr.msk.f32.mxu1 %vm5026_vm4, %v5391_v63  ;;  %v10826_v31 = vpack.c.bf16 %v9338_v22, %v9337_v9  ;;  %v9387_v63 = vld [vmem:[%s14424_s7 + $0x60] sm:$0xff] }
 0x459   : > { %v10858_v21 = vpack.c.bf16 %v9388_v2, %v9387_v63 }
 0x45b   : > { %10466 = vmatmul.mubr.msk.f32.gmra.mrb[38].mxu1 %vm5026_vm4, %v5392_v38 }
 0x45c   : > { %10476 = vmatprep.mubr.msk.f32.mxu1 %vm5026_vm4, %v5760_v37 }
 0x45f   : > { %10477 = vmatmul.mubr.msk.f32.vlgmr.msra.gmra.mrb[32].mxu1 %vm5026_vm4, %v5761_v27 }
 0x460   : > { %10821 = vmatpush3.bf16.msra.mxu1 %v10818_v23  ;;  %10479 = vmatprep.mubr.msk.f32.mxu1 %vm5026_vm4, %v5762_v33 }
 0x461   : > { %10823 = vmatprep.subr.bf16.mxu1 %v10822_v17 }
 0x463   : > { %10480 = vmatmul.mubr.msk.f32.gmra.mrb[34].mxu1 %vm5026_vm4, %v5763_v15 }
 0x464   : > { %10482 = vmatprep.mubr.msk.f32.mxu1 %vm5026_vm4, %v5764_v29  ;;  %10825 = vmatpush3.bf16.msra.mxu1 %v10822_v17 }
 0x465   : > { %10827 = vmatprep.subr.bf16.mxu1 %v10826_v31 }
 0x467   : > { %10483 = vmatmul.mubr.msk.f32.gmra.mrb[36].mxu1 %vm5026_vm4, %v5765_v43 }
 0x468   : > { %10485 = vmatprep.mubr.msk.f32.mxu1 %vm5026_vm4, %v5766_v24 }
 0x46b   : > { %10486 = vmatmul.mubr.msk.f32.gmra.mrb[38].mxu1 %vm5026_vm4, %v5767_v52 }
 0x46c   : > { %10496 = vmatprep.mubr.msk.f32.mxu1 %vm5026_vm4, %v5761_v27 }
 0x46f   : > { %10497 = vmatmul.mubr.msk.f32.vlgmr.msra.gmra.mrb[32].mxu1 %vm5026_vm4, %v5762_v33 }
 0x470   : > { %10829 = vmatpush3.bf16.msra.mxu1 %v10826_v31  ;;  %10499 = vmatprep.mubr.msk.f32.mxu1 %vm5026_vm4, %v5763_v15 }
 0x471   : > { %10831 = vmatprep.subr.bf16.mxu1 %v10830_v3 }
 0x473   : > { %10500 = vmatmul.mubr.msk.f32.gmra.mrb[34].mxu1 %vm5026_vm4, %v5764_v29 }
 0x474   : > { %10502 = vmatprep.mubr.msk.f32.mxu1 %vm5026_vm4, %v5765_v43  ;;  %10833 = vmatpush3.bf16.msra.mxu1 %v10830_v3 }
 0x475   : > { %10835 = vmatprep.subr.bf16.mxu1 %v10834_v13 }
 0x477   : > { %10503 = vmatmul.mubr.msk.f32.gmra.mrb[36].mxu1 %vm5026_vm4, %v5766_v24 }
 0x478   : > { %10505 = vmatprep.mubr.msk.f32.mxu1 %vm5026_vm4, %v5767_v52 }
 0x47b   : > { %10506 = vmatmul.mubr.msk.f32.gmra.mrb[38].mxu1 %vm5026_vm4, %v5768_v56 }
 0x47c   : > { %10516 = vmatprep.mubr.msk.f32.mxu1 %vm5026_vm4, %v5762_v33 }
 0x47f   : > { %10517 = vmatmul.mubr.msk.f32.vlgmr.msra.gmra.mrb[32].mxu1 %vm5026_vm4, %v5763_v15 }
 0x480   : > { %10837 = vmatpush3.bf16.msra.mxu1 %v10834_v13  ;;  %10519 = vmatprep.mubr.msk.f32.mxu1 %vm5026_vm4, %v5764_v29 }
 0x481   : > { %10839 = vmatprep.subr.bf16.mxu1 %v10838_v7 }
 0x483   : > { %10520 = vmatmul.mubr.msk.f32.gmra.mrb[34].mxu1 %vm5026_vm4, %v5765_v43 }
 0x484   : > { %10522 = vmatprep.mubr.msk.f32.mxu1 %vm5026_vm4, %v5766_v24  ;;  %10841 = vmatpush3.bf16.msra.mxu1 %v10838_v7 }
 0x485   : > { %10843 = vmatprep.subr.bf16.mxu1 %v10842_v47 }
 0x487   : > { %10523 = vmatmul.mubr.msk.f32.gmra.mrb[36].mxu1 %vm5026_vm4, %v5767_v52 }
 0x488   : > { %10525 = vmatprep.mubr.msk.f32.mxu1 %vm5026_vm4, %v5768_v56 }
 0x48b   : > { %10526 = vmatmul.mubr.msk.f32.gmra.mrb[38].mxu1 %vm5026_vm4, %v5769_v44 }
 0x48c   : > { %10536 = vmatprep.mubr.msk.f32.mxu1 %vm5026_vm4, %v6154_v14 }
 0x48f   : > { %10537 = vmatmul.mubr.msk.f32.vlgmr.msra.gmra.mrb[32].mxu1 %vm5026_vm4, %v6155_v55 }
 0x490   : > { %10845 = vmatpush3.bf16.msra.mxu1 %v10842_v47  ;;  %10539 = vmatprep.mubr.msk.f32.mxu1 %vm5026_vm4, %v6156_v57 }
 0x491   : > { %10847 = vmatprep.subr.bf16.mxu1 %v10846_v20 }
 0x493   : > { %10540 = vmatmul.mubr.msk.f32.gmra.mrb[34].mxu1 %vm5026_vm4, %v6157_v11 }
 0x494   : > { %10542 = vmatprep.mubr.msk.f32.mxu1 %vm5026_vm4, %v6158_v5  ;;  %10849 = vmatpush3.bf16.msra.mxu1 %v10846_v20 }
 0x495   : > { %10851 = vmatprep.subr.bf16.mxu1 %v10850_v28 }
 0x497   : > { %10543 = vmatmul.mubr.msk.f32.gmra.mrb[36].mxu1 %vm5026_vm4, %v6159_v61 }
 0x498   : > { %10545 = vmatprep.mubr.msk.f32.mxu1 %vm5026_vm4, %v6160_v50 }
 0x49b   : > { %10546 = vmatmul.mubr.msk.f32.gmra.mrb[38].mxu1 %vm5026_vm4, %v6161_v32 }
 0x49c   : > { %10556 = vmatprep.mubr.msk.f32.mxu1 %vm5026_vm4, %v6155_v55 }
 0x49f   : > { %10557 = vmatmul.mubr.msk.f32.vlgmr.msra.gmra.mrb[32].mxu1 %vm5026_vm4, %v6156_v57 }
 0x4a0   : > { %10853 = vmatpush3.bf16.msra.mxu1 %v10850_v28  ;;  %10559 = vmatprep.mubr.msk.f32.mxu1 %vm5026_vm4, %v6157_v11 }
 0x4a1   : > { %10855 = vmatprep.subr.bf16.mxu1 %v10854_v35 }
 0x4a3   : > { %10560 = vmatmul.mubr.msk.f32.gmra.mrb[34].mxu1 %vm5026_vm4, %v6158_v5 }
 0x4a4   : > { %10562 = vmatprep.mubr.msk.f32.mxu1 %vm5026_vm4, %v6159_v61  ;;  %10857 = vmatpush3.bf16.msra.mxu1 %v10854_v35 }
 0x4a5   : > { %10859 = vmatprep.subr.bf16.mxu1 %v10858_v21 }
 0x4a7   : > { %10563 = vmatmul.mubr.msk.f32.gmra.mrb[36].mxu1 %vm5026_vm4, %v6160_v50 }
 0x4a8   : > { %10565 = vmatprep.mubr.msk.f32.mxu1 %vm5026_vm4, %v6161_v32 }
 0x4ab   : > { %10566 = vmatmul.mubr.msk.f32.gmra.mrb[38].mxu1 %vm5026_vm4, %v6162_v25 }
 0x4ac   : > { %10576 = vmatprep.mubr.msk.f32.mxu1 %vm5026_vm4, %v6156_v57 }
 0x4af   : > { %10577 = vmatmul.mubr.msk.f32.vlgmr.msra.gmra.mrb[32].mxu1 %vm5026_vm4, %v6157_v11 }
 0x4b0   : > { %10579 = vmatprep.mubr.msk.f32.mxu1 %vm5026_vm4, %v6158_v5  ;;  %10861 = vmatpush3.bf16.msra.mxu1 %v10858_v21 }
 0x4b1   : > { %10863 = vmatprep.subr.bf16.mxu1 %v10862_v18 }
 0x4b3   : > { %10580 = vmatmul.mubr.msk.f32.gmra.mrb[34].mxu1 %vm5026_vm4, %v6159_v61 }
 0x4b4   : > { %10582 = vmatprep.mubr.msk.f32.mxu1 %vm5026_vm4, %v6160_v50  ;;  %10865 = vmatpush3.bf16.msra.mxu1 %v10862_v18 }
 0x4b5   : > { %10867 = vmatprep.subr.bf16.mxu1 %v14013_v10 }
 0x4b7   : > { %10583 = vmatmul.mubr.msk.f32.gmra.mrb[36].mxu1 %vm5026_vm4, %v6161_v32 }
 0x4b8   : > { %10585 = vmatprep.mubr.msk.f32.mxu1 %vm5026_vm4, %v6162_v25 }
 0x4bb   : > { %10586 = vmatmul.mubr.msk.f32.gmra.mrb[38].mxu1 %vm5026_vm4, %v6163_v58 }
 0x582   : > { %v10578_v0 = vpop.f32.mrb[32].mxu1 }
 0x583   : > { %v6556_v53 = vmul.f32 %v10578_v0, %v14019_v40  ;;  %v6501_v23 = vpop.f32.mrb[33].mxu1 }
 0x584   : > { %v6555_v38 = vmul.f32 %v14019_v40, %v6501_v23 }
 0x585   : > { %v6571_v37 = vadd.f32 %v14024_v59, %v6556_v53 }
 0x586   : > { %v6570_v45 = vadd.f32 %v14024_v59, %v6555_v38  ;;  %v10581_v4 = vpop.f32.mrb[34].mxu1 }
 0x587   : > { %v6579_v17 = vmax.f32 %v6571_v37, 0.0  ;;  %v6558_v27 = vmul.f32 %v10581_v4, %v14019_v40  ;;  %v6511_v9 = vpop.f32.mrb[35].mxu1 }
 0x588   : > { %v6578_v22 = vmax.f32 %v6570_v45, 0.0  ;;  %v6557_v33 = vmul.f32 %v14019_v40, %v6511_v9 }
 0x589   : > { %v6611_v31 = vcombine.high %v6579_v17, %v6579_v17  ;;  %v6618_v15 = vrot.slane %v6579_v17, %v12846_v6  ;;  %v6573_v29 = vadd.f32 %v14024_v59, %v6558_v27 }
 0x58a   : > { %v6594_v43 = vcombine.high %v6578_v22, %v6578_v22  ;;  %v6601_v24 = vrot.slane %v6578_v22, %v12846_v6  ;;  %v14036_v52 = vadd.f32 %v14024_v59, %v6557_v33  ;;  %v14038_v39 = vpop.f32.mrb[36].mxu1 }
 0x58b   : > { %v6625_v19 = vrot.slane %v6611_v31, %v12846_v6  ;;  %v6626_v3 = vcombine.high %v6618_v15, %v6618_v15  ;;  %v6790_v16 = vsel %vm4129_vm3, %v6618_v15, -inf  ;;  %v14042_v46 = vmax.f32 %v6573_v29, 0.0  ;;  %v14044_v13 = vpop.f32.mrb[37].mxu1 }
 0x58c   : > { %v6791_v56 = vrot.slane %v6790_v16, 4  ;;  %v6608_v36 = vrot.slane %v6594_v43, %v12846_v6  ;;  %v6609_v51 = vcombine.high %v6601_v24, %v6601_v24  ;;  %v6762_v7 = vsel %vm4129_vm3, %v6601_v24, -inf }
 0x58d   : > { %v6627_v48 = vcombine.high %v6625_v19, %v6625_v19  ;;  %v6797_v30 = vsel %vm4129_vm3, %v6626_v3, -inf  ;;  %v6804_v47 = vsel %vm4129_vm3, %v6625_v19, -inf  ;;  %v6763_v44 = vrot.slane %v6762_v7, 4 }
 0x58e   : > { %v6792_v14 = vmax.f32 %v6790_v16, %v6791_v56  ;;  %v6798_v26 = vrot.slane %v6797_v30, 4  ;;  %v6805_v42 = vrot.slane %v6804_v47, 4  ;;  %v6610_v20 = vcombine.high %v6608_v36, %v6608_v36  ;;  %v14050_v55 = vpop.f32.mrb[38].mxu1 }
 0x58f   : > { %v6811_v60 = vsel %vm4129_vm3, %v6627_v48, -inf  ;;  %v6764_v8 = vmax.f32 %v6762_v7, %v6763_v44  ;;  %v6769_v57 = vsel %vm4129_vm3, %v6609_v51, -inf  ;;  %v6776_v28 = vsel %vm4129_vm3, %v6608_v36, -inf  ;;  %v14055_v11 = vpop.f32.mrb[39].mxu1 }
 0x590   : > { %v6793_v5 = vrot.slane %v6792_v14, 2  ;;  %v6799_v61 = vmax.f32 %v6797_v30, %v6798_v26  ;;  %v6806_v50 = vmax.f32 %v6804_v47, %v6805_v42  ;;  %v6812_v32 = vrot.slane %v6811_v60, 4 }
 0x591   : > { %v6765_v41 = vrot.slane %v6764_v8, 2  ;;  %v6770_v62 = vrot.slane %v6769_v57, 4  ;;  %v6777_v35 = vrot.slane %v6776_v28, 4  ;;  %v6783_v25 = vsel %vm4129_vm3, %v6610_v20, -inf }
 0x592   : > { %v6794_v58 = vmax.f32 %v6792_v14, %v6793_v5  ;;  %v6800_v63 = vrot.slane %v6799_v61, 2  ;;  %v6807_v2 = vrot.slane %v6806_v50, 2  ;;  %v6813_v12 = vmax.f32 %v6811_v60, %v6812_v32 }
 0x593   : > { %v6766_v21 = vmax.f32 %v6764_v8, %v6765_v41  ;;  %v6771_v34 = vmax.f32 %v6769_v57, %v6770_v62  ;;  %v6778_v18 = vmax.f32 %v6776_v28, %v6777_v35  ;;  %v6784_v54 = vrot.slane %v6783_v25, 4 }
 0x594   : > { %v6795_v49 = vrot.slane %v6794_v58, 1  ;;  %v6801_v0 = vmax.f32 %v6799_v61, %v6800_v63  ;;  %v6808_v53 = vmax.f32 %v6806_v50, %v6807_v2  ;;  %v6814_v23 = vrot.slane %v6813_v12, 2 }
 0x595   : > { %v6767_v38 = vrot.slane %v6766_v21, 1  ;;  %v6772_v37 = vrot.slane %v6771_v34, 2  ;;  %v6779_v45 = vrot.slane %v6778_v18, 2  ;;  %v6785_v4 = vmax.f32 %v6783_v25, %v6784_v54 }
 0x596   : > { %v6796_v17 = vmax.f32 %v6794_v58, %v6795_v49  ;;  %v6802_v27 = vrot.slane %v6801_v0, 1  ;;  %v6809_v9 = vrot.slane %v6808_v53, 1  ;;  %v6815_v22 = vmax.f32 %v6813_v12, %v6814_v23 }
 0x597   : > { %v6768_v33 = vmax.f32 %v6766_v21, %v6767_v38  ;;  %v6773_v31 = vmax.f32 %v6771_v34, %v6772_v37  ;;  %v6780_v15 = vmax.f32 %v6778_v18, %v6779_v45  ;;  %v6786_v29 = vrot.slane %v6785_v4, 2 }
 0x598   : > { %v6803_v43 = vmax.f32 %v6801_v0, %v6802_v27  ;;  %v6810_v24 = vmax.f32 %v6808_v53, %v6809_v9  ;;  %v6816_v19 = vrot.slane %v6815_v22, 1  ;;  %v6987_v3 = vsel %vm5026_vm4, %v6796_v17, -inf }
 0x599   : > { %v6774_v16 = vrot.slane %v6773_v31, 1  ;;  %v6781_v56 = vrot.slane %v6780_v15, 1  ;;  %v6787_v36 = vmax.f32 %v6785_v4, %v6786_v29  ;;  %v6986_v51 = vsel %vm5026_vm4, %v6768_v33, -inf }
 0x59a   : > { %v6817_v7 = vmax.f32 %v6815_v22, %v6816_v19  ;;  %v6990_v48 = vsel %vm5026_vm4, %v6803_v43, -inf  ;;  %v6993_v30 = vsel %vm5026_vm4, %v6810_v24, -inf  ;;  %v6988_v47 = vmax.f32 %v6986_v51, %v6987_v3 }
 0x59b   : > { %v6775_v44 = vmax.f32 %v6773_v31, %v6774_v16  ;;  %v6782_v14 = vmax.f32 %v6780_v15, %v6781_v56  ;;  %v6788_v26 = vrot.slane %v6787_v36, 1  ;;  %v6645_v42 = vcombine.high %v14042_v46, %v14042_v46 }
 0x59c   : > { %v6996_v20 = vsel %vm5026_vm4, %v6817_v7, -inf  ;;  %v6652_v60 = vrot.slane %v14042_v46, %v12846_v6  ;;  %v6580_v8 = vmax.f32 %v14036_v52, 0.0  ;;  %v6560_v57 = vmul.f32 %v14038_v39, %v14019_v40 }
 0x59d   : > { %v6789_v28 = vmax.f32 %v6787_v36, %v6788_v26  ;;  %v6989_v5 = vsel %vm5026_vm4, %v6775_v44, -inf  ;;  %v6992_v61 = vsel %vm5026_vm4, %v6782_v14, -inf  ;;  %v6659_v50 = vrot.slane %v6645_v42, %v12846_v6 }
 0x59e   : > { %v6991_v32 = vmax.f32 %v6989_v5, %v6990_v48  ;;  %v6994_v41 = vmax.f32 %v6992_v61, %v6993_v30  ;;  %v6660_v62 = vcombine.high %v6652_v60, %v6652_v60  ;;  %v6846_v35 = vsel %vm4129_vm3, %v6652_v60, -inf }
 0x59f   : > { %v6995_v25 = vsel %vm5026_vm4, %v6789_v28, -inf  ;;  %v6661_v46 = vcombine.high %v6659_v50, %v6659_v50  ;;  %v6847_v58 = vrot.slane %v6846_v35, 4  ;;  %v6860_v52 = vsel %vm4129_vm3, %v6659_v50, -inf }
 0x5a0   : > { %v6997_v63 = vmax.f32 %v6995_v25, %v6996_v20  ;;  %v7057_v39 = vsel %vm5303_vm5, %v6991_v32, %v6988_v47  ;;  %v6853_v2 = vsel %vm4129_vm3, %v6660_v62, -inf  ;;  %v6861_v12 = vrot.slane %v6860_v52, 4 }
 0x5a1   : > { %v7058_v21 = vsel %vm5305_vm6, %v6994_v41, %v7057_v39  ;;  %v6848_v34 = vmax.f32 %v6846_v35, %v6847_v58  ;;  %v6854_v18 = vrot.slane %v6853_v2, 4  ;;  %v6867_v54 = vsel %vm4129_vm3, %v6661_v46, -inf }
 0x5a2   : > { %v7059_v49 = vsel %vm5307_vm7, %v6997_v63, %v7058_v21  ;;  %v6862_v0 = vmax.f32 %v6860_v52, %v6861_v12  ;;  %v6868_v53 = vrot.slane %v6867_v54, 4  ;;  %v6628_v23 = vcombine.high %v6580_v8, %v6580_v8 }
 0x5a3   : > { %7075 = vst.msk [vmem:[#allocation4 + $0x9] sm:$0xf] %vm7074_vm13, %v7059_v49  ;;  %v6849_v38 = vrot.slane %v6848_v34, 2  ;;  %v6855_v37 = vmax.f32 %v6853_v2, %v6854_v18  ;;  %v6635_v45 = vrot.slane %v6580_v8, %v12846_v6  ;;  %v6575_v4 = vadd.f32 %v14024_v59, %v6560_v57 }
 0x5a4   : > { %v6863_v17 = vrot.slane %v6862_v0, 2  ;;  %v6869_v27 = vmax.f32 %v6867_v54, %v6868_v53  ;;  %v6642_v9 = vrot.slane %v6628_v23, %v12846_v6  ;;  %v6559_v22 = vmul.f32 %v14019_v40, %v14044_v13 }
 0x5a5   : > { %v6850_v33 = vmax.f32 %v6848_v34, %v6849_v38  ;;  %v6856_v31 = vrot.slane %v6855_v37, 2  ;;  %v6643_v15 = vcombine.high %v6635_v45, %v6635_v45  ;;  %v6818_v29 = vsel %vm4129_vm3, %v6635_v45, -inf }
 0x5a6   : > { %v6864_v43 = vmax.f32 %v6862_v0, %v6863_v17  ;;  %v6870_v24 = vrot.slane %v6869_v27, 2  ;;  %v6644_v19 = vcombine.high %v6642_v9, %v6642_v9  ;;  %v6819_v3 = vrot.slane %v6818_v29, 4 }
 0x5a7   : > { %v6851_v16 = vrot.slane %v6850_v33, 1  ;;  %v6857_v56 = vmax.f32 %v6855_v37, %v6856_v31  ;;  %v6825_v36 = vsel %vm4129_vm3, %v6643_v15, -inf  ;;  %v6832_v51 = vsel %vm4129_vm3, %v6642_v9, -inf }
 0x5a8   : > { %v6865_v7 = vrot.slane %v6864_v43, 1  ;;  %v6871_v48 = vmax.f32 %v6869_v27, %v6870_v24  ;;  %v6820_v30 = vmax.f32 %v6818_v29, %v6819_v3  ;;  %v6826_v47 = vrot.slane %v6825_v36, 4 }
 0x5a9   : > { %v6852_v13 = vmax.f32 %v6850_v33, %v6851_v16  ;;  %v6858_v44 = vrot.slane %v6857_v56, 1  ;;  %v6833_v14 = vrot.slane %v6832_v51, 4  ;;  %v6839_v26 = vsel %vm4129_vm3, %v6644_v19, -inf }
 0x5aa   : > { %v6866_v42 = vmax.f32 %v6864_v43, %v6865_v7  ;;  %v6872_v20 = vrot.slane %v6871_v48, 1  ;;  %v6821_v60 = vrot.slane %v6820_v30, 2  ;;  %v6827_v8 = vmax.f32 %v6825_v36, %v6826_v47 }
 0x5ab   : > { %v6859_v57 = vmax.f32 %v6857_v56, %v6858_v44  ;;  %v6999_v28 = vsel %vm5026_vm4, %v6852_v13, -inf  ;;  %v6834_v5 = vmax.f32 %v6832_v51, %v6833_v14  ;;  %v6840_v61 = vrot.slane %v6839_v26, 4 }
 0x5ac   : > { %v6873_v50 = vmax.f32 %v6871_v48, %v6872_v20  ;;  %v7005_v32 = vsel %vm5026_vm4, %v6866_v42, -inf  ;;  %v6822_v41 = vmax.f32 %v6820_v30, %v6821_v60  ;;  %v6828_v62 = vrot.slane %v6827_v8, 2 }
 0x5ad   : > { %v7002_v35 = vsel %vm5026_vm4, %v6859_v57, -inf  ;;  %v6835_v25 = vrot.slane %v6834_v5, 2  ;;  %v6841_v46 = vmax.f32 %v6839_v26, %v6840_v61  ;;  %v6583_v58 = vmax.f32 %v6575_v4, 0.0 }
 0x5ae   : > { %v7008_v52 = vsel %vm5026_vm4, %v6873_v50, -inf  ;;  %v6823_v63 = vrot.slane %v6822_v41, 1  ;;  %v6829_v39 = vmax.f32 %v6827_v8, %v6828_v62  ;;  %v6574_v2 = vadd.f32 %v14024_v59, %v6559_v22 }
 0x5af   : > { %v6836_v12 = vmax.f32 %v6834_v5, %v6835_v25  ;;  %v6842_v21 = vrot.slane %v6841_v46, 2  ;;  %v6679_v34 = vcombine.high %v6583_v58, %v6583_v58  ;;  %v6686_v18 = vrot.slane %v6583_v58, %v12846_v6 }
 0x5b0   : > { %v6824_v54 = vmax.f32 %v6822_v41, %v6823_v63  ;;  %v6830_v49 = vrot.slane %v6829_v39, 1  ;;  %v6582_v0 = vmax.f32 %v6574_v2, 0.0  ;;  %v6562_v53 = vmul.f32 %v14050_v55, %v14019_v40 }
 0x5b1   : > { %v6837_v23 = vrot.slane %v6836_v12, 1  ;;  %v6843_v38 = vmax.f32 %v6841_v46, %v6842_v21  ;;  %v6693_v37 = vrot.slane %v6679_v34, %v12846_v6  ;;  %v6694_v45 = vcombine.high %v6686_v18, %v6686_v18 }
 0x5b2   : > { %v6831_v4 = vmax.f32 %v6829_v39, %v6830_v49  ;;  %v6998_v17 = vsel %vm5026_vm4, %v6824_v54, -inf  ;;  %v6902_v27 = vsel %vm4129_vm3, %v6686_v18, -inf  ;;  %v6662_v9 = vcombine.high %v6582_v0, %v6582_v0 }
 0x5b3   : > { %v6838_v22 = vmax.f32 %v6836_v12, %v6837_v23  ;;  %v6844_v33 = vrot.slane %v6843_v38, 1  ;;  %v7000_v31 = vmax.f32 %v6998_v17, %v6999_v28  ;;  %v6695_v15 = vcombine.high %v6693_v37, %v6693_v37 }
 0x5b4   : > { %v7001_v29 = vsel %vm5026_vm4, %v6831_v4, -inf  ;;  %v6903_v43 = vrot.slane %v6902_v27, 4  ;;  %v6909_v55 = vsel %vm4129_vm3, %v6694_v45, -inf  ;;  %v6916_v24 = vsel %vm4129_vm3, %v6693_v37, -inf }
 0x5b5   : > { %v6845_v19 = vmax.f32 %v6843_v38, %v6844_v33  ;;  %v7003_v3 = vmax.f32 %v7001_v29, %v7002_v35  ;;  %v7004_v16 = vsel %vm5026_vm4, %v6838_v22, -inf  ;;  %v6910_v56 = vrot.slane %v6909_v55, 4 }
 0x5b6   : > { %v7006_v36 = vmax.f32 %v7004_v16, %v7005_v32  ;;  %v6904_v51 = vmax.f32 %v6902_v27, %v6903_v43  ;;  %v6917_v7 = vrot.slane %v6916_v24, 4  ;;  %v6923_v48 = vsel %vm4129_vm3, %v6695_v15, -inf }
 0x5b7   : > { %v7007_v30 = vsel %vm5026_vm4, %v6845_v19, -inf  ;;  %v7060_v47 = vsel %vm5303_vm5, %v7003_v3, %v7000_v31  ;;  %v6911_v13 = vmax.f32 %v6909_v55, %v6910_v56  ;;  %v6924_v44 = vrot.slane %v6923_v48, 4 }
 0x5b8   : > { %v7009_v14 = vmax.f32 %v7007_v30, %v7008_v52  ;;  %v7061_v26 = vsel %vm5305_vm6, %v7006_v36, %v7060_v47  ;;  %v6905_v42 = vrot.slane %v6904_v51, 2  ;;  %v6918_v20 = vmax.f32 %v6916_v24, %v6917_v7 }
 0x5b9   : > { %v6912_v60 = vrot.slane %v6911_v13, 2  ;;  %v6925_v8 = vmax.f32 %v6923_v48, %v6924_v44  ;;  %v6669_v57 = vrot.slane %v6582_v0, %v12846_v6  ;;  %v6676_v28 = vrot.slane %v6662_v9, %v12846_v6  ;;  %v14128_v48 = vld [vmem:[#allocation4 + $0x8] sm:$0xf] }
 0x5ba   : > { %v7062_v5 = vsel %vm5307_vm7, %v7009_v14, %v7061_v26  ;;  %v6906_v61 = vmax.f32 %v6904_v51, %v6905_v42  ;;  %v6919_v50 = vrot.slane %v6918_v20, 2  ;;  %v6577_v32 = vadd.f32 %v14024_v59, %v6562_v53 }
 0x5bb   : > { %7076 = vst.msk [vmem:[#allocation4 + $0x11] sm:$0xf] %vm7074_vm13, %v7062_v5  ;;  %v6913_v41 = vmax.f32 %v6911_v13, %v6912_v60  ;;  %v6926_v62 = vrot.slane %v6925_v8, 2  ;;  %v6677_v35 = vcombine.high %v6669_v57, %v6669_v57  ;;  %v6678_v25 = vcombine.high %v6676_v28, %v6676_v28 }
 0x5bc   : > { %v6907_v46 = vrot.slane %v6906_v61, 1  ;;  %v6920_v58 = vmax.f32 %v6918_v20, %v6919_v50  ;;  %v6874_v52 = vsel %vm4129_vm3, %v6669_v57, -inf  ;;  %v6888_v63 = vsel %vm4129_vm3, %v6676_v28, -inf }
 0x5bd   : > { %v6914_v39 = vrot.slane %v6913_v41, 1  ;;  %v6927_v2 = vmax.f32 %v6925_v8, %v6926_v62  ;;  %v6875_v12 = vrot.slane %v6874_v52, 4  ;;  %v6881_v21 = vsel %vm4129_vm3, %v6677_v35, -inf }
 0x5be   : > { %v6908_v34 = vmax.f32 %v6906_v61, %v6907_v46  ;;  %v6921_v18 = vrot.slane %v6920_v58, 1  ;;  %v6882_v54 = vrot.slane %v6881_v21, 4  ;;  %v6889_v49 = vrot.slane %v6888_v63, 4 }
 0x5bf   : > { %v6915_v0 = vmax.f32 %v6913_v41, %v6914_v39  ;;  %v6928_v53 = vrot.slane %v6927_v2, 1  ;;  %v6876_v23 = vmax.f32 %v6874_v52, %v6875_v12  ;;  %v6895_v38 = vsel %vm4129_vm3, %v6678_v25, -inf }
 0x5c0   : > { %v6922_v37 = vmax.f32 %v6920_v58, %v6921_v18  ;;  %v7011_v45 = vsel %vm5026_vm4, %v6908_v34, -inf  ;;  %v6883_v4 = vmax.f32 %v6881_v21, %v6882_v54  ;;  %v6890_v17 = vmax.f32 %v6888_v63, %v6889_v49 }
 0x5c1   : > { %v6929_v27 = vmax.f32 %v6927_v2, %v6928_v53  ;;  %v7014_v9 = vsel %vm5026_vm4, %v6915_v0, -inf  ;;  %v6877_v22 = vrot.slane %v6876_v23, 2  ;;  %v6896_v33 = vrot.slane %v6895_v38, 4 }
 0x5c2   : > { %v7017_v31 = vsel %vm5026_vm4, %v6922_v37, -inf  ;;  %v6884_v15 = vrot.slane %v6883_v4, 2  ;;  %v6891_v29 = vrot.slane %v6890_v17, 2  ;;  %v6585_v43 = vmax.f32 %v6577_v32, 0.0  ;;  %v14122_v55 = vld [vmem:[#allocation4 + $0x10] sm:$0xf] }
 0x5c3   : > { %v7020_v24 = vsel %vm5026_vm4, %v6929_v27, -inf  ;;  %v6878_v19 = vmax.f32 %v6876_v23, %v6877_v22  ;;  %v6897_v3 = vmax.f32 %v6895_v38, %v6896_v33  ;;  %v6561_v16 = vmul.f32 %v14019_v40, %v14055_v11 }
 0x5c4   : > { %v6885_v56 = vmax.f32 %v6883_v4, %v6884_v15  ;;  %v6892_v36 = vmax.f32 %v6890_v17, %v6891_v29  ;;  %v6713_v51 = vcombine.high %v6585_v43, %v6585_v43  ;;  %v6720_v7 = vrot.slane %v6585_v43, %v12846_v6 }
 0x5c5   : > { %v6879_v30 = vrot.slane %v6878_v19, 1  ;;  %v6898_v47 = vrot.slane %v6897_v3, 2  ;;  %v6576_v13 = vadd.f32 %v14024_v59, %v6561_v16  ;;  %v7098_v44 = vcombine.low %v14128_v48, %v14122_v55 }
 0x5c6   : > { %v6886_v14 = vrot.slane %v6885_v56, 1  ;;  %v6893_v26 = vrot.slane %v6892_v36, 1  ;;  %v6727_v42 = vrot.slane %v6713_v51, %v12846_v6  ;;  %v6728_v20 = vcombine.high %v6720_v7, %v6720_v7 }
 0x5c7   : > { %v6880_v40 = vmax.f32 %v6878_v19, %v6879_v30  ;;  %v6899_v11 = vmax.f32 %v6897_v3, %v6898_v47  ;;  %v6958_v60 = vsel %vm4129_vm3, %v6720_v7, -inf  ;;  %v6584_v8 = vmax.f32 %v6576_v13, 0.0  ;;  %10596 = vmatprep.mubr.msk.f32.mxu1 %vm5026_vm4, %v7098_v44 }
 0x5c8   : > { %v6887_v57 = vmax.f32 %v6885_v56, %v6886_v14  ;;  %v6894_v28 = vmax.f32 %v6892_v36, %v6893_v26  ;;  %v6729_v5 = vcombine.high %v6727_v42, %v6727_v42  ;;  %v6959_v61 = vrot.slane %v6958_v60, 4 }
 0x5c9   : > { %v6900_v59 = vrot.slane %v6899_v11, 1  ;;  %v7010_v50 = vsel %vm5026_vm4, %v6880_v40, -inf  ;;  %v6965_v32 = vsel %vm4129_vm3, %v6728_v20, -inf  ;;  %v6972_v41 = vsel %vm4129_vm3, %v6727_v42, -inf }
 0x5ca   : > { %v7012_v62 = vmax.f32 %v7010_v50, %v7011_v45  ;;  %v7013_v35 = vsel %vm5026_vm4, %v6887_v57, -inf  ;;  %v7016_v25 = vsel %vm5026_vm4, %v6894_v28, -inf  ;;  %v6960_v46 = vmax.f32 %v6958_v60, %v6959_v61 }
 0x5cb   : > { %v6901_v58 = vmax.f32 %v6899_v11, %v6900_v59  ;;  %v7015_v52 = vmax.f32 %v7013_v35, %v7014_v9  ;;  %v7018_v63 = vmax.f32 %v7016_v25, %v7017_v31  ;;  %v6966_v39 = vrot.slane %v6965_v32, 4 }
 0x5cc   : > { %v6961_v2 = vrot.slane %v6960_v46, 2  ;;  %v6973_v12 = vrot.slane %v6972_v41, 4  ;;  %v6979_v21 = vsel %vm4129_vm3, %v6729_v5, -inf  ;;  %v6696_v34 = vcombine.high %v6584_v8, %v6584_v8 }
 0x5cd   : > { %v7019_v18 = vsel %vm5026_vm4, %v6901_v58, -inf  ;;  %v7063_v54 = vsel %vm5303_vm5, %v7015_v52, %v7012_v62  ;;  %v6967_v49 = vmax.f32 %v6965_v32, %v6966_v39  ;;  %v6980_v0 = vrot.slane %v6979_v21, 4 }
 0x5ce   : > { %v7021_v53 = vmax.f32 %v7019_v18, %v7020_v24  ;;  %v7064_v23 = vsel %vm5305_vm6, %v7018_v63, %v7063_v54  ;;  %v6974_v38 = vmax.f32 %v6972_v41, %v6973_v12  ;;  %v6703_v4 = vrot.slane %v6584_v8, %v12846_v6 }
 0x5cf   : > { %v6968_v37 = vrot.slane %v6967_v49, 2  ;;  %v6981_v45 = vmax.f32 %v6979_v21, %v6980_v0  ;;  %v6710_v17 = vrot.slane %v6696_v34, %v12846_v6  ;;  %v6962_v9 = vmax.f32 %v6960_v46, %v6961_v2 }
 0x5d0   : > { %v7065_v27 = vsel %vm5307_vm7, %v7021_v53, %v7064_v23  ;;  %v6975_v22 = vrot.slane %v6974_v38, 2  ;;  %v6711_v15 = vcombine.high %v6703_v4, %v6703_v4  ;;  %v6930_v24 = vsel %vm4129_vm3, %v6703_v4, -inf }
 0x5d1   : > { %7077 = vst.msk [vmem:[#allocation4 + $0x19] sm:$0xf] %vm7074_vm13, %v7065_v27  ;;  %v6969_v33 = vmax.f32 %v6967_v49, %v6968_v37  ;;  %v6982_v31 = vrot.slane %v6981_v45, 2  ;;  %v6712_v29 = vcombine.high %v6710_v17, %v6710_v17  ;;  %v6944_v19 = vsel %vm4129_vm3, %v6710_v17, -inf }
 0x5d2   : > { %v6976_v43 = vmax.f32 %v6974_v38, %v6975_v22  ;;  %v6931_v16 = vrot.slane %v6930_v24, 4  ;;  %v6937_v56 = vsel %vm4129_vm3, %v6711_v15, -inf  ;;  %v6945_v51 = vrot.slane %v6944_v19, 4  ;;  %v7088_v22 = vld [vmem:[%s14424_s7 + $0x18] sm:$0xff] }
 0x5d3   : > { %v6983_v3 = vmax.f32 %v6981_v45, %v6982_v31  ;;  %v6938_v36 = vrot.slane %v6937_v56, 4  ;;  %v6963_v7 = vrot.slane %v6962_v9, 1  ;;  %v6970_v30 = vrot.slane %v6969_v33, 1 }
 0x5d4   : > { %v6932_v47 = vmax.f32 %v6930_v24, %v6931_v16  ;;  %v6951_v13 = vsel %vm4129_vm3, %v6712_v29, -inf  ;;  %v6977_v44 = vrot.slane %v6976_v43, 1  ;;  %v6946_v26 = vmax.f32 %v6944_v19, %v6945_v51  ;;  %v9395_v19 = vld [vmem:[%s14424_s7 + $0xc0] sm:$0xff] }
 0x5d5   : > { %v6939_v14 = vmax.f32 %v6937_v56, %v6938_v36  ;;  %v6952_v42 = vrot.slane %v6951_v13, 4  ;;  %v6984_v20 = vrot.slane %v6983_v3, 1  ;;  %v6964_v57 = vmax.f32 %v6962_v9, %v6963_v7  ;;  %v7087_v9 = vld [vmem:[%s14424_s7 + $0x10] sm:$0xff]  ;;  %v9398_v56 = vld [vmem:[%s14424_s7 + $0xd8] sm:$0xff]  ;;  %v9402_v7 = vld [vmem:[%s14424_s7 + $0x28] sm:$0xff] }
 0x5d6   : > { %v6933_v40 = vrot.slane %v6932_v47, 2  ;;  %v6947_v60 = vrot.slane %v6946_v26, 2  ;;  %v6971_v28 = vmax.f32 %v6969_v33, %v6970_v30  ;;  %v6978_v61 = vmax.f32 %v6976_v43, %v6977_v44  ;;  %v7079_v33 = vld [vmem:[#allocation4] sm:$0xf] }
 0x5d7   : > { %v6940_v11 = vrot.slane %v6939_v14, 2  ;;  %v6953_v8 = vmax.f32 %v6951_v13, %v6952_v42  ;;  %v6985_v41 = vmax.f32 %v6983_v3, %v6984_v20  ;;  %v7023_v58 = vsel %vm5026_vm4, %v6964_v57, -inf  ;;  %v9396_v3 = vld [vmem:[%s14424_s7 + $0xc8] sm:$0xff]  ;;  %v9404_v13 = vld [vmem:[%s14424_s7 + $0x38] sm:$0xff]  ;;  %v7347_v44 = vld [vmem:[#allocation4 + $0x1] sm:$0xf] }
 0x5d8   : > { %v6934_v5 = vmax.f32 %v6932_v47, %v6933_v40  ;;  %v6948_v50 = vmax.f32 %v6946_v26, %v6947_v60  ;;  %v7026_v52 = vsel %vm5026_vm4, %v6971_v28, -inf  ;;  %v7029_v39 = vsel %vm5026_vm4, %v6978_v61, -inf  ;;  %v7082_v31 = vld [vmem:[#allocation4 + $0x18] sm:$0xf]  ;;  %v7084_v47 = vld [vmem:[#allocation4 + $0x28] sm:$0xf] }
 0x5d9   : > { %v6941_v59 = vmax.f32 %v6939_v14, %v6940_v11  ;;  %v6954_v32 = vrot.slane %v6953_v8, 2  ;;  %v7032_v34 = vsel %vm5026_vm4, %v6985_v41, -inf  ;;  %v10870_v43 = vpack.c.bf16 %v7088_v22, %v7087_v9  ;;  %v7348_v14 = vld [vmem:[#allocation4 + $0x9] sm:$0xf]  ;;  %v9407_v40 = vld [vmem:[%s14424_s7 + $0x80] sm:$0xff]  ;;  %v9408_v11 = vld [vmem:[%s14424_s7 + $0x88] sm:$0xff] }
 0x5da   : > { %v6935_v62 = vrot.slane %v6934_v5, 1  ;;  %v6949_v25 = vrot.slane %v6948_v50, 1  ;;  %v7180_v24 = vcombine.low %v7079_v33, %v14128_v48  ;;  %v10874_v16 = vpack.c.bf16 %v9396_v3, %v9395_v19  ;;  %v9397_v48 = vld [vmem:[%s14424_s7 + $0xd0] sm:$0xff]  ;;  %v9410_v28 = vld [vmem:[%s14424_s7 + $0x98] sm:$0xff]  ;;  %v9414_v41 = vld [vmem:[%s14424_s7 + $0xe8] sm:$0xff] }
 0x5db   : > { %v6942_v35 = vrot.slane %v6941_v59, 1  ;;  %v6955_v46 = vmax.f32 %v6953_v8, %v6954_v32  ;;  %v7181_v36 = vcombine.low %v14122_v55, %v7082_v31  ;;  %v10878_v51 = vpack.c.bf16 %v9398_v56, %v9397_v48  ;;  %v9403_v55 = vld [vmem:[%s14424_s7 + $0x30] sm:$0xff]  ;;  %v7350_v8 = vld [vmem:[#allocation4 + $0x19] sm:$0xf]  ;;  %v9413_v32 = vld [vmem:[%s14424_s7 + $0xe0] sm:$0xff] }
 0x5dc   : > { %v6936_v63 = vmax.f32 %v6934_v5, %v6935_v62  ;;  %v6950_v12 = vmax.f32 %v6948_v50, %v6949_v25  ;;  %v10886_v42 = vpack.c.bf16 %v9404_v13, %v9403_v55  ;;  %v7362_v20 = vcombine.low %v7347_v44, %v7348_v14  ;;  %v9409_v57 = vld [vmem:[%s14424_s7 + $0x90] sm:$0xff]  ;;  %v7349_v5 = vld [vmem:[#allocation4 + $0x11] sm:$0xf]  ;;  %v9434_v19 = vld [vmem:[%s14424_s7 + $0x118] sm:$0xff] }
 0x5dd   : > { %v6943_v2 = vmax.f32 %v6941_v59, %v6942_v35  ;;  %v6956_v21 = vrot.slane %v6955_v46, 1  ;;  %v10890_v60 = vpack.c.bf16 %v9408_v11, %v9407_v40  ;;  %v7363_v61 = vcombine.low %v7349_v5, %v7350_v8  ;;  %v9415_v25 = vld [vmem:[%s14424_s7 + $0xf0] sm:$0xff]  ;;  %v7625_v48 = vld [vmem:[#allocation4 + $0x2a] sm:$0xf]  ;;  %v9437_v13 = vld [vmem:[%s14425_s8] ss:$0 sm:$0xff] }
 0x5de   : > { %v7022_v18 = vsel %vm5026_vm4, %v6936_v63, -inf  ;;  %v7028_v53 = vsel %vm5026_vm4, %v6950_v12, -inf  ;;  %v10894_v59 = vpack.c.bf16 %v9410_v28, %v9409_v57  ;;  %v7451_v50 = vcombine.low %v7348_v14, %v7349_v5  ;;  %v9419_v63 = vld [vmem:[%s14424_s7 + $0x40] sm:$0xff]  ;;  %v7352_v12 = vld [vmem:[#allocation4 + $0x29] sm:$0xf] }
 0x5df   : > { %v6957_v54 = vmax.f32 %v6955_v46, %v6956_v21  ;;  %v7024_v49 = vmax.f32 %v7022_v18, %v7023_v58  ;;  %v7025_v0 = vsel %vm5026_vm4, %v6943_v2, -inf  ;;  %v7030_v38 = vmax.f32 %v7028_v53, %v7029_v39  ;;  %v9416_v46 = vld [vmem:[%s14424_s7 + $0xf8] sm:$0xff]  ;;  %v9420_v39 = vld [vmem:[%s14424_s7 + $0x48] sm:$0xff]  ;;  %v9421_v21 = vld [vmem:[%s14424_s7 + $0x50] sm:$0xff] }
 0x5e0   : > { %v7027_v23 = vmax.f32 %v7025_v0, %v7026_v52  ;;  %v10898_v62 = vpack.c.bf16 %v9414_v41, %v9413_v32  ;;  %v10902_v52 = vpack.c.bf16 %v9416_v46, %v9415_v25  ;;  %v10906_v2 = vpack.c.bf16 %v9420_v39, %v9419_v63  ;;  %v7620_v18 = vld [vmem:[#allocation4 + $0x2] sm:$0xf]  ;;  %v9438_v14 = vld [vmem:[%s14426_s9] ss:$0 sm:$0xff] }
 0x5e1   : > { %v7031_v37 = vsel %vm5026_vm4, %v6957_v54, -inf  ;;  %v7621_v54 = vld [vmem:[#allocation4 + $0xa] sm:$0xf] }
 0x5e2   : > { %v7033_v45 = vmax.f32 %v7031_v37, %v7032_v34  ;;  %v7066_v4 = vsel %vm5303_vm5, %v7027_v23, %v7024_v49  ;;  %v9422_v34 = vld [vmem:[%s14424_s7 + $0x58] sm:$0xff]  ;;  %v7635_v53 = vcombine.low %v7620_v18, %v7621_v54  ;;  %v9425_v23 = vld [vmem:[%s14424_s7 + $0xa0] sm:$0xff] }
 0x5e3   : > { %v7067_v17 = vsel %vm5305_vm6, %v7030_v38, %v7066_v4  ;;  %v10910_v0 = vpack.c.bf16 %v9422_v34, %v9421_v21  ;;  %v9426_v38 = vld [vmem:[%s14424_s7 + $0xa8] sm:$0xff]  ;;  %v9427_v4 = vld [vmem:[%s14424_s7 + $0xb0] sm:$0xff] }
 0x5e4   : > { %v7068_v27 = vsel %vm5307_vm7, %v7033_v45, %v7067_v17  ;;  %v10914_v37 = vpack.c.bf16 %v9426_v38, %v9425_v23  ;;  %v7623_v45 = vld [vmem:[#allocation4 + $0x1a] sm:$0xf]  ;;  %v9428_v17 = vld [vmem:[%s14424_s7 + $0xb8] sm:$0xff] }
 0x5e5   : > { %7078 = vst.msk [vmem:[#allocation4 + $0x21] sm:$0xf] %vm7074_vm13, %v7068_v27  ;;  %v7622_v27 = vld [vmem:[#allocation4 + $0x12] sm:$0xf]  ;;  %v10918_v22 = vpack.c.bf16 %v9428_v17, %v9427_v4 }
 0x5e6   : > { %v7636_v9 = vcombine.low %v7622_v27, %v7623_v45  ;;  %v7724_v33 = vcombine.low %v7621_v54, %v7622_v27 }
 0x5ec   : > { %v7083_v15 = vld [vmem:[#allocation4 + $0x20] sm:$0xf] }
 0x5ed   : > { %v7099_v29 = vcombine.low %v7082_v31, %v7083_v15  ;;  %v7267_v26 = vcombine.low %v7083_v15, %v7084_v47  ;;  %v7351_v35 = vld [vmem:[#allocation4 + $0x21] sm:$0xf]  ;;  %v9431_v31 = vld [vmem:[%s14424_s7 + $0x100] sm:$0xff]  ;;  %v9432_v15 = vld [vmem:[%s14424_s7 + $0x108] sm:$0xff] }
 0x5ee   : > { %v7452_v58 = vcombine.low %v7350_v8, %v7351_v35  ;;  %v7540_v49 = vcombine.low %v7351_v35, %v7352_v12  ;;  %v8052_v47 = vld [vmem:[#allocation9 + $0x78] sm:$0xff] }
 0x5ef   : > { %10597 = vmatmul.mubr.msk.f32.vlgmr.msra.gmra.mrb[40].mxu1 %vm5026_vm4, %v7099_v29  ;;  %v10922_v29 = vpack.c.bf16 %v9432_v15, %v9431_v31 }
 0x5f0   : > { %10869 = vmatpush3.bf16.msra.mxu1 %v14013_v10  ;;  %10607 = vmatprep.mubr.msk.f32.mxu1 %vm5026_vm4, %v7180_v24  ;;  %v9401_v10 = vld [vmem:[%s14424_s7 + $0x20] sm:$0xff]  ;;  %v9433_v24 = vld [vmem:[%s14424_s7 + $0x110] sm:$0xff] }
 0x5f1   : > { %10871 = vmatprep.subr.bf16.mxu1 %v10870_v43  ;;  %v10882_v30 = vpack.c.bf16 %v9402_v7, %v9401_v10  ;;  %v8051_v10 = vld [vmem:[#allocation9 + $0x70] sm:$0xff]  ;;  %v11571_v7 = vmov 0.0|0.0  }
 0x5f2   : > { %v10934_v55 = vpack.c.bf16 %v8052_v47, %v8051_v10 }
 0x5f4   : > { %10873 = vmatpush3.bf16.msra.mxu1 %v10870_v43  ;;  %v7624_v43 = vld [vmem:[#allocation4 + $0x22] sm:$0xf] }
 0x5f5   : > { %10875 = vmatprep.subr.bf16.mxu1 %v10874_v16  ;;  %v7725_v3 = vcombine.low %v7623_v45, %v7624_v43  ;;  %v7813_v56 = vcombine.low %v7624_v43, %v7625_v48 }
 0x5f7   : > { %10608 = vmatmul.mubr.msk.f32.vlgmr.msra.gmra.mrb[40].mxu1 %vm5026_vm4, %v7181_v36 }
 0x5f8   : > { %10877 = vmatpush3.bf16.msra.mxu1 %v10874_v16  ;;  %10618 = vmatprep.mubr.msk.f32.mxu1 %vm5026_vm4, %v7181_v36  ;;  %v10926_v16 = vpack.c.bf16 %v9434_v19, %v9433_v24  ;;  %v8049_v36 = vld [vmem:[#allocation9 + $0x60] sm:$0xff] }
 0x5f9   : > { %10879 = vmatprep.subr.bf16.mxu1 %v10878_v51 }
 0x5fc   : > { %10881 = vmatpush3.bf16.msra.mxu1 %v10878_v51  ;;  %v8050_v51 = vld [vmem:[#allocation9 + $0x68] sm:$0xff] }
 0x5fd   : > { %10883 = vmatprep.subr.bf16.mxu1 %v10882_v30 }
 0x5ff   : > { %10619 = vmatmul.mubr.msk.f32.vlgmr.msra.gmra.mrb[40].mxu1 %vm5026_vm4, %v7267_v26 }
 0x600   : > { %10885 = vmatpush3.bf16.msra.mxu1 %v10882_v30  ;;  %10629 = vmatprep.mubr.msk.f32.mxu1 %vm5026_vm4, %v7362_v20  ;;  %v10931_v30 = vpack.c.bf16 %v8050_v51, %v8049_v36 }
 0x601   : > { %10887 = vmatprep.subr.bf16.mxu1 %v10886_v42 }
 0x604   : > { %10889 = vmatpush3.bf16.msra.mxu1 %v10886_v42 }
 0x605   : > { %10891 = vmatprep.subr.bf16.mxu1 %v10890_v60 }
 0x607   : > { %10630 = vmatmul.mubr.msk.f32.vlgmr.msra.gmra.mrb[40].mxu1 %vm5026_vm4, %v7363_v61 }
 0x608   : > { %10893 = vmatpush3.bf16.msra.mxu1 %v10890_v60  ;;  %10640 = vmatprep.mubr.msk.f32.mxu1 %vm5026_vm4, %v7451_v50 }
 0x609   : > { %10895 = vmatprep.subr.bf16.mxu1 %v10894_v59 }
 0x60c   : > { %10897 = vmatpush3.bf16.msra.mxu1 %v10894_v59 }
 0x60d   : > { %10899 = vmatprep.subr.bf16.mxu1 %v10898_v62 }
 0x60f   : > { %10641 = vmatmul.mubr.msk.f32.vlgmr.msra.gmra.mrb[40].mxu1 %vm5026_vm4, %v7452_v58 }
 0x610   : > { %10901 = vmatpush3.bf16.msra.mxu1 %v10898_v62  ;;  %10651 = vmatprep.mubr.msk.f32.mxu1 %vm5026_vm4, %v7363_v61 }
 0x611   : > { %10903 = vmatprep.subr.bf16.mxu1 %v10902_v52 }
 0x614   : > { %10905 = vmatpush3.bf16.msra.mxu1 %v10902_v52 }
 0x615   : > { %10907 = vmatprep.subr.bf16.mxu1 %v10906_v2 }
 0x617   : > { %10652 = vmatmul.mubr.msk.f32.vlgmr.msra.gmra.mrb[40].mxu1 %vm5026_vm4, %v7540_v49 }
 0x618   : > { %10909 = vmatpush3.bf16.msra.mxu1 %v10906_v2  ;;  %10662 = vmatprep.mubr.msk.f32.mxu1 %vm5026_vm4, %v7635_v53 }
 0x619   : > { %10911 = vmatprep.subr.bf16.mxu1 %v10910_v0 }
 0x61c   : > { %10913 = vmatpush3.bf16.msra.mxu1 %v10910_v0 }
 0x61d   : > { %10915 = vmatprep.subr.bf16.mxu1 %v10914_v37 }
 0x61f   : > { %10663 = vmatmul.mubr.msk.f32.vlgmr.msra.gmra.mrb[40].mxu1 %vm5026_vm4, %v7636_v9 }
 0x620   : > { %10917 = vmatpush3.bf16.msra.mxu1 %v10914_v37  ;;  %10673 = vmatprep.mubr.msk.f32.mxu1 %vm5026_vm4, %v7724_v33 }
 0x621   : > { %10919 = vmatprep.subr.bf16.mxu1 %v10918_v22 }
 0x624   : > { %10921 = vmatpush3.bf16.msra.mxu1 %v10918_v22 }
 0x625   : > { %10923 = vmatprep.subr.bf16.mxu1 %v10922_v29 }
 0x627   : > { %10674 = vmatmul.mubr.msk.f32.vlgmr.msra.gmra.mrb[40].mxu1 %vm5026_vm4, %v7725_v3 }
 0x628   : > { %10925 = vmatpush3.bf16.msra.mxu1 %v10922_v29  ;;  %10684 = vmatprep.mubr.msk.f32.mxu1 %vm5026_vm4, %v7636_v9 }
 0x629   : > { %10927 = vmatprep.subr.bf16.mxu1 %v10926_v16 }
 0x62c   : > { %10929 = vmatpush3.bf16.msra.mxu1 %v10926_v16 }
 0x62d   : > { %10930 = vmatprep.subr.bf16.mxu1 %v11571_v7 }
 0x62f   : > { %10685 = vmatmul.mubr.msk.f32.vlgmr.msra.gmra.mrb[40].mxu1 %vm5026_vm4, %v7813_v56 }
 0x630   : > { %10695 = vmatprep.mubr.msk.f32.mxu1 %vm11572_vm14, %v14501_v1  ;;  %10932 = vmatpush3.bf16.msra.mxu1 %v10931_v30 }
 0x631   : > { %10933 = vmatprep.subr.bf16.mxu1 %v11571_v7 }
 0x634   : > { %10935 = vmatpush3.bf16.msra.mxu1 %v10934_v55 }
 0x635   : > { %10936 = vmatprep.subr.bf16.mxu1 %v11571_v7 }
 0x702   : > { %v10686_v44 = vpop.f32.mrb[40].mxu1 }
 0x703   : > { %v7901_v26 = vmul.f32 %v10686_v44, %v9437_v13  ;;  %v7882_v42 = vpop.f32.mrb[41].mxu1 }
 0x704   : > { %v7900_v20 = vmul.f32 %v9437_v13, %v7882_v42 }
 0x705   : > { %v7910_v40 = vadd.f32 %v9438_v14, %v7901_v26 }
 0x706   : > { %v7909_v11 = vadd.f32 %v9438_v14, %v7900_v20 }
 0x707   : > { %v7912_v60 = vmax.f32 %v7910_v40, 0.0 }
 0x708   : > { %v7911_v8 = vmax.f32 %v7909_v11, 0.0 }
 0x709   : > { %v7932_v57 = vcombine.high %v7912_v60, %v7912_v60  ;;  %v7939_v28 = vrot.slane %v7912_v60, %v12846_v6 }
 0x70a   : > { %v7915_v5 = vcombine.high %v7911_v8, %v7911_v8  ;;  %v7922_v61 = vrot.slane %v7911_v8, %v12846_v6 }
 0x70b   : > { %v7946_v59 = vrot.slane %v7932_v57, %v12846_v6  ;;  %v7947_v50 = vcombine.high %v7939_v28, %v7939_v28  ;;  %v7985_v32 = vsel %vm4129_vm3, %v7939_v28, -inf }
 0x70c   : > { %v7986_v41 = vrot.slane %v7985_v32, 4  ;;  %v7929_v62 = vrot.slane %v7915_v5, %v12846_v6  ;;  %v7930_v35 = vcombine.high %v7922_v61, %v7922_v61  ;;  %v7957_v25 = vsel %vm4129_vm3, %v7922_v61, -inf }
 0x70d   : > { %v7948_v46 = vcombine.high %v7946_v59, %v7946_v59  ;;  %v7992_v58 = vsel %vm4129_vm3, %v7947_v50, -inf  ;;  %v7999_v52 = vsel %vm4129_vm3, %v7946_v59, -inf  ;;  %v7958_v63 = vrot.slane %v7957_v25, 4 }
 0x70e   : > { %v7987_v39 = vmax.f32 %v7985_v32, %v7986_v41  ;;  %v7993_v2 = vrot.slane %v7992_v58, 4  ;;  %v8000_v12 = vrot.slane %v7999_v52, 4  ;;  %v7931_v21 = vcombine.high %v7929_v62, %v7929_v62 }
 0x70f   : > { %v8006_v34 = vsel %vm4129_vm3, %v7948_v46, -inf  ;;  %v7959_v18 = vmax.f32 %v7957_v25, %v7958_v63  ;;  %v7964_v54 = vsel %vm4129_vm3, %v7930_v35, -inf  ;;  %v7971_v49 = vsel %vm4129_vm3, %v7929_v62, -inf }
 0x710   : > { %v7988_v0 = vrot.slane %v7987_v39, 2  ;;  %v7994_v53 = vmax.f32 %v7992_v58, %v7993_v2  ;;  %v8001_v23 = vmax.f32 %v7999_v52, %v8000_v12  ;;  %v8007_v38 = vrot.slane %v8006_v34, 4 }
 0x711   : > { %v7960_v37 = vrot.slane %v7959_v18, 2  ;;  %v7965_v45 = vrot.slane %v7964_v54, 4  ;;  %v7972_v4 = vrot.slane %v7971_v49, 4  ;;  %v7978_v17 = vsel %vm4129_vm3, %v7931_v21, -inf }
 0x712   : > { %v7989_v27 = vmax.f32 %v7987_v39, %v7988_v0  ;;  %v7995_v9 = vrot.slane %v7994_v53, 2  ;;  %v8002_v22 = vrot.slane %v8001_v23, 2  ;;  %v8008_v33 = vmax.f32 %v8006_v34, %v8007_v38  ;;  %v8046_v38 = vld [vmem:[#allocation9 + $0x10] sm:$0xff] }
 0x713   : > { %v7961_v31 = vmax.f32 %v7959_v18, %v7960_v37  ;;  %v7966_v15 = vmax.f32 %v7964_v54, %v7965_v45  ;;  %v7973_v29 = vmax.f32 %v7971_v49, %v7972_v4  ;;  %v7979_v43 = vrot.slane %v7978_v17, 4  ;;  %v8044_v18 = vld [vmem:[#allocation9] sm:$0xff]  ;;  %v8045_v54 = vld [vmem:[#allocation9 + $0x8] sm:$0xff]  ;;  %v8047_v37 = vld [vmem:[#allocation9 + $0x18] sm:$0xff] }
 0x714   : > { %v7990_v24 = vrot.slane %v7989_v27, 1  ;;  %v7996_v19 = vmax.f32 %v7994_v53, %v7995_v9  ;;  %v8003_v3 = vmax.f32 %v8001_v23, %v8002_v22  ;;  %v8009_v16 = vrot.slane %v8008_v33, 2  ;;  %v8040_v45 = vld [vmem:[#allocation5] sm:$0x3] }
 0x715   : > { %v7967_v48 = vrot.slane %v7966_v15, 2  ;;  %v7974_v56 = vrot.slane %v7973_v29, 2  ;;  %v7980_v36 = vmax.f32 %v7978_v17, %v7979_v43  ;;  %v7962_v47 = vrot.slane %v7961_v31, 1  ;;  %v8218_v9 = vld [vmem:[#allocation9 + $0xc8] sm:$0xff] }
 0x716   : > { %v7997_v51 = vrot.slane %v7996_v19, 1  ;;  %v8004_v10 = vrot.slane %v8003_v3, 1  ;;  %v8010_v30 = vmax.f32 %v8008_v33, %v8009_v16  ;;  %v7991_v14 = vmax.f32 %v7989_v27, %v7990_v24  ;;  %v8217_v27 = vld [vmem:[#allocation9 + $0xc0] sm:$0xff] }
 0x717   : > { %v7968_v55 = vmax.f32 %v7966_v15, %v7967_v48  ;;  %v7975_v13 = vmax.f32 %v7973_v29, %v7974_v56  ;;  %v7981_v44 = vrot.slane %v7980_v36, 2  ;;  %v7963_v28 = vmax.f32 %v7961_v31, %v7962_v47  ;;  %v8219_v31 = vld [vmem:[#allocation9 + $0xd0] sm:$0xff]  ;;  %v8220_v15 = vld [vmem:[#allocation9 + $0xd8] sm:$0xff] }
 0x718   : > { %v7998_v26 = vmax.f32 %v7996_v19, %v7997_v51  ;;  %v8005_v42 = vmax.f32 %v8003_v3, %v8004_v10  ;;  %v8011_v20 = vrot.slane %v8010_v30, 1  ;;  %v8019_v50 = vsel %vm5026_vm4, %v7991_v14, -inf  ;;  %v8043_v29 = vld [vmem:[#allocation5 + $0xc] sm:$0x3]  ;;  %v8308_v19 = vld [vmem:[#allocation9 + $0x20] sm:$0xff]  ;;  %v8309_v3 = vld [vmem:[#allocation9 + $0x28] sm:$0xff] }
 0x719   : > { %v7969_v40 = vrot.slane %v7968_v55, 1  ;;  %v7976_v11 = vrot.slane %v7975_v13, 1  ;;  %v7982_v60 = vmax.f32 %v7980_v36, %v7981_v44  ;;  %v8013_v52 = vsel %vm5026_vm4, %v7963_v28, -inf  ;;  %v8310_v56 = vld [vmem:[#allocation9 + $0x30] sm:$0xff]  ;;  %v8311_v36 = vld [vmem:[#allocation9 + $0x38] sm:$0xff] }
 0x71a   : > { %v8012_v8 = vmax.f32 %v8010_v30, %v8011_v20  ;;  %v8020_v57 = vsel %vm5026_vm4, %v8005_v42, -inf  ;;  %v8022_v32 = vsel %vm5026_vm4, %v7998_v26, -inf  ;;  %v10937_v53 = vpack.c.bf16 %v8045_v54, %v8044_v18  ;;  %v8303_v51 = vld [vmem:[#allocation5 + $0x1] sm:$0x3]  ;;  %v8398_v26 = vld [vmem:[#allocation9 + $0x90] sm:$0xff]  ;;  %v8399_v42 = vld [vmem:[#allocation9 + $0x98] sm:$0xff] }
 0x71b   : > { %v7970_v5 = vmax.f32 %v7968_v55, %v7969_v40  ;;  %v7977_v61 = vmax.f32 %v7975_v13, %v7976_v11  ;;  %v7983_v59 = vrot.slane %v7982_v60, 1  ;;  %v8021_v62 = vmax.f32 %v8019_v50, %v8020_v57  ;;  %v8396_v55 = vld [vmem:[#allocation9 + $0x80] sm:$0xff]  ;;  %v8397_v13 = vld [vmem:[#allocation9 + $0x88] sm:$0xff]  ;;  %v8664_v54 = vld [vmem:[#allocation9 + $0xb0] sm:$0xff] }
 0x71c   : > { %v8023_v41 = vsel %vm5026_vm4, %v8012_v8, -inf  ;;  %v10940_v4 = vpack.c.bf16 %v8047_v37, %v8046_v38  ;;  %v10943_v22 = vpack.c.bf16 %v8218_v9, %v8217_v27  ;;  %v10946_v43 = vpack.c.bf16 %v8220_v15, %v8219_v31  ;;  %v8484_v8 = vld [vmem:[#allocation9 + $0xe8] sm:$0xff]  ;;  %v8749_v38 = vld [vmem:[#allocation9 + $0x100] sm:$0xff]  ;;  %v8752_v27 = vld [vmem:[#allocation9 + $0x118] sm:$0xff] }
 0x71d   : > { %v8024_v35 = vmax.f32 %v8022_v32, %v8023_v41  ;;  %v7984_v25 = vmax.f32 %v7982_v60, %v7983_v59  ;;  %v8014_v46 = vsel %vm5026_vm4, %v7977_v61, -inf  ;;  %v8016_v63 = vsel %vm5026_vm4, %v7970_v5, -inf  ;;  %v8483_v60 = vld [vmem:[#allocation9 + $0xe0] sm:$0xff]  ;;  %v8485_v5 = vld [vmem:[#allocation9 + $0xf0] sm:$0xff]  ;;  %v8486_v61 = vld [vmem:[#allocation9 + $0xf8] sm:$0xff] }
 0x71e   : > { %v8015_v2 = vmax.f32 %v8013_v52, %v8014_v46  ;;  %v10949_v16 = vpack.c.bf16 %v8309_v3, %v8308_v19  ;;  %v10952_v30 = vpack.c.bf16 %v8311_v36, %v8310_v56  ;;  %v10955_v44 = vpack.c.bf16 %v8397_v13, %v8396_v55  ;;  %v8306_v59 = vld [vmem:[#allocation5 + $0xd] sm:$0x3]  ;;  %v8574_v41 = vld [vmem:[#allocation9 + $0x40] sm:$0xff]  ;;  %v8576_v46 = vld [vmem:[#allocation9 + $0x50] sm:$0xff] }
 0x71f   : > { %v8034_v58 = vsel %vm5303_vm5, %v8024_v35, %v8021_v62  ;;  %v8017_v39 = vsel %vm5026_vm4, %v7984_v25, -inf  ;;  %v10958_v40 = vpack.c.bf16 %v8399_v42, %v8398_v26  ;;  %v10961_v57 = vpack.c.bf16 %v8484_v8, %v8483_v60  ;;  %v8575_v62 = vld [vmem:[#allocation9 + $0x48] sm:$0xff]  ;;  %v8572_v9 = vld [vmem:[#allocation5 + $0xe] sm:$0x3] }
 0x720   : > { %8039 = vst.msk [vmem:[#allocation5 + $0x9] sm:$0x3] %vm4129_vm3, %v8034_v58  ;;  %v8018_v12 = vmax.f32 %v8016_v63, %v8017_v39  ;;  %v10964_v50 = vpack.c.bf16 %v8486_v61, %v8485_v5  ;;  %v10967_v35 = vpack.c.bf16 %v8575_v62, %v8574_v41  ;;  %v8577_v58 = vld [vmem:[#allocation9 + $0x58] sm:$0xff]  ;;  %v8569_v52 = vld [vmem:[#allocation5 + $0x2] sm:$0x3] }
 0x721   : > { %v10970_v39 = vpack.c.bf16 %v8577_v58, %v8576_v46  ;;  %v8750_v37 = vld [vmem:[#allocation9 + $0x108] sm:$0xff] }
 0x722   : > { %v8033_v21 = vsel %vm5303_vm5, %v8018_v12, %v8015_v2  ;;  %v8662_v12 = vld [vmem:[#allocation9 + $0xa0] sm:$0xff]  ;;  %v9448_v15 = vld [vmem:[%s14428_s11] ss:$0 sm:$0xff] }
 0x723   : > { %8038 = vst.msk [vmem:[#allocation5 + $0x5] sm:$0x3] %vm4129_vm3, %v8033_v21  ;;  %v8663_v21 = vld [vmem:[#allocation9 + $0xa8] sm:$0xff] }
 0x727   : > { %v8042_v34 = vld [vmem:[#allocation5 + $0x8] sm:$0x3] }
 0x728   : > { %v8222_v24 = vcombine.low %v8042_v34, %v8043_v29  ;;  %v8305_v20 = vld [vmem:[#allocation5 + $0x9] sm:$0x3] }
 0x729   : > { %v8488_v32 = vcombine.low %v8305_v20, %v8306_v59 }
 0x72a   : > { %v8041_v49 = vld [vmem:[#allocation5 + $0x4] sm:$0x3]  ;;  %v8229_v48 = vrot.slane %v8222_v24, %v12846_v6  ;;  %v8570_v63 = vld [vmem:[#allocation5 + $0x6] sm:$0x3] }
 0x72b   : > { %v8055_v0 = vcombine.low %v8041_v49, %v8042_v34  ;;  %v8136_v17 = vcombine.low %v8040_v45, %v8041_v49  ;;  %v8304_v10 = vld [vmem:[#allocation5 + $0x5] sm:$0x3]  ;;  %v8495_v25 = vrot.slane %v8488_v32, %v12846_v6  ;;  %v8580_v2 = vcombine.low %v8569_v52, %v8570_v63  ;;  %v8665_v49 = vld [vmem:[#allocation9 + $0xb8] sm:$0xff] }
 0x72c   : > { %v8314_v47 = vcombine.low %v8303_v51, %v8304_v10  ;;  %v8401_v11 = vcombine.low %v8304_v10, %v8305_v20  ;;  %v10973_v34 = vpack.c.bf16 %v8663_v21, %v8662_v12  ;;  %v10979_v45 = vpack.c.bf16 %v8750_v37, %v8749_v38 }
 0x72d   : > { %v8062_v23 = vrot.slane %v8055_v0, %v12846_v6  ;;  %v8143_v33 = vrot.slane %v8136_v17, %v12846_v6  ;;  %v8587_v18 = vrot.slane %v8580_v2, %v12846_v6  ;;  %v8571_v0 = vld [vmem:[#allocation5 + $0xa] sm:$0x3] }
 0x72e   : > { %v8321_v14 = vrot.slane %v8314_v47, %v12846_v6  ;;  %v8408_v28 = vrot.slane %v8401_v11, %v12846_v6  ;;  %v8751_v17 = vld [vmem:[#allocation9 + $0x110] sm:$0xff] }
 0x72f   : > { %10696 = vmatmul.mubr.msk.f32.vlgmr.msra.gmra.mrb[42].mxu1 %vm5026_vm4, %v8062_v23  ;;  %v8667_v23 = vcombine.low %v8570_v63, %v8571_v0 }
 0x730   : > { %10938 = vmatpush3.bf16.msra.mxu1 %v10937_v53  ;;  %10706 = vmatprep.mubr.msk.f32.mxu1 %vm11572_vm14, %v14501_v1  ;;  %v10976_v53 = vpack.c.bf16 %v8665_v49, %v8664_v54 }
 0x731   : > { %10939 = vmatprep.subr.bf16.mxu1 %v11571_v7 }
 0x734   : > { %10941 = vmatpush3.bf16.msra.mxu1 %v10940_v4  ;;  %v8674_v4 = vrot.slane %v8667_v23, %v12846_v6 }
 0x735   : > { %10942 = vmatprep.subr.bf16.mxu1 %v11571_v7 }
 0x737   : > { %10707 = vmatmul.mubr.msk.f32.vlgmr.msra.gmra.mrb[42].mxu1 %vm5026_vm4, %v8143_v33  ;;  %v8754_v33 = vcombine.low %v8571_v0, %v8572_v9 }
 0x738   : > { %10944 = vmatpush3.bf16.msra.mxu1 %v10943_v22  ;;  %10717 = vmatprep.mubr.msk.f32.mxu1 %vm11572_vm14, %v14501_v1  ;;  %v10982_v22 = vpack.c.bf16 %v8752_v27, %v8751_v17 }
 0x739   : > { %10945 = vmatprep.subr.bf16.mxu1 %v11571_v7  ;;  %v8761_v31 = vrot.slane %v8754_v33, %v12846_v6 }
 0x73c   : > { %10947 = vmatpush3.bf16.msra.mxu1 %v10946_v43  ;;  %v9449_v43 = vld [vmem:[%s14429_s12] ss:$0 sm:$0xff] }
 0x73d   : > { %10948 = vmatprep.subr.bf16.mxu1 %v11571_v7 }
 0x73f   : > { %10718 = vmatmul.mubr.msk.f32.vlgmr.msra.gmra.mrb[42].mxu1 %vm5026_vm4, %v8229_v48 }
 0x740   : > { %10950 = vmatpush3.bf16.msra.mxu1 %v10949_v16  ;;  %10728 = vmatprep.mubr.msk.f32.mxu1 %vm11572_vm14, %v14501_v1 }
 0x741   : > { %10951 = vmatprep.subr.bf16.mxu1 %v11571_v7 }
 0x744   : > { %10953 = vmatpush3.bf16.msra.mxu1 %v10952_v30 }
 0x745   : > { %10954 = vmatprep.subr.bf16.mxu1 %v11571_v7 }
 0x747   : > { %10729 = vmatmul.mubr.msk.f32.vlgmr.msra.gmra.mrb[42].mxu1 %vm5026_vm4, %v8321_v14 }
 0x748   : > { %10956 = vmatpush3.bf16.msra.mxu1 %v10955_v44  ;;  %10739 = vmatprep.mubr.msk.f32.mxu1 %vm11572_vm14, %v14501_v1 }
 0x749   : > { %10957 = vmatprep.subr.bf16.mxu1 %v11571_v7 }
 0x74c   : > { %10959 = vmatpush3.bf16.msra.mxu1 %v10958_v40 }
 0x74d   : > { %10960 = vmatprep.subr.bf16.mxu1 %v11571_v7 }
 0x74f   : > { %10740 = vmatmul.mubr.msk.f32.vlgmr.msra.gmra.mrb[42].mxu1 %vm5026_vm4, %v8408_v28 }
 0x750   : > { %10962 = vmatpush3.bf16.msra.mxu1 %v10961_v57  ;;  %10750 = vmatprep.mubr.msk.f32.mxu1 %vm11572_vm14, %v14501_v1 }
 0x751   : > { %10963 = vmatprep.subr.bf16.mxu1 %v11571_v7 }
 0x754   : > { %10965 = vmatpush3.bf16.msra.mxu1 %v10964_v50 }
 0x755   : > { %10966 = vmatprep.subr.bf16.mxu1 %v11571_v7 }
 0x757   : > { %10751 = vmatmul.mubr.msk.f32.vlgmr.msra.gmra.mrb[42].mxu1 %vm5026_vm4, %v8495_v25 }
 0x758   : > { %10968 = vmatpush3.bf16.msra.mxu1 %v10967_v35  ;;  %10761 = vmatprep.mubr.msk.f32.mxu1 %vm11572_vm14, %v14501_v1 }
 0x759   : > { %10969 = vmatprep.subr.bf16.mxu1 %v11571_v7 }
 0x75c   : > { %10971 = vmatpush3.bf16.msra.mxu1 %v10970_v39 }
 0x75d   : > { %10972 = vmatprep.subr.bf16.mxu1 %v11571_v7 }
 0x75f   : > { %10762 = vmatmul.mubr.msk.f32.vlgmr.msra.gmra.mrb[42].mxu1 %vm5026_vm4, %v8587_v18 }
 0x760   : > { %10974 = vmatpush3.bf16.msra.mxu1 %v10973_v34  ;;  %10772 = vmatprep.mubr.msk.f32.mxu1 %vm11572_vm14, %v14501_v1 }
 0x761   : > { %10975 = vmatprep.subr.bf16.mxu1 %v11571_v7 }
 0x764   : > { %10977 = vmatpush3.bf16.msra.mxu1 %v10976_v53 }
 0x765   : > { %10978 = vmatprep.subr.bf16.mxu1 %v11571_v7 }
 0x767   : > { %10773 = vmatmul.mubr.msk.f32.vlgmr.msra.gmra.mrb[42].mxu1 %vm5026_vm4, %v8674_v4 }
 0x768   : > { %10980 = vmatpush3.bf16.msra.mxu1 %v10979_v45  ;;  %10783 = vmatprep.mubr.msk.f32.mxu1 %vm11572_vm14, %v14501_v1 }
 0x769   : > { %10981 = vmatprep.subr.bf16.mxu1 %v11571_v7 }
 0x76c   : > { %10983 = vmatpush3.bf16.msra.mxu1 %v10982_v22 }
 0x76f   : > { %10784 = vmatmul.mubr.msk.f32.vlgmr.msra.gmra.mrb[42].mxu1 %vm5026_vm4, %v8761_v31 }
 0x842   : > { %v8830_v29 = vpop.f32.mrb[42].mxu1 }
 0x843   : > { %v8842_v24 = vmul.f32 %v9448_v15, %v8830_v29  ;;  %v10785_v1 = vpop.f32.mrb[43].mxu1 }
 0x845   : > { %v8850_v19 = vadd.f32 %v9449_v43, %v8842_v24 }
 0x847   : > { %v8851_v7 = vmax.f32 %v8850_v19, 0.0 }
 0x849   : > { %v8859_v3 = vrot.slane %v8851_v7, %v12846_v6 }
 0x84b   : > { %v8860_v16 = vcombine.high %v8859_v3, %v8859_v3  ;;  %v8863_v48 = vsel %vm4129_vm3, %v8859_v3, -inf }
 0x84c   : > { %v8864_v56 = vrot.slane %v8863_v48, 4 }
 0x84d   : > { %v8870_v36 = vsel %vm4129_vm3, %v8860_v16, -inf }
 0x84e   : > { %v8865_v51 = vmax.f32 %v8863_v48, %v8864_v56  ;;  %v8871_v10 = vrot.slane %v8870_v36, 4 }
 0x850   : > { %v8866_v30 = vrot.slane %v8865_v51, 2  ;;  %v8872_v47 = vmax.f32 %v8870_v36, %v8871_v10 }
 0x852   : > { %v8867_v55 = vmax.f32 %v8865_v51, %v8866_v30  ;;  %v8873_v13 = vrot.slane %v8872_v47, 2 }
 0x854   : > { %v8868_v44 = vrot.slane %v8867_v55, 1  ;;  %v8874_v14 = vmax.f32 %v8872_v47, %v8873_v13 }
 0x856   : > { %v8869_v26 = vmax.f32 %v8867_v55, %v8868_v44  ;;  %v8875_v42 = vrot.slane %v8874_v14, 1 }
 0x858   : > { %v8876_v6 = vmax.f32 %v8874_v14, %v8875_v42  ;;  %v8877_v20 = vsel %vm5026_vm4, %v8869_v26, -inf }
 0x85a   : > { %v8878_v40 = vsel %vm5026_vm4, %v8876_v6, -inf }
 0x85b   : > { %v8879_v11 = vmax.f32 %v8877_v20, %v8878_v40 }
 0x85d   : > { %8881 = vst.msk [vmem:[%s462_s22] sm:$0x1] %vm8880_vm15, %v8879_v11 }
 0x85e   : > { %11504 = shalt.err (!%p11501_p11)
}
 0x85f   : > { %s11505_s19 = scalar_lea.hbm %s14375_s23, 16  ;;  %s11509_s24 = scalar_lea.hbm %s14503_s20, 32 }
 0x860   : > { %p11506_p13 = scmp.ne.s32.totalorder %s14375_s23, %s11505_s19  ;;  %p11510_p6 = scmp.lt.u32.totalorder %s14375_s23, %s14503_s20 }
 0x861   : > { %p11511_p9 = scmp.lt.u32.totalorder %s11509_s24, %s11505_s19  ;;  %p11513_p12 = scmp.lt.u32.totalorder %s11505_s19, %s14375_s23 }
 0x862   : > { %p11507_p0 = pnand %p11506_p13, %p14504_p1 }
 0x863   : > { %p11512_p10 = por %p11511_p9, %p11510_p6 }
 0x864   : > { %p11508_p5 = pneg %p11507_p0 }
 0x865   : > { %p11514_p2 = por %p11513_p12, %p11512_p10 }
 0x867   : > { %p11515_p3 = pnand %p11514_p2, %p11508_p5 }
 0x869   : > { %11518 = shalt.err (!%p11515_p3)
}
 0x86a   : > { %11346 = dma.vmem_to_hbm [thread:$0]  (%p14504_p1), %s14377_s13, 16, %s14375_s23, %s8883_s29  }
 0x86b PF: > { %s14505_s28 = sld [smem:[#allocation17_spill]]  ;;  %s14506_s27 = sld [smem:[#allocation15_spill]] }
 0x86c   : > { %s14507_s30 = sld [smem:[#allocation20_spill]] }
 0x871   : > { %p11363_p4 = scmp.ge.s32.totalorder %s14505_s28, 2  ;;  %s8907_s15 = sand.u32 1, %s14506_s27  }
 0x872   : > { %p14508_p7 = scmp.ne.s32.totalorder %s14507_s30, 0  ;;  %s8908_s14 = scalar_lea.sflag [#allocation8], %s8907_s15 }
 0x874   : > { %p11356_p8 = pnand %p11363_p4, %p14508_p7 }
 0x876   : > { %11544 = dma.done.wait (!%p11356_p8), %s8908_s14, 16  }
 0x877   : > { %11546 = vsyncadd (!%p11356_p8), %s8908_s14, 4294967280  ;;  %s14509_s28 = sld [smem:[#allocation18_spill]]  ;;  %s14510_s17 = sld [smem:[#allocation16_spill]] }
 0x878   : > { %s14511_s27 = sld [smem:[#allocation19_spill]]  ;;  %s14512_s25 = smov %s11553_s26 }
 0x87d   : > { %p25_p11 = scmp.ge.s32.totalorder %s14509_s28, 4   ;;  %s14513_s26 = smov %s14510_s17 }
 0x87f   :  { %27 = sbr.rel (!%p25_p11) target bundleno = 7 (0x7), region = 152 }
 0x886   :  { %8912 = vsyncpa [#allocation7], 1 }
 0x887   :  { %8914 = vsyncpa [#allocation7 + $0x1], 1 }
 0x888   :  { %8915 = vsyncpa [#allocation10], 1 }
 0x889   :  { %8916 = vsyncpa [#allocation8], 1 }
 0x88a   :  { %8918 = vsyncpa [#allocation8 + $0x1], 1 }

</bundles_post_ra>
